<compile_context>
chip_gen: v6e
topology: v6e:2x2x1
jax: 0.10.0
libtpu: 0.0.40
codegen_flags: <defaults>
</compile_context>

<pallas_src>
import functools

import jax
import jax.numpy as jnp
from jax.experimental import pallas as pl
from jax.experimental.pallas import tpu as pltpu


def _lstm_kernel(x2d_ref,   # (S*Bp, I)  f32, time-major flattened input
                 wih1_ref,  # (I, 4H)    bf16 (W_ih_l0^T)
                 whh1_ref,  # (H, 4H)    bf16 (W_hh_l0^T)
                 b1_ref,    # (1, 4H)    f32  (b_ih_l0 + b_hh_l0)
                 w2ih_ref,  # (H, 4H)    bf16 (W_ih_l1^T)
                 w2hh_ref,  # (H, 4H)    bf16 (W_hh_l1^T)
                 b2_ref,    # (1, 4H)    f32  (b_ih_l1 + b_hh_l1)
                 wfc_ref,   # (H, Cp)    bf16 (lane-padded)
                 bfc_ref,   # (1, Cp)    f32  (lane-padded)
                 out_ref,   # (Bp, Cp)   f32
                 gx_ref,    # (S*Bp, 4H) f32 scratch: hoisted layer-1 input projection
                 *, seq_len, batch, hidden):
    S, Bp, H = seq_len, batch, hidden

    # Hoisted, non-recurrent part of layer 1: one big matmul for all timesteps at once.
    gx_ref[...] = (
        jnp.dot(x2d_ref[...].astype(jnp.bfloat16), wih1_ref[...],
                preferred_element_type=jnp.float32)
        + b1_ref[...])

    # Hoist the bias-2 broadcast once; JAX does not CSE broadcast_in_dim, so leaving it
    # inside the unrolled loop would emit S separate broadcasts on the recurrent path.
    b2b = jnp.broadcast_to(b2_ref[...], (Bp, 4 * H))

    h1 = jnp.zeros((Bp, H), jnp.float32)
    c1 = jnp.zeros((Bp, H), jnp.float32)
    h2 = jnp.zeros((Bp, H), jnp.float32)
    c2 = jnp.zeros((Bp, H), jnp.float32)

    def gates_to_hc(gates, c_prev):
        # PyTorch gate order: i, f, g, o. Gate math stays f32 (v5e VPU/EUP have no bf16).
        i_g = jax.nn.sigmoid(gates[:, 0 * H:1 * H])
        f_g = jax.nn.sigmoid(gates[:, 1 * H:2 * H])
        g_g = jnp.tanh(gates[:, 2 * H:3 * H])
        o_g = jax.nn.sigmoid(gates[:, 3 * H:4 * H])
        c_new = f_g * c_prev + i_g * g_g
        h_new = o_g * jnp.tanh(c_new)
        return h_new, c_new

    # Fully unrolled recurrence (S is small & static): single grid step, static slices only.
    # Weight refs are indexed at the use site (not hoisted into SSA values) so regalloc
    # keeps short vld->vmatmul live ranges instead of spilling weights across steps.
    for t in range(S):
        gx_t = gx_ref[pl.ds(t * Bp, Bp), :]                  # tile-aligned static slice
        g1 = gx_t + jnp.dot(h1.astype(jnp.bfloat16), whh1_ref[...],
                            preferred_element_type=jnp.float32)
        h1, c1 = gates_to_hc(g1, c1)

        # Layer 2: two dots (no per-step lane-dim concat/repack of [h1 | h2]).
        g2 = (jnp.dot(h1.astype(jnp.bfloat16), w2ih_ref[...],
                      preferred_element_type=jnp.float32)
              + jnp.dot(h2.astype(jnp.bfloat16), w2hh_ref[...],
                        preferred_element_type=jnp.float32)
              + b2b)
        h2, c2 = gates_to_hc(g2, c2)

    # Final Linear on the last timestep's layer-2 hidden state; lane-dense (Cp=128) store.
    out_ref[...] = (jnp.dot(h2.astype(jnp.bfloat16), wfc_ref[...],
                            preferred_element_type=jnp.float32)
                    + bfc_ref[...]).astype(out_ref.dtype)


def lstm_model_forward(x, params, *, hidden_size, num_classes):
    """x: (batch, seq, input_size) float32. Returns (batch, num_classes) float32."""
    B, S, I = x.shape
    H = hidden_size
    C = num_classes
    Bp = 8 * pl.cdiv(B, 8)        # pad batch to a full f32 sublane tile
    Cp = 128 * pl.cdiv(C, 128)    # lane-dense output slab

    # Pad batch, go time-major and flatten so timestep t occupies rows [t*Bp, (t+1)*Bp)
    # -> every per-step slice inside the kernel is a tile-aligned contiguous block.
    x_p = jnp.zeros((Bp, S, I), x.dtype).at[:B].set(x)
    x2d = jnp.transpose(x_p, (1, 0, 2)).reshape(S * Bp, I)

    wdt = jnp.bfloat16  # MXU operands bf16, f32 accumulation; states/activations stay f32
    wih1 = params["w_ih_l0"].T.astype(wdt)                                   # (I, 4H)
    whh1 = params["w_hh_l0"].T.astype(wdt)                                   # (H, 4H)
    b1 = (params["b_ih_l0"] + params["b_hh_l0"]).reshape(1, 4 * H)
    w2ih = params["w_ih_l1"].T.astype(wdt)                                   # (H, 4H)
    w2hh = params["w_hh_l1"].T.astype(wdt)                                   # (H, 4H)
    b2 = (params["b_ih_l1"] + params["b_hh_l1"]).reshape(1, 4 * H)
    wfc = jnp.zeros((H, Cp), jnp.float32).at[:, :C].set(params["w_fc"].T).astype(wdt)
    bfc = jnp.zeros((1, Cp), jnp.float32).at[:, :C].set(params["b_fc"].reshape(1, C))

    kernel = functools.partial(_lstm_kernel, seq_len=S, batch=Bp, hidden=H)

    full = lambda i: (0, 0)
    grid_spec = pltpu.PrefetchScalarGridSpec(
        num_scalar_prefetch=0,
        grid=(1,),    # single invocation: the whole recurrence lives inside the kernel
        in_specs=[
            pl.BlockSpec((S * Bp, I), full),
            pl.BlockSpec((I, 4 * H), full),
            pl.BlockSpec((H, 4 * H), full),
            pl.BlockSpec((1, 4 * H), full),
            pl.BlockSpec((H, 4 * H), full),
            pl.BlockSpec((H, 4 * H), full),
            pl.BlockSpec((1, 4 * H), full),
            pl.BlockSpec((H, Cp), full),
            pl.BlockSpec((1, Cp), full),
        ],
        out_specs=pl.BlockSpec((Bp, Cp), full),
        scratch_shapes=[pltpu.VMEM((S * Bp, 4 * H), jnp.float32)],
    )

    out_p = pl.pallas_call(
        kernel,
        out_shape=jax.ShapeDtypeStruct((Bp, Cp), jnp.float32),
        grid_spec=grid_spec,
        compiler_params=pltpu.CompilerParams(
            dimension_semantics=("arbitrary",)),
    )(x2d, wih1, whh1, b1, w2ih, w2hh, b2, wfc, bfc)

    return out_p[:B, :C]


def _reference_forward(x, params, *, hidden_size):
    """Pure-JAX f32 reference of the PyTorch forward (for the correctness check)."""
    H = hidden_size
    B = x.shape[0]

    def cell(carry, x_t, wih, whh, b_ih, b_hh):
        h, c = carry
        gates = x_t @ wih.T + h @ whh.T + b_ih + b_hh
        i = jax.nn.sigmoid(gates[:, 0 * H:1 * H])
        f = jax.nn.sigmoid(gates[:, 1 * H:2 * H])
        g = jnp.tanh(gates[:, 2 * H:3 * H])
        o = jax.nn.sigmoid(gates[:, 3 * H:4 * H])
        c = f * c + i * g
        h = o * jnp.tanh(c)
        return (h, c), h

    def run_layer(seq_in, wih, whh, b_ih, b_hh):
        init = (jnp.zeros((B, H), jnp.float32), jnp.zeros((B, H), jnp.float32))
        (_, _), ys = jax.lax.scan(
            lambda carry, x_t: cell(carry, x_t, wih, whh, b_ih, b_hh),
            init, jnp.transpose(seq_in, (1, 0, 2)))
        return jnp.transpose(ys, (1, 0, 2))

    out1 = run_layer(x, params["w_ih_l0"], params["w_hh_l0"],
                     params["b_ih_l0"], params["b_hh_l0"])
    out2 = run_layer(out1, params["w_ih_l1"], params["w_hh_l1"],
                     params["b_ih_l1"], params["b_hh_l1"])
    return out2[:, -1, :] @ params["w_fc"].T + params["b_fc"]


def init_params(key, input_size, hidden_size, num_classes):
    H = hidden_size
    k = 1.0 / jnp.sqrt(jnp.float32(H))
    keys = jax.random.split(key, 10)
    u = lambda kk, shape: jax.random.uniform(kk, shape, jnp.float32, -k, k)
    return {
        "w_ih_l0": u(keys[0], (4 * H, input_size)),
        "w_hh_l0": u(keys[1], (4 * H, H)),
        "b_ih_l0": u(keys[2], (4 * H,)),
        "b_hh_l0": u(keys[3], (4 * H,)),
        "w_ih_l1": u(keys[4], (4 * H, H)),
        "w_hh_l1": u(keys[5], (4 * H, H)),
        "b_ih_l1": u(keys[6], (4 * H,)),
        "b_hh_l1": u(keys[7], (4 * H,)),
        "w_fc":    u(keys[8], (num_classes, H)),
        "b_fc":    u(keys[9], (num_classes,)),
    }


if __name__ == "__main__":
    INPUT_SIZE = 28
    HIDDEN_SIZE = 128
    NUM_CLASSES = 10
    BATCH = 4
    SEQ = 8

    root = jax.random.PRNGKey(0)
    kx, kp = jax.random.split(root)
    x = jax.random.normal(kx, (BATCH, SEQ, INPUT_SIZE), jnp.float32)
    params = init_params(kp, INPUT_SIZE, HIDDEN_SIZE, NUM_CLASSES)

    out = lstm_model_forward(x, params, hidden_size=HIDDEN_SIZE,
                             num_classes=NUM_CLASSES)
    out = jax.block_until_ready(out)

    ref = jax.block_until_ready(
        _reference_forward(x, params, hidden_size=HIDDEN_SIZE))

    assert out.shape == (BATCH, NUM_CLASSES), out.shape
    # Tolerance covers bf16 MXU weights (f32 accumulation / f32 gate math).
    assert jnp.allclose(out, ref, atol=2e-2, rtol=2e-2), (
        float(jnp.max(jnp.abs(out - ref))))
    print("KERNEL_OK")
</pallas_src>

<mosaic_0001>
module attributes {stable_mosaic.version = 11 : i64} {
  func.func @_lstm_kernel(%arg0: i32, %arg1: memref<64x28xf32, #tpu.memory_space<vmem>>, %arg2: memref<28x512xbf16, #tpu.memory_space<vmem>>, %arg3: memref<128x512xbf16, #tpu.memory_space<vmem>>, %arg4: memref<1x512xf32, #tpu.memory_space<vmem>>, %arg5: memref<128x512xbf16, #tpu.memory_space<vmem>>, %arg6: memref<128x512xbf16, #tpu.memory_space<vmem>>, %arg7: memref<1x512xf32, #tpu.memory_space<vmem>>, %arg8: memref<128x128xbf16, #tpu.memory_space<vmem>>, %arg9: memref<1x128xf32, #tpu.memory_space<vmem>>, %arg10: memref<8x128xf32, #tpu.memory_space<vmem>>, %arg11: memref<64x512xf32, #tpu.memory_space<vmem>>) attributes {dimension_semantics = [#tpu.dimension_semantics<arbitrary>], iteration_bounds = array<i64: 1>, scalar_prefetch = 0 : i64, scratch_operands = 1 : i64, tpu.core_type = #tpu.core_type<tc>, window_params = [{pipeline_mode = #tpu.pipeline_mode<synchronous>, transform_indices = @transform_0, window_bounds = array<i64: 64, 28>}, {pipeline_mode = #tpu.pipeline_mode<synchronous>, transform_indices = @transform_1, window_bounds = array<i64: 28, 512>}, {pipeline_mode = #tpu.pipeline_mode<synchronous>, transform_indices = @transform_2, window_bounds = array<i64: 128, 512>}, {pipeline_mode = #tpu.pipeline_mode<synchronous>, transform_indices = @transform_3, window_bounds = array<i64: 1, 512>}, {pipeline_mode = #tpu.pipeline_mode<synchronous>, transform_indices = @transform_4, window_bounds = array<i64: 128, 512>}, {pipeline_mode = #tpu.pipeline_mode<synchronous>, transform_indices = @transform_5, window_bounds = array<i64: 128, 512>}, {pipeline_mode = #tpu.pipeline_mode<synchronous>, transform_indices = @transform_6, window_bounds = array<i64: 1, 512>}, {pipeline_mode = #tpu.pipeline_mode<synchronous>, transform_indices = @transform_7, window_bounds = array<i64: 128, 128>}, {pipeline_mode = #tpu.pipeline_mode<synchronous>, transform_indices = @transform_8, window_bounds = array<i64: 1, 128>}, {pipeline_mode = #tpu.pipeline_mode<synchronous>, transform_indices = @transform_9, window_bounds = array<i64: 8, 128>}]} {
    %c0 = arith.constant 0 : index
    %c0_0 = arith.constant 0 : index
    %0 = vector.load %arg1[%c0, %c0_0] : memref<64x28xf32, #tpu.memory_space<vmem>>, vector<64x28xf32>
    %1 = arith.truncf %0 : vector<64x28xf32> to vector<64x28xbf16>
    %c0_1 = arith.constant 0 : index
    %c0_2 = arith.constant 0 : index
    %2 = vector.load %arg2[%c0_1, %c0_2] : memref<28x512xbf16, #tpu.memory_space<vmem>>, vector<28x512xbf16>
    %cst = arith.constant dense<0.000000e+00> : vector<64x512xf32>
    %3 = tpu.matmul %1, %2, %cst {dimension_numbers = #tpu.dot_dimension_numbers<[1], [0], [0], [1], [0, 0, 1, 1], [], []>} : vector<64x28xbf16>, vector<28x512xbf16>, vector<64x512xf32> -> vector<64x512xf32>
    %c0_3 = arith.constant 0 : index
    %c0_4 = arith.constant 0 : index
    %4 = vector.load %arg4[%c0_3, %c0_4] : memref<1x512xf32, #tpu.memory_space<vmem>>, vector<1x512xf32>
    %5 = vector.broadcast %4 : vector<1x512xf32> to vector<64x512xf32>
    %6 = arith.addf %3, %5 : vector<64x512xf32>
    %c0_5 = arith.constant 0 : index
    %c0_6 = arith.constant 0 : index
    %7 = vector.load %arg11[%c0_5, %c0_6] : memref<64x512xf32, #tpu.memory_space<vmem>>, vector<64x512xf32>
    tpu.vector_store %arg11[%c0_5, %c0_6], %6 {strides = array<i32>} : memref<64x512xf32, #tpu.memory_space<vmem>>, vector<64x512xf32>,
    %c0_7 = arith.constant 0 : index
    %c0_8 = arith.constant 0 : index
    %8 = vector.load %arg7[%c0_7, %c0_8] : memref<1x512xf32, #tpu.memory_space<vmem>>, vector<1x512xf32>
    %9 = vector.shape_cast %8 : vector<1x512xf32> to vector<1x512xf32>
    %10 = vector.broadcast %9 : vector<1x512xf32> to vector<8x512xf32>
    %cst_9 = arith.constant 0.000000e+00 : f32
    %11 = vector.broadcast %cst_9 : f32 to vector<8x128xf32>
    %cst_10 = arith.constant 0.000000e+00 : f32
    %12 = vector.broadcast %cst_10 : f32 to vector<8x128xf32>
    %cst_11 = arith.constant 0.000000e+00 : f32
    %13 = vector.broadcast %cst_11 : f32 to vector<8x128xf32>
    %cst_12 = arith.constant 0.000000e+00 : f32
    %14 = vector.broadcast %cst_12 : f32 to vector<8x128xf32>
    %c0_13 = arith.constant 0 : index
    %c0_14 = arith.constant 0 : index
    %15 = vector.load %arg11[%c0_13, %c0_14] : memref<64x512xf32, #tpu.memory_space<vmem>>, vector<8x512xf32>
    %16 = arith.truncf %11 : vector<8x128xf32> to vector<8x128xbf16>
    %c0_15 = arith.constant 0 : index
    %c0_16 = arith.constant 0 : index
    %17 = vector.load %arg3[%c0_15, %c0_16] : memref<128x512xbf16, #tpu.memory_space<vmem>>, vector<128x512xbf16>
    %cst_17 = arith.constant dense<0.000000e+00> : vector<8x512xf32>
    %18 = tpu.matmul %16, %17, %cst_17 {dimension_numbers = #tpu.dot_dimension_numbers<[1], [0], [0], [1], [0, 0, 1, 1], [], []>} : vector<8x128xbf16>, vector<128x512xbf16>, vector<8x512xf32> -> vector<8x512xf32>
    %19 = arith.addf %15, %18 : vector<8x512xf32>
    %20 = vector.extract_strided_slice %19 {offsets = [0, 0], sizes = [8, 128], strides = [1, 1]} : vector<8x512xf32> to vector<8x128xf32>
    %21 = arith.negf %20 : vector<8x128xf32>
    %22 = math.exp %21 : vector<8x128xf32>
    %cst_18 = arith.constant 1.000000e+00 : f32
    %23 = vector.broadcast %cst_18 : f32 to vector<8x128xf32>
    %24 = arith.addf %23, %22 : vector<8x128xf32>
    %25 = arith.divf %23, %24 : vector<8x128xf32>
    %26 = vector.extract_strided_slice %19 {offsets = [0, 128], sizes = [8, 128], strides = [1, 1]} : vector<8x512xf32> to vector<8x128xf32>
    %27 = arith.negf %26 : vector<8x128xf32>
    %28 = math.exp %27 : vector<8x128xf32>
    %cst_19 = arith.constant 1.000000e+00 : f32
    %29 = vector.broadcast %cst_19 : f32 to vector<8x128xf32>
    %30 = arith.addf %29, %28 : vector<8x128xf32>
    %31 = arith.divf %29, %30 : vector<8x128xf32>
    %32 = vector.extract_strided_slice %19 {offsets = [0, 256], sizes = [8, 128], strides = [1, 1]} : vector<8x512xf32> to vector<8x128xf32>
    %33 = math.tanh %32 : vector<8x128xf32>
    %34 = vector.extract_strided_slice %19 {offsets = [0, 384], sizes = [8, 128], strides = [1, 1]} : vector<8x512xf32> to vector<8x128xf32>
    %35 = arith.negf %34 : vector<8x128xf32>
    %36 = math.exp %35 : vector<8x128xf32>
    %cst_20 = arith.constant 1.000000e+00 : f32
    %37 = vector.broadcast %cst_20 : f32 to vector<8x128xf32>
    %38 = arith.addf %37, %36 : vector<8x128xf32>
    %39 = arith.divf %37, %38 : vector<8x128xf32>
    %40 = arith.mulf %31, %12 : vector<8x128xf32>
    %41 = arith.mulf %25, %33 : vector<8x128xf32>
    %42 = arith.addf %40, %41 : vector<8x128xf32>
    %43 = math.tanh %42 : vector<8x128xf32>
    %44 = arith.mulf %39, %43 : vector<8x128xf32>
    %45 = arith.truncf %44 : vector<8x128xf32> to vector<8x128xbf16>
    %c0_21 = arith.constant 0 : index
    %c0_22 = arith.constant 0 : index
    %46 = vector.load %arg5[%c0_21, %c0_22] : memref<128x512xbf16, #tpu.memory_space<vmem>>, vector<128x512xbf16>
    %cst_23 = arith.constant dense<0.000000e+00> : vector<8x512xf32>
    %47 = tpu.matmul %45, %46, %cst_23 {dimension_numbers = #tpu.dot_dimension_numbers<[1], [0], [0], [1], [0, 0, 1, 1], [], []>} : vector<8x128xbf16>, vector<128x512xbf16>, vector<8x512xf32> -> vector<8x512xf32>
    %48 = arith.truncf %13 : vector<8x128xf32> to vector<8x128xbf16>
    %c0_24 = arith.constant 0 : index
    %c0_25 = arith.constant 0 : index
    %49 = vector.load %arg6[%c0_24, %c0_25] : memref<128x512xbf16, #tpu.memory_space<vmem>>, vector<128x512xbf16>
    %cst_26 = arith.constant dense<0.000000e+00> : vector<8x512xf32>
    %50 = tpu.matmul %48, %49, %cst_26 {dimension_numbers = #tpu.dot_dimension_numbers<[1], [0], [0], [1], [0, 0, 1, 1], [], []>} : vector<8x128xbf16>, vector<128x512xbf16>, vector<8x512xf32> -> vector<8x512xf32>
    %51 = arith.addf %47, %50 : vector<8x512xf32>
    %52 = arith.addf %51, %10 : vector<8x512xf32>
    %53 = vector.extract_strided_slice %52 {offsets = [0, 0], sizes = [8, 128], strides = [1, 1]} : vector<8x512xf32> to vector<8x128xf32>
    %54 = arith.negf %53 : vector<8x128xf32>
    %55 = math.exp %54 : vector<8x128xf32>
    %cst_27 = arith.constant 1.000000e+00 : f32
    %56 = vector.broadcast %cst_27 : f32 to vector<8x128xf32>
    %57 = arith.addf %56, %55 : vector<8x128xf32>
    %58 = arith.divf %56, %57 : vector<8x128xf32>
    %59 = vector.extract_strided_slice %52 {offsets = [0, 128], sizes = [8, 128], strides = [1, 1]} : vector<8x512xf32> to vector<8x128xf32>
    %60 = arith.negf %59 : vector<8x128xf32>
    %61 = math.exp %60 : vector<8x128xf32>
    %cst_28 = arith.constant 1.000000e+00 : f32
    %62 = vector.broadcast %cst_28 : f32 to vector<8x128xf32>
    %63 = arith.addf %62, %61 : vector<8x128xf32>
    %64 = arith.divf %62, %63 : vector<8x128xf32>
    %65 = vector.extract_strided_slice %52 {offsets = [0, 256], sizes = [8, 128], strides = [1, 1]} : vector<8x512xf32> to vector<8x128xf32>
    %66 = math.tanh %65 : vector<8x128xf32>
    %67 = vector.extract_strided_slice %52 {offsets = [0, 384], sizes = [8, 128], strides = [1, 1]} : vector<8x512xf32> to vector<8x128xf32>
    %68 = arith.negf %67 : vector<8x128xf32>
    %69 = math.exp %68 : vector<8x128xf32>
    %cst_29 = arith.constant 1.000000e+00 : f32
    %70 = vector.broadcast %cst_29 : f32 to vector<8x128xf32>
    %71 = arith.addf %70, %69 : vector<8x128xf32>
    %72 = arith.divf %70, %71 : vector<8x128xf32>
    %73 = arith.mulf %64, %14 : vector<8x128xf32>
    %74 = arith.mulf %58, %66 : vector<8x128xf32>
    %75 = arith.addf %73, %74 : vector<8x128xf32>
    %76 = math.tanh %75 : vector<8x128xf32>
    %77 = arith.mulf %72, %76 : vector<8x128xf32>
    %c8 = arith.constant 8 : index
    %c0_30 = arith.constant 0 : index
    %78 = vector.load %arg11[%c8, %c0_30] : memref<64x512xf32, #tpu.memory_space<vmem>>, vector<8x512xf32>
    %79 = arith.truncf %44 : vector<8x128xf32> to vector<8x128xbf16>
    %c0_31 = arith.constant 0 : index
    %c0_32 = arith.constant 0 : index
    %80 = vector.load %arg3[%c0_31, %c0_32] : memref<128x512xbf16, #tpu.memory_space<vmem>>, vector<128x512xbf16>
    %cst_33 = arith.constant dense<0.000000e+00> : vector<8x512xf32>
    %81 = tpu.matmul %79, %80, %cst_33 {dimension_numbers = #tpu.dot_dimension_numbers<[1], [0], [0], [1], [0, 0, 1, 1], [], []>} : vector<8x128xbf16>, vector<128x512xbf16>, vector<8x512xf32> -> vector<8x512xf32>
    %82 = arith.addf %78, %81 : vector<8x512xf32>
    %83 = vector.extract_strided_slice %82 {offsets = [0, 0], sizes = [8, 128], strides = [1, 1]} : vector<8x512xf32> to vector<8x128xf32>
    %84 = arith.negf %83 : vector<8x128xf32>
    %85 = math.exp %84 : vector<8x128xf32>
    %cst_34 = arith.constant 1.000000e+00 : f32
    %86 = vector.broadcast %cst_34 : f32 to vector<8x128xf32>
    %87 = arith.addf %86, %85 : vector<8x128xf32>
    %88 = arith.divf %86, %87 : vector<8x128xf32>
    %89 = vector.extract_strided_slice %82 {offsets = [0, 128], sizes = [8, 128], strides = [1, 1]} : vector<8x512xf32> to vector<8x128xf32>
    %90 = arith.negf %89 : vector<8x128xf32>
    %91 = math.exp %90 : vector<8x128xf32>
    %cst_35 = arith.constant 1.000000e+00 : f32
    %92 = vector.broadcast %cst_35 : f32 to vector<8x128xf32>
    %93 = arith.addf %92, %91 : vector<8x128xf32>
    %94 = arith.divf %92, %93 : vector<8x128xf32>
    %95 = vector.extract_strided_slice %82 {offsets = [0, 256], sizes = [8, 128], strides = [1, 1]} : vector<8x512xf32> to vector<8x128xf32>
    %96 = math.tanh %95 : vector<8x128xf32>
    %97 = vector.extract_strided_slice %82 {offsets = [0, 384], sizes = [8, 128], strides = [1, 1]} : vector<8x512xf32> to vector<8x128xf32>
    %98 = arith.negf %97 : vector<8x128xf32>
    %99 = math.exp %98 : vector<8x128xf32>
    %cst_36 = arith.constant 1.000000e+00 : f32
    %100 = vector.broadcast %cst_36 : f32 to vector<8x128xf32>
    %101 = arith.addf %100, %99 : vector<8x128xf32>
    %102 = arith.divf %100, %101 : vector<8x128xf32>
    %103 = arith.mulf %94, %42 : vector<8x128xf32>
    %104 = arith.mulf %88, %96 : vector<8x128xf32>
    %105 = arith.addf %103, %104 : vector<8x128xf32>
    %106 = math.tanh %105 : vector<8x128xf32>
    %107 = arith.mulf %102, %106 : vector<8x128xf32>
    %108 = arith.truncf %107 : vector<8x128xf32> to vector<8x128xbf16>
    %c0_37 = arith.constant 0 : index
    %c0_38 = arith.constant 0 : index
    %109 = vector.load %arg5[%c0_37, %c0_38] : memref<128x512xbf16, #tpu.memory_space<vmem>>, vector<128x512xbf16>
    %cst_39 = arith.constant dense<0.000000e+00> : vector<8x512xf32>
    %110 = tpu.matmul %108, %109, %cst_39 {dimension_numbers = #tpu.dot_dimension_numbers<[1], [0], [0], [1], [0, 0, 1, 1], [], []>} : vector<8x128xbf16>, vector<128x512xbf16>, vector<8x512xf32> -> vector<8x512xf32>
    %111 = arith.truncf %77 : vector<8x128xf32> to vector<8x128xbf16>
    %c0_40 = arith.constant 0 : index
    %c0_41 = arith.constant 0 : index
    %112 = vector.load %arg6[%c0_40, %c0_41] : memref<128x512xbf16, #tpu.memory_space<vmem>>, vector<128x512xbf16>
    %cst_42 = arith.constant dense<0.000000e+00> : vector<8x512xf32>
    %113 = tpu.matmul %111, %112, %cst_42 {dimension_numbers = #tpu.dot_dimension_numbers<[1], [0], [0], [1], [0, 0, 1, 1], [], []>} : vector<8x128xbf16>, vector<128x512xbf16>, vector<8x512xf32> -> vector<8x512xf32>
    %114 = arith.addf %110, %113 : vector<8x512xf32>
    %115 = arith.addf %114, %10 : vector<8x512xf32>
    %116 = vector.extract_strided_slice %115 {offsets = [0, 0], sizes = [8, 128], strides = [1, 1]} : vector<8x512xf32> to vector<8x128xf32>
    %117 = arith.negf %116 : vector<8x128xf32>
    %118 = math.exp %117 : vector<8x128xf32>
    %cst_43 = arith.constant 1.000000e+00 : f32
    %119 = vector.broadcast %cst_43 : f32 to vector<8x128xf32>
    %120 = arith.addf %119, %118 : vector<8x128xf32>
    %121 = arith.divf %119, %120 : vector<8x128xf32>
    %122 = vector.extract_strided_slice %115 {offsets = [0, 128], sizes = [8, 128], strides = [1, 1]} : vector<8x512xf32> to vector<8x128xf32>
    %123 = arith.negf %122 : vector<8x128xf32>
    %124 = math.exp %123 : vector<8x128xf32>
    %cst_44 = arith.constant 1.000000e+00 : f32
    %125 = vector.broadcast %cst_44 : f32 to vector<8x128xf32>
    %126 = arith.addf %125, %124 : vector<8x128xf32>
    %127 = arith.divf %125, %126 : vector<8x128xf32>
    %128 = vector.extract_strided_slice %115 {offsets = [0, 256], sizes = [8, 128], strides = [1, 1]} : vector<8x512xf32> to vector<8x128xf32>
    %129 = math.tanh %128 : vector<8x128xf32>
    %130 = vector.extract_strided_slice %115 {offsets = [0, 384], sizes = [8, 128], strides = [1, 1]} : vector<8x512xf32> to vector<8x128xf32>
    %131 = arith.negf %130 : vector<8x128xf32>
    %132 = math.exp %131 : vector<8x128xf32>
    %cst_45 = arith.constant 1.000000e+00 : f32
    %133 = vector.broadcast %cst_45 : f32 to vector<8x128xf32>
    %134 = arith.addf %133, %132 : vector<8x128xf32>
    %135 = arith.divf %133, %134 : vector<8x128xf32>
    %136 = arith.mulf %127, %75 : vector<8x128xf32>
    %137 = arith.mulf %121, %129 : vector<8x128xf32>
    %138 = arith.addf %136, %137 : vector<8x128xf32>
    %139 = math.tanh %138 : vector<8x128xf32>
    %140 = arith.mulf %135, %139 : vector<8x128xf32>
    %c16 = arith.constant 16 : index
    %c0_46 = arith.constant 0 : index
    %141 = vector.load %arg11[%c16, %c0_46] : memref<64x512xf32, #tpu.memory_space<vmem>>, vector<8x512xf32>
    %142 = arith.truncf %107 : vector<8x128xf32> to vector<8x128xbf16>
    %c0_47 = arith.constant 0 : index
    %c0_48 = arith.constant 0 : index
    %143 = vector.load %arg3[%c0_47, %c0_48] : memref<128x512xbf16, #tpu.memory_space<vmem>>, vector<128x512xbf16>
    %cst_49 = arith.constant dense<0.000000e+00> : vector<8x512xf32>
    %144 = tpu.matmul %142, %143, %cst_49 {dimension_numbers = #tpu.dot_dimension_numbers<[1], [0], [0], [1], [0, 0, 1, 1], [], []>} : vector<8x128xbf16>, vector<128x512xbf16>, vector<8x512xf32> -> vector<8x512xf32>
    %145 = arith.addf %141, %144 : vector<8x512xf32>
    %146 = vector.extract_strided_slice %145 {offsets = [0, 0], sizes = [8, 128], strides = [1, 1]} : vector<8x512xf32> to vector<8x128xf32>
    %147 = arith.negf %146 : vector<8x128xf32>
    %148 = math.exp %147 : vector<8x128xf32>
    %cst_50 = arith.constant 1.000000e+00 : f32
    %149 = vector.broadcast %cst_50 : f32 to vector<8x128xf32>
    %150 = arith.addf %149, %148 : vector<8x128xf32>
    %151 = arith.divf %149, %150 : vector<8x128xf32>
    %152 = vector.extract_strided_slice %145 {offsets = [0, 128], sizes = [8, 128], strides = [1, 1]} : vector<8x512xf32> to vector<8x128xf32>
    %153 = arith.negf %152 : vector<8x128xf32>
    %154 = math.exp %153 : vector<8x128xf32>
    %cst_51 = arith.constant 1.000000e+00 : f32
    %155 = vector.broadcast %cst_51 : f32 to vector<8x128xf32>
    %156 = arith.addf %155, %154 : vector<8x128xf32>
    %157 = arith.divf %155, %156 : vector<8x128xf32>
    %158 = vector.extract_strided_slice %145 {offsets = [0, 256], sizes = [8, 128], strides = [1, 1]} : vector<8x512xf32> to vector<8x128xf32>
    %159 = math.tanh %158 : vector<8x128xf32>
    %160 = vector.extract_strided_slice %145 {offsets = [0, 384], sizes = [8, 128], strides = [1, 1]} : vector<8x512xf32> to vector<8x128xf32>
    %161 = arith.negf %160 : vector<8x128xf32>
    %162 = math.exp %161 : vector<8x128xf32>
    %cst_52 = arith.constant 1.000000e+00 : f32
    %163 = vector.broadcast %cst_52 : f32 to vector<8x128xf32>
    %164 = arith.addf %163, %162 : vector<8x128xf32>
    %165 = arith.divf %163, %164 : vector<8x128xf32>
    %166 = arith.mulf %157, %105 : vector<8x128xf32>
    %167 = arith.mulf %151, %159 : vector<8x128xf32>
    %168 = arith.addf %166, %167 : vector<8x128xf32>
    %169 = math.tanh %168 : vector<8x128xf32>
    %170 = arith.mulf %165, %169 : vector<8x128xf32>
    %171 = arith.truncf %170 : vector<8x128xf32> to vector<8x128xbf16>
    %c0_53 = arith.constant 0 : index
    %c0_54 = arith.constant 0 : index
    %172 = vector.load %arg5[%c0_53, %c0_54] : memref<128x512xbf16, #tpu.memory_space<vmem>>, vector<128x512xbf16>
    %cst_55 = arith.constant dense<0.000000e+00> : vector<8x512xf32>
    %173 = tpu.matmul %171, %172, %cst_55 {dimension_numbers = #tpu.dot_dimension_numbers<[1], [0], [0], [1], [0, 0, 1, 1], [], []>} : vector<8x128xbf16>, vector<128x512xbf16>, vector<8x512xf32> -> vector<8x512xf32>
    %174 = arith.truncf %140 : vector<8x128xf32> to vector<8x128xbf16>
    %c0_56 = arith.constant 0 : index
    %c0_57 = arith.constant 0 : index
    %175 = vector.load %arg6[%c0_56, %c0_57] : memref<128x512xbf16, #tpu.memory_space<vmem>>, vector<128x512xbf16>
    %cst_58 = arith.constant dense<0.000000e+00> : vector<8x512xf32>
    %176 = tpu.matmul %174, %175, %cst_58 {dimension_numbers = #tpu.dot_dimension_numbers<[1], [0], [0], [1], [0, 0, 1, 1], [], []>} : vector<8x128xbf16>, vector<128x512xbf16>, vector<8x512xf32> -> vector<8x512xf32>
    %177 = arith.addf %173, %176 : vector<8x512xf32>
    %178 = arith.addf %177, %10 : vector<8x512xf32>
    %179 = vector.extract_strided_slice %178 {offsets = [0, 0], sizes = [8, 128], strides = [1, 1]} : vector<8x512xf32> to vector<8x128xf32>
    %180 = arith.negf %179 : vector<8x128xf32>
    %181 = math.exp %180 : vector<8x128xf32>
    %cst_59 = arith.constant 1.000000e+00 : f32
    %182 = vector.broadcast %cst_59 : f32 to vector<8x128xf32>
    %183 = arith.addf %182, %181 : vector<8x128xf32>
    %184 = arith.divf %182, %183 : vector<8x128xf32>
    %185 = vector.extract_strided_slice %178 {offsets = [0, 128], sizes = [8, 128], strides = [1, 1]} : vector<8x512xf32> to vector<8x128xf32>
    %186 = arith.negf %185 : vector<8x128xf32>
    %187 = math.exp %186 : vector<8x128xf32>
    %cst_60 = arith.constant 1.000000e+00 : f32
    %188 = vector.broadcast %cst_60 : f32 to vector<8x128xf32>
    %189 = arith.addf %188, %187 : vector<8x128xf32>
    %190 = arith.divf %188, %189 : vector<8x128xf32>
    %191 = vector.extract_strided_slice %178 {offsets = [0, 256], sizes = [8, 128], strides = [1, 1]} : vector<8x512xf32> to vector<8x128xf32>
    %192 = math.tanh %191 : vector<8x128xf32>
    %193 = vector.extract_strided_slice %178 {offsets = [0, 384], sizes = [8, 128], strides = [1, 1]} : vector<8x512xf32> to vector<8x128xf32>
    %194 = arith.negf %193 : vector<8x128xf32>
    %195 = math.exp %194 : vector<8x128xf32>
    %cst_61 = arith.constant 1.000000e+00 : f32
    %196 = vector.broadcast %cst_61 : f32 to vector<8x128xf32>
    %197 = arith.addf %196, %195 : vector<8x128xf32>
    %198 = arith.divf %196, %197 : vector<8x128xf32>
    %199 = arith.mulf %190, %138 : vector<8x128xf32>
    %200 = arith.mulf %184, %192 : vector<8x128xf32>
    %201 = arith.addf %199, %200 : vector<8x128xf32>
    %202 = math.tanh %201 : vector<8x128xf32>
    %203 = arith.mulf %198, %202 : vector<8x128xf32>
    %c24 = arith.constant 24 : index
    %c0_62 = arith.constant 0 : index
    %204 = vector.load %arg11[%c24, %c0_62] : memref<64x512xf32, #tpu.memory_space<vmem>>, vector<8x512xf32>
    %205 = arith.truncf %170 : vector<8x128xf32> to vector<8x128xbf16>
    %c0_63 = arith.constant 0 : index
    %c0_64 = arith.constant 0 : index
    %206 = vector.load %arg3[%c0_63, %c0_64] : memref<128x512xbf16, #tpu.memory_space<vmem>>, vector<128x512xbf16>
    %cst_65 = arith.constant dense<0.000000e+00> : vector<8x512xf32>
    %207 = tpu.matmul %205, %206, %cst_65 {dimension_numbers = #tpu.dot_dimension_numbers<[1], [0], [0], [1], [0, 0, 1, 1], [], []>} : vector<8x128xbf16>, vector<128x512xbf16>, vector<8x512xf32> -> vector<8x512xf32>
    %208 = arith.addf %204, %207 : vector<8x512xf32>
    %209 = vector.extract_strided_slice %208 {offsets = [0, 0], sizes = [8, 128], strides = [1, 1]} : vector<8x512xf32> to vector<8x128xf32>
    %210 = arith.negf %209 : vector<8x128xf32>
    %211 = math.exp %210 : vector<8x128xf32>
    %cst_66 = arith.constant 1.000000e+00 : f32
    %212 = vector.broadcast %cst_66 : f32 to vector<8x128xf32>
    %213 = arith.addf %212, %211 : vector<8x128xf32>
    %214 = arith.divf %212, %213 : vector<8x128xf32>
    %215 = vector.extract_strided_slice %208 {offsets = [0, 128], sizes = [8, 128], strides = [1, 1]} : vector<8x512xf32> to vector<8x128xf32>
    %216 = arith.negf %215 : vector<8x128xf32>
    %217 = math.exp %216 : vector<8x128xf32>
    %cst_67 = arith.constant 1.000000e+00 : f32
    %218 = vector.broadcast %cst_67 : f32 to vector<8x128xf32>
    %219 = arith.addf %218, %217 : vector<8x128xf32>
    %220 = arith.divf %218, %219 : vector<8x128xf32>
    %221 = vector.extract_strided_slice %208 {offsets = [0, 256], sizes = [8, 128], strides = [1, 1]} : vector<8x512xf32> to vector<8x128xf32>
    %222 = math.tanh %221 : vector<8x128xf32>
    %223 = vector.extract_strided_slice %208 {offsets = [0, 384], sizes = [8, 128], strides = [1, 1]} : vector<8x512xf32> to vector<8x128xf32>
    %224 = arith.negf %223 : vector<8x128xf32>
    %225 = math.exp %224 : vector<8x128xf32>
    %cst_68 = arith.constant 1.000000e+00 : f32
    %226 = vector.broadcast %cst_68 : f32 to vector<8x128xf32>
    %227 = arith.addf %226, %225 : vector<8x128xf32>
    %228 = arith.divf %226, %227 : vector<8x128xf32>
    %229 = arith.mulf %220, %168 : vector<8x128xf32>
    %230 = arith.mulf %214, %222 : vector<8x128xf32>
    %231 = arith.addf %229, %230 : vector<8x128xf32>
    %232 = math.tanh %231 : vector<8x128xf32>
    %233 = arith.mulf %228, %232 : vector<8x128xf32>
    %234 = arith.truncf %233 : vector<8x128xf32> to vector<8x128xbf16>
    %c0_69 = arith.constant 0 : index
    %c0_70 = arith.constant 0 : index
    %235 = vector.load %arg5[%c0_69, %c0_70] : memref<128x512xbf16, #tpu.memory_space<vmem>>, vector<128x512xbf16>
    %cst_71 = arith.constant dense<0.000000e+00> : vector<8x512xf32>
    %236 = tpu.matmul %234, %235, %cst_71 {dimension_numbers = #tpu.dot_dimension_numbers<[1], [0], [0], [1], [0, 0, 1, 1], [], []>} : vector<8x128xbf16>, vector<128x512xbf16>, vector<8x512xf32> -> vector<8x512xf32>
    %237 = arith.truncf %203 : vector<8x128xf32> to vector<8x128xbf16>
    %c0_72 = arith.constant 0 : index
    %c0_73 = arith.constant 0 : index
    %238 = vector.load %arg6[%c0_72, %c0_73] : memref<128x512xbf16, #tpu.memory_space<vmem>>, vector<128x512xbf16>
    %cst_74 = arith.constant dense<0.000000e+00> : vector<8x512xf32>
    %239 = tpu.matmul %237, %238, %cst_74 {dimension_numbers = #tpu.dot_dimension_numbers<[1], [0], [0], [1], [0, 0, 1, 1], [], []>} : vector<8x128xbf16>, vector<128x512xbf16>, vector<8x512xf32> -> vector<8x512xf32>
    %240 = arith.addf %236, %239 : vector<8x512xf32>
    %241 = arith.addf %240, %10 : vector<8x512xf32>
    %242 = vector.extract_strided_slice %241 {offsets = [0, 0], sizes = [8, 128], strides = [1, 1]} : vector<8x512xf32> to vector<8x128xf32>
    %243 = arith.negf %242 : vector<8x128xf32>
    %244 = math.exp %243 : vector<8x128xf32>
    %cst_75 = arith.constant 1.000000e+00 : f32
    %245 = vector.broadcast %cst_75 : f32 to vector<8x128xf32>
    %246 = arith.addf %245, %244 : vector<8x128xf32>
    %247 = arith.divf %245, %246 : vector<8x128xf32>
    %248 = vector.extract_strided_slice %241 {offsets = [0, 128], sizes = [8, 128], strides = [1, 1]} : vector<8x512xf32> to vector<8x128xf32>
    %249 = arith.negf %248 : vector<8x128xf32>
    %250 = math.exp %249 : vector<8x128xf32>
    %cst_76 = arith.constant 1.000000e+00 : f32
    %251 = vector.broadcast %cst_76 : f32 to vector<8x128xf32>
    %252 = arith.addf %251, %250 : vector<8x128xf32>
    %253 = arith.divf %251, %252 : vector<8x128xf32>
    %254 = vector.extract_strided_slice %241 {offsets = [0, 256], sizes = [8, 128], strides = [1, 1]} : vector<8x512xf32> to vector<8x128xf32>
    %255 = math.tanh %254 : vector<8x128xf32>
    %256 = vector.extract_strided_slice %241 {offsets = [0, 384], sizes = [8, 128], strides = [1, 1]} : vector<8x512xf32> to vector<8x128xf32>
    %257 = arith.negf %256 : vector<8x128xf32>
    %258 = math.exp %257 : vector<8x128xf32>
    %cst_77 = arith.constant 1.000000e+00 : f32
    %259 = vector.broadcast %cst_77 : f32 to vector<8x128xf32>
    %260 = arith.addf %259, %258 : vector<8x128xf32>
    %261 = arith.divf %259, %260 : vector<8x128xf32>
    %262 = arith.mulf %253, %201 : vector<8x128xf32>
    %263 = arith.mulf %247, %255 : vector<8x128xf32>
    %264 = arith.addf %262, %263 : vector<8x128xf32>
    %265 = math.tanh %264 : vector<8x128xf32>
    %266 = arith.mulf %261, %265 : vector<8x128xf32>
    %c32 = arith.constant 32 : index
    %c0_78 = arith.constant 0 : index
    %267 = vector.load %arg11[%c32, %c0_78] : memref<64x512xf32, #tpu.memory_space<vmem>>, vector<8x512xf32>
    %268 = arith.truncf %233 : vector<8x128xf32> to vector<8x128xbf16>
    %c0_79 = arith.constant 0 : index
    %c0_80 = arith.constant 0 : index
    %269 = vector.load %arg3[%c0_79, %c0_80] : memref<128x512xbf16, #tpu.memory_space<vmem>>, vector<128x512xbf16>
    %cst_81 = arith.constant dense<0.000000e+00> : vector<8x512xf32>
    %270 = tpu.matmul %268, %269, %cst_81 {dimension_numbers = #tpu.dot_dimension_numbers<[1], [0], [0], [1], [0, 0, 1, 1], [], []>} : vector<8x128xbf16>, vector<128x512xbf16>, vector<8x512xf32> -> vector<8x512xf32>
    %271 = arith.addf %267, %270 : vector<8x512xf32>
    %272 = vector.extract_strided_slice %271 {offsets = [0, 0], sizes = [8, 128], strides = [1, 1]} : vector<8x512xf32> to vector<8x128xf32>
    %273 = arith.negf %272 : vector<8x128xf32>
    %274 = math.exp %273 : vector<8x128xf32>
    %cst_82 = arith.constant 1.000000e+00 : f32
    %275 = vector.broadcast %cst_82 : f32 to vector<8x128xf32>
    %276 = arith.addf %275, %274 : vector<8x128xf32>
    %277 = arith.divf %275, %276 : vector<8x128xf32>
    %278 = vector.extract_strided_slice %271 {offsets = [0, 128], sizes = [8, 128], strides = [1, 1]} : vector<8x512xf32> to vector<8x128xf32>
    %279 = arith.negf %278 : vector<8x128xf32>
    %280 = math.exp %279 : vector<8x128xf32>
    %cst_83 = arith.constant 1.000000e+00 : f32
    %281 = vector.broadcast %cst_83 : f32 to vector<8x128xf32>
    %282 = arith.addf %281, %280 : vector<8x128xf32>
    %283 = arith.divf %281, %282 : vector<8x128xf32>
    %284 = vector.extract_strided_slice %271 {offsets = [0, 256], sizes = [8, 128], strides = [1, 1]} : vector<8x512xf32> to vector<8x128xf32>
    %285 = math.tanh %284 : vector<8x128xf32>
    %286 = vector.extract_strided_slice %271 {offsets = [0, 384], sizes = [8, 128], strides = [1, 1]} : vector<8x512xf32> to vector<8x128xf32>
    %287 = arith.negf %286 : vector<8x128xf32>
    %288 = math.exp %287 : vector<8x128xf32>
    %cst_84 = arith.constant 1.000000e+00 : f32
    %289 = vector.broadcast %cst_84 : f32 to vector<8x128xf32>
    %290 = arith.addf %289, %288 : vector<8x128xf32>
    %291 = arith.divf %289, %290 : vector<8x128xf32>
    %292 = arith.mulf %283, %231 : vector<8x128xf32>
    %293 = arith.mulf %277, %285 : vector<8x128xf32>
    %294 = arith.addf %292, %293 : vector<8x128xf32>
    %295 = math.tanh %294 : vector<8x128xf32>
    %296 = arith.mulf %291, %295 : vector<8x128xf32>
    %297 = arith.truncf %296 : vector<8x128xf32> to vector<8x128xbf16>
    %c0_85 = arith.constant 0 : index
    %c0_86 = arith.constant 0 : index
    %298 = vector.load %arg5[%c0_85, %c0_86] : memref<128x512xbf16, #tpu.memory_space<vmem>>, vector<128x512xbf16>
    %cst_87 = arith.constant dense<0.000000e+00> : vector<8x512xf32>
    %299 = tpu.matmul %297, %298, %cst_87 {dimension_numbers = #tpu.dot_dimension_numbers<[1], [0], [0], [1], [0, 0, 1, 1], [], []>} : vector<8x128xbf16>, vector<128x512xbf16>, vector<8x512xf32> -> vector<8x512xf32>
    %300 = arith.truncf %266 : vector<8x128xf32> to vector<8x128xbf16>
    %c0_88 = arith.constant 0 : index
    %c0_89 = arith.constant 0 : index
    %301 = vector.load %arg6[%c0_88, %c0_89] : memref<128x512xbf16, #tpu.memory_space<vmem>>, vector<128x512xbf16>
    %cst_90 = arith.constant dense<0.000000e+00> : vector<8x512xf32>
    %302 = tpu.matmul %300, %301, %cst_90 {dimension_numbers = #tpu.dot_dimension_numbers<[1], [0], [0], [1], [0, 0, 1, 1], [], []>} : vector<8x128xbf16>, vector<128x512xbf16>, vector<8x512xf32> -> vector<8x512xf32>
    %303 = arith.addf %299, %302 : vector<8x512xf32>
    %304 = arith.addf %303, %10 : vector<8x512xf32>
    %305 = vector.extract_strided_slice %304 {offsets = [0, 0], sizes = [8, 128], strides = [1, 1]} : vector<8x512xf32> to vector<8x128xf32>
    %306 = arith.negf %305 : vector<8x128xf32>
    %307 = math.exp %306 : vector<8x128xf32>
    %cst_91 = arith.constant 1.000000e+00 : f32
    %308 = vector.broadcast %cst_91 : f32 to vector<8x128xf32>
    %309 = arith.addf %308, %307 : vector<8x128xf32>
    %310 = arith.divf %308, %309 : vector<8x128xf32>
    %311 = vector.extract_strided_slice %304 {offsets = [0, 128], sizes = [8, 128], strides = [1, 1]} : vector<8x512xf32> to vector<8x128xf32>
    %312 = arith.negf %311 : vector<8x128xf32>
    %313 = math.exp %312 : vector<8x128xf32>
    %cst_92 = arith.constant 1.000000e+00 : f32
    %314 = vector.broadcast %cst_92 : f32 to vector<8x128xf32>
    %315 = arith.addf %314, %313 : vector<8x128xf32>
    %316 = arith.divf %314, %315 : vector<8x128xf32>
    %317 = vector.extract_strided_slice %304 {offsets = [0, 256], sizes = [8, 128], strides = [1, 1]} : vector<8x512xf32> to vector<8x128xf32>
    %318 = math.tanh %317 : vector<8x128xf32>
    %319 = vector.extract_strided_slice %304 {offsets = [0, 384], sizes = [8, 128], strides = [1, 1]} : vector<8x512xf32> to vector<8x128xf32>
    %320 = arith.negf %319 : vector<8x128xf32>
    %321 = math.exp %320 : vector<8x128xf32>
    %cst_93 = arith.constant 1.000000e+00 : f32
    %322 = vector.broadcast %cst_93 : f32 to vector<8x128xf32>
    %323 = arith.addf %322, %321 : vector<8x128xf32>
    %324 = arith.divf %322, %323 : vector<8x128xf32>
    %325 = arith.mulf %316, %264 : vector<8x128xf32>
    %326 = arith.mulf %310, %318 : vector<8x128xf32>
    %327 = arith.addf %325, %326 : vector<8x128xf32>
    %328 = math.tanh %327 : vector<8x128xf32>
    %329 = arith.mulf %324, %328 : vector<8x128xf32>
    %c40 = arith.constant 40 : index
    %c0_94 = arith.constant 0 : index
    %330 = vector.load %arg11[%c40, %c0_94] : memref<64x512xf32, #tpu.memory_space<vmem>>, vector<8x512xf32>
    %331 = arith.truncf %296 : vector<8x128xf32> to vector<8x128xbf16>
    %c0_95 = arith.constant 0 : index
    %c0_96 = arith.constant 0 : index
    %332 = vector.load %arg3[%c0_95, %c0_96] : memref<128x512xbf16, #tpu.memory_space<vmem>>, vector<128x512xbf16>
    %cst_97 = arith.constant dense<0.000000e+00> : vector<8x512xf32>
    %333 = tpu.matmul %331, %332, %cst_97 {dimension_numbers = #tpu.dot_dimension_numbers<[1], [0], [0], [1], [0, 0, 1, 1], [], []>} : vector<8x128xbf16>, vector<128x512xbf16>, vector<8x512xf32> -> vector<8x512xf32>
    %334 = arith.addf %330, %333 : vector<8x512xf32>
    %335 = vector.extract_strided_slice %334 {offsets = [0, 0], sizes = [8, 128], strides = [1, 1]} : vector<8x512xf32> to vector<8x128xf32>
    %336 = arith.negf %335 : vector<8x128xf32>
    %337 = math.exp %336 : vector<8x128xf32>
    %cst_98 = arith.constant 1.000000e+00 : f32
    %338 = vector.broadcast %cst_98 : f32 to vector<8x128xf32>
    %339 = arith.addf %338, %337 : vector<8x128xf32>
    %340 = arith.divf %338, %339 : vector<8x128xf32>
    %341 = vector.extract_strided_slice %334 {offsets = [0, 128], sizes = [8, 128], strides = [1, 1]} : vector<8x512xf32> to vector<8x128xf32>
    %342 = arith.negf %341 : vector<8x128xf32>
    %343 = math.exp %342 : vector<8x128xf32>
    %cst_99 = arith.constant 1.000000e+00 : f32
    %344 = vector.broadcast %cst_99 : f32 to vector<8x128xf32>
    %345 = arith.addf %344, %343 : vector<8x128xf32>
    %346 = arith.divf %344, %345 : vector<8x128xf32>
    %347 = vector.extract_strided_slice %334 {offsets = [0, 256], sizes = [8, 128], strides = [1, 1]} : vector<8x512xf32> to vector<8x128xf32>
    %348 = math.tanh %347 : vector<8x128xf32>
    %349 = vector.extract_strided_slice %334 {offsets = [0, 384], sizes = [8, 128], strides = [1, 1]} : vector<8x512xf32> to vector<8x128xf32>
    %350 = arith.negf %349 : vector<8x128xf32>
    %351 = math.exp %350 : vector<8x128xf32>
    %cst_100 = arith.constant 1.000000e+00 : f32
    %352 = vector.broadcast %cst_100 : f32 to vector<8x128xf32>
    %353 = arith.addf %352, %351 : vector<8x128xf32>
    %354 = arith.divf %352, %353 : vector<8x128xf32>
    %355 = arith.mulf %346, %294 : vector<8x128xf32>
    %356 = arith.mulf %340, %348 : vector<8x128xf32>
    %357 = arith.addf %355, %356 : vector<8x128xf32>
    %358 = math.tanh %357 : vector<8x128xf32>
    %359 = arith.mulf %354, %358 : vector<8x128xf32>
    %360 = arith.truncf %359 : vector<8x128xf32> to vector<8x128xbf16>
    %c0_101 = arith.constant 0 : index
    %c0_102 = arith.constant 0 : index
    %361 = vector.load %arg5[%c0_101, %c0_102] : memref<128x512xbf16, #tpu.memory_space<vmem>>, vector<128x512xbf16>
    %cst_103 = arith.constant dense<0.000000e+00> : vector<8x512xf32>
    %362 = tpu.matmul %360, %361, %cst_103 {dimension_numbers = #tpu.dot_dimension_numbers<[1], [0], [0], [1], [0, 0, 1, 1], [], []>} : vector<8x128xbf16>, vector<128x512xbf16>, vector<8x512xf32> -> vector<8x512xf32>
    %363 = arith.truncf %329 : vector<8x128xf32> to vector<8x128xbf16>
    %c0_104 = arith.constant 0 : index
    %c0_105 = arith.constant 0 : index
    %364 = vector.load %arg6[%c0_104, %c0_105] : memref<128x512xbf16, #tpu.memory_space<vmem>>, vector<128x512xbf16>
    %cst_106 = arith.constant dense<0.000000e+00> : vector<8x512xf32>
    %365 = tpu.matmul %363, %364, %cst_106 {dimension_numbers = #tpu.dot_dimension_numbers<[1], [0], [0], [1], [0, 0, 1, 1], [], []>} : vector<8x128xbf16>, vector<128x512xbf16>, vector<8x512xf32> -> vector<8x512xf32>
    %366 = arith.addf %362, %365 : vector<8x512xf32>
    %367 = arith.addf %366, %10 : vector<8x512xf32>
    %368 = vector.extract_strided_slice %367 {offsets = [0, 0], sizes = [8, 128], strides = [1, 1]} : vector<8x512xf32> to vector<8x128xf32>
    %369 = arith.negf %368 : vector<8x128xf32>
    %370 = math.exp %369 : vector<8x128xf32>
    %cst_107 = arith.constant 1.000000e+00 : f32
    %371 = vector.broadcast %cst_107 : f32 to vector<8x128xf32>
    %372 = arith.addf %371, %370 : vector<8x128xf32>
    %373 = arith.divf %371, %372 : vector<8x128xf32>
    %374 = vector.extract_strided_slice %367 {offsets = [0, 128], sizes = [8, 128], strides = [1, 1]} : vector<8x512xf32> to vector<8x128xf32>
    %375 = arith.negf %374 : vector<8x128xf32>
    %376 = math.exp %375 : vector<8x128xf32>
    %cst_108 = arith.constant 1.000000e+00 : f32
    %377 = vector.broadcast %cst_108 : f32 to vector<8x128xf32>
    %378 = arith.addf %377, %376 : vector<8x128xf32>
    %379 = arith.divf %377, %378 : vector<8x128xf32>
    %380 = vector.extract_strided_slice %367 {offsets = [0, 256], sizes = [8, 128], strides = [1, 1]} : vector<8x512xf32> to vector<8x128xf32>
    %381 = math.tanh %380 : vector<8x128xf32>
    %382 = vector.extract_strided_slice %367 {offsets = [0, 384], sizes = [8, 128], strides = [1, 1]} : vector<8x512xf32> to vector<8x128xf32>
    %383 = arith.negf %382 : vector<8x128xf32>
    %384 = math.exp %383 : vector<8x128xf32>
    %cst_109 = arith.constant 1.000000e+00 : f32
    %385 = vector.broadcast %cst_109 : f32 to vector<8x128xf32>
    %386 = arith.addf %385, %384 : vector<8x128xf32>
    %387 = arith.divf %385, %386 : vector<8x128xf32>
    %388 = arith.mulf %379, %327 : vector<8x128xf32>
    %389 = arith.mulf %373, %381 : vector<8x128xf32>
    %390 = arith.addf %388, %389 : vector<8x128xf32>
    %391 = math.tanh %390 : vector<8x128xf32>
    %392 = arith.mulf %387, %391 : vector<8x128xf32>
    %c48 = arith.constant 48 : index
    %c0_110 = arith.constant 0 : index
    %393 = vector.load %arg11[%c48, %c0_110] : memref<64x512xf32, #tpu.memory_space<vmem>>, vector<8x512xf32>
    %394 = arith.truncf %359 : vector<8x128xf32> to vector<8x128xbf16>
    %c0_111 = arith.constant 0 : index
    %c0_112 = arith.constant 0 : index
    %395 = vector.load %arg3[%c0_111, %c0_112] : memref<128x512xbf16, #tpu.memory_space<vmem>>, vector<128x512xbf16>
    %cst_113 = arith.constant dense<0.000000e+00> : vector<8x512xf32>
    %396 = tpu.matmul %394, %395, %cst_113 {dimension_numbers = #tpu.dot_dimension_numbers<[1], [0], [0], [1], [0, 0, 1, 1], [], []>} : vector<8x128xbf16>, vector<128x512xbf16>, vector<8x512xf32> -> vector<8x512xf32>
    %397 = arith.addf %393, %396 : vector<8x512xf32>
    %398 = vector.extract_strided_slice %397 {offsets = [0, 0], sizes = [8, 128], strides = [1, 1]} : vector<8x512xf32> to vector<8x128xf32>
    %399 = arith.negf %398 : vector<8x128xf32>
    %400 = math.exp %399 : vector<8x128xf32>
    %cst_114 = arith.constant 1.000000e+00 : f32
    %401 = vector.broadcast %cst_114 : f32 to vector<8x128xf32>
    %402 = arith.addf %401, %400 : vector<8x128xf32>
    %403 = arith.divf %401, %402 : vector<8x128xf32>
    %404 = vector.extract_strided_slice %397 {offsets = [0, 128], sizes = [8, 128], strides = [1, 1]} : vector<8x512xf32> to vector<8x128xf32>
    %405 = arith.negf %404 : vector<8x128xf32>
    %406 = math.exp %405 : vector<8x128xf32>
    %cst_115 = arith.constant 1.000000e+00 : f32
    %407 = vector.broadcast %cst_115 : f32 to vector<8x128xf32>
    %408 = arith.addf %407, %406 : vector<8x128xf32>
    %409 = arith.divf %407, %408 : vector<8x128xf32>
    %410 = vector.extract_strided_slice %397 {offsets = [0, 256], sizes = [8, 128], strides = [1, 1]} : vector<8x512xf32> to vector<8x128xf32>
    %411 = math.tanh %410 : vector<8x128xf32>
    %412 = vector.extract_strided_slice %397 {offsets = [0, 384], sizes = [8, 128], strides = [1, 1]} : vector<8x512xf32> to vector<8x128xf32>
    %413 = arith.negf %412 : vector<8x128xf32>
    %414 = math.exp %413 : vector<8x128xf32>
    %cst_116 = arith.constant 1.000000e+00 : f32
    %415 = vector.broadcast %cst_116 : f32 to vector<8x128xf32>
    %416 = arith.addf %415, %414 : vector<8x128xf32>
    %417 = arith.divf %415, %416 : vector<8x128xf32>
    %418 = arith.mulf %409, %357 : vector<8x128xf32>
    %419 = arith.mulf %403, %411 : vector<8x128xf32>
    %420 = arith.addf %418, %419 : vector<8x128xf32>
    %421 = math.tanh %420 : vector<8x128xf32>
    %422 = arith.mulf %417, %421 : vector<8x128xf32>
    %423 = arith.truncf %422 : vector<8x128xf32> to vector<8x128xbf16>
    %c0_117 = arith.constant 0 : index
    %c0_118 = arith.constant 0 : index
    %424 = vector.load %arg5[%c0_117, %c0_118] : memref<128x512xbf16, #tpu.memory_space<vmem>>, vector<128x512xbf16>
    %cst_119 = arith.constant dense<0.000000e+00> : vector<8x512xf32>
    %425 = tpu.matmul %423, %424, %cst_119 {dimension_numbers = #tpu.dot_dimension_numbers<[1], [0], [0], [1], [0, 0, 1, 1], [], []>} : vector<8x128xbf16>, vector<128x512xbf16>, vector<8x512xf32> -> vector<8x512xf32>
    %426 = arith.truncf %392 : vector<8x128xf32> to vector<8x128xbf16>
    %c0_120 = arith.constant 0 : index
    %c0_121 = arith.constant 0 : index
    %427 = vector.load %arg6[%c0_120, %c0_121] : memref<128x512xbf16, #tpu.memory_space<vmem>>, vector<128x512xbf16>
    %cst_122 = arith.constant dense<0.000000e+00> : vector<8x512xf32>
    %428 = tpu.matmul %426, %427, %cst_122 {dimension_numbers = #tpu.dot_dimension_numbers<[1], [0], [0], [1], [0, 0, 1, 1], [], []>} : vector<8x128xbf16>, vector<128x512xbf16>, vector<8x512xf32> -> vector<8x512xf32>
    %429 = arith.addf %425, %428 : vector<8x512xf32>
    %430 = arith.addf %429, %10 : vector<8x512xf32>
    %431 = vector.extract_strided_slice %430 {offsets = [0, 0], sizes = [8, 128], strides = [1, 1]} : vector<8x512xf32> to vector<8x128xf32>
    %432 = arith.negf %431 : vector<8x128xf32>
    %433 = math.exp %432 : vector<8x128xf32>
    %cst_123 = arith.constant 1.000000e+00 : f32
    %434 = vector.broadcast %cst_123 : f32 to vector<8x128xf32>
    %435 = arith.addf %434, %433 : vector<8x128xf32>
    %436 = arith.divf %434, %435 : vector<8x128xf32>
    %437 = vector.extract_strided_slice %430 {offsets = [0, 128], sizes = [8, 128], strides = [1, 1]} : vector<8x512xf32> to vector<8x128xf32>
    %438 = arith.negf %437 : vector<8x128xf32>
    %439 = math.exp %438 : vector<8x128xf32>
    %cst_124 = arith.constant 1.000000e+00 : f32
    %440 = vector.broadcast %cst_124 : f32 to vector<8x128xf32>
    %441 = arith.addf %440, %439 : vector<8x128xf32>
    %442 = arith.divf %440, %441 : vector<8x128xf32>
    %443 = vector.extract_strided_slice %430 {offsets = [0, 256], sizes = [8, 128], strides = [1, 1]} : vector<8x512xf32> to vector<8x128xf32>
    %444 = math.tanh %443 : vector<8x128xf32>
    %445 = vector.extract_strided_slice %430 {offsets = [0, 384], sizes = [8, 128], strides = [1, 1]} : vector<8x512xf32> to vector<8x128xf32>
    %446 = arith.negf %445 : vector<8x128xf32>
    %447 = math.exp %446 : vector<8x128xf32>
    %cst_125 = arith.constant 1.000000e+00 : f32
    %448 = vector.broadcast %cst_125 : f32 to vector<8x128xf32>
    %449 = arith.addf %448, %447 : vector<8x128xf32>
    %450 = arith.divf %448, %449 : vector<8x128xf32>
    %451 = arith.mulf %442, %390 : vector<8x128xf32>
    %452 = arith.mulf %436, %444 : vector<8x128xf32>
    %453 = arith.addf %451, %452 : vector<8x128xf32>
    %454 = math.tanh %453 : vector<8x128xf32>
    %455 = arith.mulf %450, %454 : vector<8x128xf32>
    %c56 = arith.constant 56 : index
    %c0_126 = arith.constant 0 : index
    %456 = vector.load %arg11[%c56, %c0_126] : memref<64x512xf32, #tpu.memory_space<vmem>>, vector<8x512xf32>
    %457 = arith.truncf %422 : vector<8x128xf32> to vector<8x128xbf16>
    %c0_127 = arith.constant 0 : index
    %c0_128 = arith.constant 0 : index
    %458 = vector.load %arg3[%c0_127, %c0_128] : memref<128x512xbf16, #tpu.memory_space<vmem>>, vector<128x512xbf16>
    %cst_129 = arith.constant dense<0.000000e+00> : vector<8x512xf32>
    %459 = tpu.matmul %457, %458, %cst_129 {dimension_numbers = #tpu.dot_dimension_numbers<[1], [0], [0], [1], [0, 0, 1, 1], [], []>} : vector<8x128xbf16>, vector<128x512xbf16>, vector<8x512xf32> -> vector<8x512xf32>
    %460 = arith.addf %456, %459 : vector<8x512xf32>
    %461 = vector.extract_strided_slice %460 {offsets = [0, 0], sizes = [8, 128], strides = [1, 1]} : vector<8x512xf32> to vector<8x128xf32>
    %462 = arith.negf %461 : vector<8x128xf32>
    %463 = math.exp %462 : vector<8x128xf32>
    %cst_130 = arith.constant 1.000000e+00 : f32
    %464 = vector.broadcast %cst_130 : f32 to vector<8x128xf32>
    %465 = arith.addf %464, %463 : vector<8x128xf32>
    %466 = arith.divf %464, %465 : vector<8x128xf32>
    %467 = vector.extract_strided_slice %460 {offsets = [0, 128], sizes = [8, 128], strides = [1, 1]} : vector<8x512xf32> to vector<8x128xf32>
    %468 = arith.negf %467 : vector<8x128xf32>
    %469 = math.exp %468 : vector<8x128xf32>
    %cst_131 = arith.constant 1.000000e+00 : f32
    %470 = vector.broadcast %cst_131 : f32 to vector<8x128xf32>
    %471 = arith.addf %470, %469 : vector<8x128xf32>
    %472 = arith.divf %470, %471 : vector<8x128xf32>
    %473 = vector.extract_strided_slice %460 {offsets = [0, 256], sizes = [8, 128], strides = [1, 1]} : vector<8x512xf32> to vector<8x128xf32>
    %474 = math.tanh %473 : vector<8x128xf32>
    %475 = vector.extract_strided_slice %460 {offsets = [0, 384], sizes = [8, 128], strides = [1, 1]} : vector<8x512xf32> to vector<8x128xf32>
    %476 = arith.negf %475 : vector<8x128xf32>
    %477 = math.exp %476 : vector<8x128xf32>
    %cst_132 = arith.constant 1.000000e+00 : f32
    %478 = vector.broadcast %cst_132 : f32 to vector<8x128xf32>
    %479 = arith.addf %478, %477 : vector<8x128xf32>
    %480 = arith.divf %478, %479 : vector<8x128xf32>
    %481 = arith.mulf %472, %420 : vector<8x128xf32>
    %482 = arith.mulf %466, %474 : vector<8x128xf32>
    %483 = arith.addf %481, %482 : vector<8x128xf32>
    %484 = math.tanh %483 : vector<8x128xf32>
    %485 = arith.mulf %480, %484 : vector<8x128xf32>
    %486 = arith.truncf %485 : vector<8x128xf32> to vector<8x128xbf16>
    %c0_133 = arith.constant 0 : index
    %c0_134 = arith.constant 0 : index
    %487 = vector.load %arg5[%c0_133, %c0_134] : memref<128x512xbf16, #tpu.memory_space<vmem>>, vector<128x512xbf16>
    %cst_135 = arith.constant dense<0.000000e+00> : vector<8x512xf32>
    %488 = tpu.matmul %486, %487, %cst_135 {dimension_numbers = #tpu.dot_dimension_numbers<[1], [0], [0], [1], [0, 0, 1, 1], [], []>} : vector<8x128xbf16>, vector<128x512xbf16>, vector<8x512xf32> -> vector<8x512xf32>
    %489 = arith.truncf %455 : vector<8x128xf32> to vector<8x128xbf16>
    %c0_136 = arith.constant 0 : index
    %c0_137 = arith.constant 0 : index
    %490 = vector.load %arg6[%c0_136, %c0_137] : memref<128x512xbf16, #tpu.memory_space<vmem>>, vector<128x512xbf16>
    %cst_138 = arith.constant dense<0.000000e+00> : vector<8x512xf32>
    %491 = tpu.matmul %489, %490, %cst_138 {dimension_numbers = #tpu.dot_dimension_numbers<[1], [0], [0], [1], [0, 0, 1, 1], [], []>} : vector<8x128xbf16>, vector<128x512xbf16>, vector<8x512xf32> -> vector<8x512xf32>
    %492 = arith.addf %488, %491 : vector<8x512xf32>
    %493 = arith.addf %492, %10 : vector<8x512xf32>
    %494 = vector.extract_strided_slice %493 {offsets = [0, 0], sizes = [8, 128], strides = [1, 1]} : vector<8x512xf32> to vector<8x128xf32>
    %495 = arith.negf %494 : vector<8x128xf32>
    %496 = math.exp %495 : vector<8x128xf32>
    %cst_139 = arith.constant 1.000000e+00 : f32
    %497 = vector.broadcast %cst_139 : f32 to vector<8x128xf32>
    %498 = arith.addf %497, %496 : vector<8x128xf32>
    %499 = arith.divf %497, %498 : vector<8x128xf32>
    %500 = vector.extract_strided_slice %493 {offsets = [0, 128], sizes = [8, 128], strides = [1, 1]} : vector<8x512xf32> to vector<8x128xf32>
    %501 = arith.negf %500 : vector<8x128xf32>
    %502 = math.exp %501 : vector<8x128xf32>
    %cst_140 = arith.constant 1.000000e+00 : f32
    %503 = vector.broadcast %cst_140 : f32 to vector<8x128xf32>
    %504 = arith.addf %503, %502 : vector<8x128xf32>
    %505 = arith.divf %503, %504 : vector<8x128xf32>
    %506 = vector.extract_strided_slice %493 {offsets = [0, 256], sizes = [8, 128], strides = [1, 1]} : vector<8x512xf32> to vector<8x128xf32>
    %507 = math.tanh %506 : vector<8x128xf32>
    %508 = vector.extract_strided_slice %493 {offsets = [0, 384], sizes = [8, 128], strides = [1, 1]} : vector<8x512xf32> to vector<8x128xf32>
    %509 = arith.negf %508 : vector<8x128xf32>
    %510 = math.exp %509 : vector<8x128xf32>
    %cst_141 = arith.constant 1.000000e+00 : f32
    %511 = vector.broadcast %cst_141 : f32 to vector<8x128xf32>
    %512 = arith.addf %511, %510 : vector<8x128xf32>
    %513 = arith.divf %511, %512 : vector<8x128xf32>
    %514 = arith.mulf %505, %453 : vector<8x128xf32>
    %515 = arith.mulf %499, %507 : vector<8x128xf32>
    %516 = arith.addf %514, %515 : vector<8x128xf32>
    %517 = math.tanh %516 : vector<8x128xf32>
    %518 = arith.mulf %513, %517 : vector<8x128xf32>
    %519 = arith.truncf %518 : vector<8x128xf32> to vector<8x128xbf16>
    %c0_142 = arith.constant 0 : index
    %c0_143 = arith.constant 0 : index
    %520 = vector.load %arg8[%c0_142, %c0_143] : memref<128x128xbf16, #tpu.memory_space<vmem>>, vector<128x128xbf16>
    %cst_144 = arith.constant dense<0.000000e+00> : vector<8x128xf32>
    %521 = tpu.matmul %519, %520, %cst_144 {dimension_numbers = #tpu.dot_dimension_numbers<[1], [0], [0], [1], [0, 0, 1, 1], [], []>} : vector<8x128xbf16>, vector<128x128xbf16>, vector<8x128xf32> -> vector<8x128xf32>
    %c0_145 = arith.constant 0 : index
    %c0_146 = arith.constant 0 : index
    %522 = vector.load %arg9[%c0_145, %c0_146] : memref<1x128xf32, #tpu.memory_space<vmem>>, vector<1x128xf32>
    %523 = vector.broadcast %522 : vector<1x128xf32> to vector<8x128xf32>
    %524 = arith.addf %521, %523 : vector<8x128xf32>
    %c0_147 = arith.constant 0 : index
    %c0_148 = arith.constant 0 : index
    %525 = vector.load %arg10[%c0_147, %c0_148] : memref<8x128xf32, #tpu.memory_space<vmem>>, vector<8x128xf32>
    tpu.vector_store %arg10[%c0_147, %c0_148], %524 {strides = array<i32>} : memref<8x128xf32, #tpu.memory_space<vmem>>, vector<8x128xf32>,
    return
  }
  func.func @transform_0(%arg0: i32) -> (i32, i32) {
    %c0_i32 = arith.constant 0 : i32
    %c0_i32_0 = arith.constant 0 : i32
    %c0_i32_1 = arith.constant 0 : i32
    return %c0_i32, %c0_i32_0 : i32, i32
  }
  func.func @transform_1(%arg0: i32) -> (i32, i32) {
    %c0_i32 = arith.constant 0 : i32
    %c0_i32_0 = arith.constant 0 : i32
    %c0_i32_1 = arith.constant 0 : i32
    return %c0_i32, %c0_i32_0 : i32, i32
  }
  func.func @transform_2(%arg0: i32) -> (i32, i32) {
    %c0_i32 = arith.constant 0 : i32
    %c0_i32_0 = arith.constant 0 : i32
    %c0_i32_1 = arith.constant 0 : i32
    return %c0_i32, %c0_i32_0 : i32, i32
  }
  func.func @transform_3(%arg0: i32) -> (i32, i32) {
    %c0_i32 = arith.constant 0 : i32
    %c0_i32_0 = arith.constant 0 : i32
    %c0_i32_1 = arith.constant 0 : i32
    return %c0_i32, %c0_i32_0 : i32, i32
  }
  func.func @transform_4(%arg0: i32) -> (i32, i32) {
    %c0_i32 = arith.constant 0 : i32
    %c0_i32_0 = arith.constant 0 : i32
    %c0_i32_1 = arith.constant 0 : i32
    return %c0_i32, %c0_i32_0 : i32, i32
  }
  func.func @transform_5(%arg0: i32) -> (i32, i32) {
    %c0_i32 = arith.constant 0 : i32
    %c0_i32_0 = arith.constant 0 : i32
    %c0_i32_1 = arith.constant 0 : i32
    return %c0_i32, %c0_i32_0 : i32, i32
  }
  func.func @transform_6(%arg0: i32) -> (i32, i32) {
    %c0_i32 = arith.constant 0 : i32
    %c0_i32_0 = arith.constant 0 : i32
    %c0_i32_1 = arith.constant 0 : i32
    return %c0_i32, %c0_i32_0 : i32, i32
  }
  func.func @transform_7(%arg0: i32) -> (i32, i32) {
    %c0_i32 = arith.constant 0 : i32
    %c0_i32_0 = arith.constant 0 : i32
    %c0_i32_1 = arith.constant 0 : i32
    return %c0_i32, %c0_i32_0 : i32, i32
  }
  func.func @transform_8(%arg0: i32) -> (i32, i32) {
    %c0_i32 = arith.constant 0 : i32
    %c0_i32_0 = arith.constant 0 : i32
    %c0_i32_1 = arith.constant 0 : i32
    return %c0_i32, %c0_i32_0 : i32, i32
  }
  func.func @transform_9(%arg0: i32) -> (i32, i32) {
    %c0_i32 = arith.constant 0 : i32
    %c0_i32_0 = arith.constant 0 : i32
    %c0_i32_1 = arith.constant 0 : i32
    return %c0_i32, %c0_i32_0 : i32, i32
  }
}

</mosaic_0001>

<bundles_post_ra>
// kernel: tpu_custom_call.1
= control target key start
LH: loop header
LB: loop body
LE: loop exit
PB: predicated region body
PF: predicated region fallthrough
CT: control target
= control target key end

     0   :  { %14 = vsyncpa [#allocation4], 0  ;;  %s6293_s0 = inlined_call_operand.vmem [shape: f32[64,28], index: 0, kind: input, shape index: {}]   ;;  %s6294_s1 = inlined_call_operand.vmem [shape: bf16[28,512], index: 1, kind: input, shape index: {}]   ;;  %s6295_s2 = inlined_call_operand.hbm [shape: bf16[128,512], index: 2, kind: input, shape index: {}]   ;;  %s6296_s3 = inlined_call_operand.vmem [shape: f32[1,512], index: 3, kind: input, shape index: {}]   ;;  %s6297_s4 = inlined_call_operand.hbm [shape: bf16[128,512], index: 4, kind: input, shape index: {}]   ;;  %s6298_s5 = inlined_call_operand.hbm [shape: bf16[128,512], index: 5, kind: input, shape index: {}]   ;;  %s6299_s6 = inlined_call_operand.vmem [shape: f32[1,512], index: 6, kind: input, shape index: {}]   ;;  %s6300_s7 = inlined_call_operand.hbm [shape: bf16[128,128], index: 7, kind: input, shape index: {}]   ;;  %s6301_s8 = inlined_call_operand.vmem [shape: f32[1,128], index: 8, kind: input, shape index: {}]   ;;  %s6302_s9 = inlined_call_operand.hbm [shape: f32[8,128], index: 9, kind: output, shape index: {}]  }
   0x1   :  { %15 = vsyncpa [#allocation7], 0 }
   0x2   :  { %16 = vsyncpa [#allocation10], 0 }
   0x3   :  { %17 = vsyncpa [#allocation5], 0  ;;  %s4494_s30 = smov [#allocation6]   ;;  %s4495_s11 = smov [#allocation3]  }
   0x4   :  { %s41_s10 = sshll.u32 %s4494_s30, 4  ;;  %s27_s12 = sshll.u32 %s4495_s11, 4  ;;  %s42_s10 = int_to_ptr.vmem [resolvable:$true] %s41_s10  ;;  %s28_s12 = int_to_ptr.vmem [resolvable:$true] %s27_s12 }
   0x5   :  { %s4394_s13 = scalar_lea.vmem %s42_s10, 4096  ;;  %p4399_p1 = scmp.lt.s32.totalorder %s42_s10, %s42_s10 }
   0x6   :  { %p4395_p0 = scmp.ne.s32.totalorder %s42_s10, %s4394_s13  ;;  %p4400_p2 = scmp.lt.s32.totalorder %s4394_s13, %s4394_s13 }
   0x8   :  { %p4401_p3 = por %p4400_p2, %p4399_p1 }
   0xa   :  { %p4402_p4 = pnand %p4401_p3, %p4395_p0 }
   0xc   :  { %4405 = shalt.err (!%p4402_p4)
}
   0xd   :  { %s4496_s14 = smov 256   ;;  %s4497_s15 = smov 16  }
   0xe   :  { %47 = dma.hbm_to_vmem [thread:$0]  %s6297_s4, 4096, %s42_s10, [#allocation7], %s4496_s14, %s4496_s14, %s4497_s15  }
   0xf   :  { %s4414_s18 = scalar_lea.vmem %s28_s12, 4096  ;;  %p4419_p6 = scmp.lt.s32.totalorder %s28_s12, %s28_s12 }
  0x10   :  { %p4415_p5 = scmp.ne.s32.totalorder %s28_s12, %s4414_s18  ;;  %p4420_p7 = scmp.lt.s32.totalorder %s4414_s18, %s4414_s18 }
  0x12   :  { %p4421_p8 = por %p4420_p7, %p4419_p6 }
  0x14   :  { %p4422_p9 = pnand %p4421_p8, %p4415_p5 }
  0x16   :  { %4425 = shalt.err (!%p4422_p9)
}
  0x17   :  { %33 = dma.hbm_to_vmem [thread:$0]  %s6295_s2, 4096, %s28_s12, [#allocation4], %s4496_s14, %s4496_s14, %s4497_s15  }
  0x18   :  { %s4498_s21 = smov [#allocation8]   ;;  %s4499_s23 = smov [#allocation9]  }
  0x19   :  { %s53_s22 = sshll.u32 %s4498_s21, 4  ;;  %s67_s24 = sshll.u32 %s4499_s23, 4  ;;  %s54_s22 = int_to_ptr.vmem [resolvable:$true] %s53_s22  ;;  %s68_s24 = int_to_ptr.vmem [resolvable:$true] %s67_s24 }
  0x1a   :  { %s4434_s25 = scalar_lea.vmem %s54_s22, 4096  ;;  %p4439_p11 = scmp.lt.s32.totalorder %s54_s22, %s54_s22 }
  0x1b   :  { %p4435_p10 = scmp.ne.s32.totalorder %s54_s22, %s4434_s25  ;;  %p4440_p12 = scmp.lt.s32.totalorder %s4434_s25, %s4434_s25 }
  0x1d   :  { %p4441_p13 = por %p4440_p12, %p4439_p11 }
  0x1f   :  { %p4442_p0 = pnand %p4441_p13, %p4435_p10 }
  0x21   :  { %4445 = shalt.err (!%p4442_p0)
}
  0x22   :  { %59 = dma.hbm_to_vmem [thread:$0]  %s6298_s5, 4096, %s54_s22, [#allocation7], %s4496_s14, %s4496_s14, %s4497_s15  }
  0x23   :  { %s4454_s27 = scalar_lea.vmem %s68_s24, 1024  ;;  %p4459_p2 = scmp.lt.s32.totalorder %s68_s24, %s68_s24 }
  0x24   :  { %p4455_p1 = scmp.ne.s32.totalorder %s68_s24, %s4454_s27  ;;  %p4460_p3 = scmp.lt.s32.totalorder %s4454_s27, %s4454_s27 }
  0x26   :  { %p4461_p4 = por %p4460_p3, %p4459_p2 }
  0x28   :  { %p4462_p5 = pnand %p4461_p4, %p4455_p1 }
  0x2a   :  { %4465 = shalt.err (!%p4462_p5)
}
  0x2b   :  { %s4500_s2 = smov 64   ;;  %s4501_s28 = smov 4  }
  0x2c   :  { %73 = dma.hbm_to_vmem [thread:$0]  %s6300_s7, 1024, %s68_s24, [#allocation10], %s4500_s2, %s4500_s2, %s4501_s28  }
  0x2d   :  { %4486 = dma.done.wait [#allocation4], 4096  }
  0x2e   :  { %4487 = vsyncadd [#allocation4], 4294963200 }
  0x2f   :  { %4488 = dma.done.wait [#allocation7], 8192  }
  0x30   :  { %4489 = vsyncadd [#allocation7], 4294959104 }
  0x31   :  { %4490 = dma.done.wait [#allocation10], 1024  }
  0x32   :  { %4491 = vsyncadd [#allocation10], 4294966272  ;;  %v6303_v0 = vmov 0   ;;  %vm180_vm0 = vcmask 1045504   ;;  %v3780_v5 = vld [vmem:[%s6294_s1 + $0x4] ss:$16 sps:$4 sm:$0xff]  }
  0x33   :  { %225 = vmatprep.mubr.bf16.mxu0 %v6303_v0  ;;  %298 = vmatprep.mubr.bf16.mxu1 %v6303_v0  ;;  %v3774_v1 = vld [vmem:[%s6294_s1 + $0x24] ss:$16 sps:$4 sm:$0x3f]   ;;  %v3776_v2 = vld [vmem:[%s6294_s1 + $0x2c] ss:$16 sps:$4 sm:$0x3f]  }
  0x34   :  { %3570 = vmatprep.subr.msk.bf16.mxu0 %vm180_vm0, %v3774_v1  ;;  %v3778_v3 = vld [vmem:[%s6294_s1 + $0x20] ss:$16 sps:$4 sm:$0x3f]   ;;  %v3779_v4 = vld [vmem:[%s6294_s1 + $0x28] ss:$16 sps:$4 sm:$0x3f]   ;;  %3575 = vmatprep.subr.msk.bf16.mxu1 %vm180_vm0, %v3776_v2 }
  0x35   :  { %v182_v6 = vsel %vm180_vm0, %v3778_v3, 0  ;;  %v188_v7 = vsel %vm180_vm0, %v3779_v4, 0  ;;  %v3782_v8 = vld [vmem:[%s6294_s1 + $0xc] ss:$16 sps:$4 sm:$0xff]   ;;  %v3784_v9 = vld [vmem:[%s6294_s1] ss:$16 sps:$4 sm:$0xff]  }
  0x36   :  { %206 = vmatpush1.bf16.msra.mxu0 %v182_v6  ;;  %279 = vmatpush1.bf16.msra.mxu1 %v188_v7  ;;  %v3785_v10 = vld [vmem:[%s6294_s1 + $0x8] ss:$16 sps:$4 sm:$0xff]   ;;  %v89_v11 = vld [vmem:[%s6293_s0] sm:$0xff]  ;;  %v4602_v15 = vld [vmem:[#allocation3 + $0xec] ss:$16 sps:$4 sm:$0xff]   ;;  %vm167_vm1 = vcmask 228352  }
  0x37   :  { %207 = vmatprep.subr.bf16.mxu0 %v3780_v5  ;;  %280 = vmatprep.subr.bf16.mxu1 %v3782_v8  ;;  %v90_v12 = vld [vmem:[%s6293_s0 + $0x8] sm:$0xff]  ;;  %v4600_v13 = vld [vmem:[#allocation3 + $0xe4] ss:$16 sps:$4 sm:$0xff]   ;;  %v4604_v16 = vld [vmem:[#allocation3 + $0xe0] ss:$16 sps:$4 sm:$0xff]   ;;  %vm4504_vm2 = vmmov 0  }
  0x38   :  { %v97_v14 = vpack.c.bf16 %v90_v12, %v89_v11  ;;  %v4606_v17 = vld [vmem:[#allocation3 + $0xe8] ss:$16 sps:$4 sm:$0xff]   ;;  %v4608_v18 = vld [vmem:[#allocation3 + $0xc4] ss:$16 sps:$4 sm:$0xff]   ;;  %v4612_v19 = vld [vmem:[#allocation3 + $0xcc] ss:$16 sps:$4 sm:$0xff]  }
  0x39   :  { %v4614_v20 = vld [vmem:[#allocation3 + $0xc0] ss:$16 sps:$4 sm:$0xff]   ;;  %v4616_v21 = vld [vmem:[#allocation3 + $0xc8] ss:$16 sps:$4 sm:$0xff]   ;;  %v4630_v24 = vld [vmem:[#allocation3 + $0xa4] ss:$16 sps:$4 sm:$0xff]  }
  0x3a   :  { %208 = vmatpush1.bf16.msra.mxu0 %v3784_v9  ;;  %281 = vmatpush1.bf16.msra.mxu1 %v3785_v10  ;;  %v91_v22 = vld [vmem:[%s6293_s0 + $0x10] sm:$0xff]  ;;  %v92_v23 = vld [vmem:[%s6293_s0 + $0x18] sm:$0xff]  ;;  %v93_v33 = vld [vmem:[%s6293_s0 + $0x20] sm:$0xff]  ;;  %s4505_s17 = smov [#allocation11]  }
  0x3b   :  { %589 = vmatprep.subr.bf16.mxu0 %v4600_v13  ;;  %630 = vmatprep.subr.bf16.mxu1 %v4602_v15  ;;  %v4632_v25 = vld [vmem:[#allocation3 + $0xac] ss:$16 sps:$4 sm:$0xff]   ;;  %v98_v26 = vpack.c.bf16 %v92_v23, %v91_v22  ;;  %v4638_v27 = vld [vmem:[#allocation3 + $0xa0] ss:$16 sps:$4 sm:$0xff]   ;;  %v4640_v28 = vld [vmem:[#allocation3 + $0xa8] ss:$16 sps:$4 sm:$0xff]  }
  0x3c   :  { %v4642_v29 = vld [vmem:[#allocation3 + $0x84] ss:$16 sps:$4 sm:$0xff]   ;;  %v4646_v30 = vld [vmem:[#allocation3 + $0x8c] ss:$16 sps:$4 sm:$0xff]   ;;  %v4648_v31 = vld [vmem:[#allocation3 + $0x80] ss:$16 sps:$4 sm:$0xff]  }
  0x3d   :  { %3571 = vmatmul.mubr.msk.bf16.vlgmr.msra.gmra.mxu0 %vm167_vm1, %v97_v14  ;;  %3576 = vmatmul.mubr.msk.bf16.vlgmr.msra.gmra.mxu1 %vm167_vm1, %v97_v14  ;;  %v4652_v32 = vld [vmem:[#allocation3 + $0x88] ss:$16 sps:$4 sm:$0xff]   ;;  %v4662_v35 = vld [vmem:[#allocation3 + $0x64] ss:$16 sps:$4 sm:$0xff]   ;;  %v4666_v36 = vld [vmem:[#allocation3 + $0x6c] ss:$16 sps:$4 sm:$0xff]  }
  0x3e   :  { %590 = vmatpush1.bf16.msra.mxu0 %v4604_v16  ;;  %631 = vmatpush1.bf16.msra.mxu1 %v4606_v17  ;;  %v94_v34 = vld [vmem:[%s6293_s0 + $0x28] sm:$0xff]  ;;  %v4670_v38 = vld [vmem:[#allocation3 + $0x60] ss:$16 sps:$4 sm:$0xff]   ;;  %v4678_v40 = vld [vmem:[#allocation3 + $0x44] ss:$16 sps:$4 sm:$0xff]   ;;  %s3551_s18 = sshll.u32 %s4505_s17, 4  ;;  %s3552_s18 = int_to_ptr.vmem [resolvable:$true] %s3551_s18 }
  0x3f   :  { %591 = vmatprep.subr.bf16.mxu0 %v4608_v18  ;;  %632 = vmatprep.subr.bf16.mxu1 %v4612_v19  ;;  %v99_v37 = vpack.c.bf16 %v94_v34, %v93_v33  ;;  %v4674_v39 = vld [vmem:[#allocation3 + $0x68] ss:$16 sps:$4 sm:$0xff]   ;;  %v4680_v41 = vld [vmem:[#allocation3 + $0x4c] ss:$16 sps:$4 sm:$0xff]   ;;  %v4682_v42 = vld [vmem:[#allocation3 + $0x40] ss:$16 sps:$4 sm:$0xff]   ;;  %p4471_p7 = scmp.lt.s32.totalorder %s3552_s18, %s3552_s18 }
  0x40   :  { %235 = vmatprep.mubr.bf16.mxu0 %v6303_v0  ;;  %308 = vmatprep.mubr.bf16.mxu1 %v6303_v0  ;;  %v4684_v43 = vld [vmem:[#allocation3 + $0x48] ss:$16 sps:$4 sm:$0xff]   ;;  %v95_v44 = vld [vmem:[%s6293_s0 + $0x30] sm:$0xff]  ;;  %v4698_v47 = vld [vmem:[#allocation3 + $0x2c] ss:$16 sps:$4 sm:$0xff]   ;;  %s4466_s19 = scalar_lea.vmem %s3552_s18, 128 }
  0x41   :  { %v96_v45 = vld [vmem:[%s6293_s0 + $0x38] sm:$0xff]  ;;  %v4696_v46 = vld [vmem:[#allocation3 + $0x24] ss:$16 sps:$4 sm:$0xff]   ;;  %v4704_v48 = vld [vmem:[#allocation3 + $0x20] ss:$16 sps:$4 sm:$0xff]   ;;  %p4467_p6 = scmp.ne.s32.totalorder %s3552_s18, %s4466_s19  ;;  %p4472_p8 = scmp.lt.s32.totalorder %s4466_s19, %s4466_s19 }
  0x42   :  { %592 = vmatpush1.bf16.msra.mxu0 %v4614_v20  ;;  %633 = vmatpush1.bf16.msra.mxu1 %v4616_v21  ;;  %v4706_v49 = vld [vmem:[#allocation3 + $0x28] ss:$16 sps:$4 sm:$0xff]   ;;  %v100_v50 = vpack.c.bf16 %v96_v45, %v95_v44  ;;  %v4708_v51 = vld [vmem:[#allocation3 + $0x4] ss:$16 sps:$4 sm:$0xff]   ;;  %v4710_v52 = vld [vmem:[#allocation3 + $0xc] ss:$16 sps:$4 sm:$0xff]  }
  0x43   :  { %593 = vmatprep.subr.bf16.mxu0 %v4630_v24  ;;  %634 = vmatprep.subr.bf16.mxu1 %v4632_v25  ;;  %v4716_v53 = vld [vmem:[#allocation3] ss:$16 sps:$4 sm:$0xff]   ;;  %v4718_v54 = vld [vmem:[#allocation3 + $0x8] ss:$16 sps:$4 sm:$0xff]   ;;  %v4734_v55 = vld [vmem:[#allocation8 + $0xe4] ss:$16 sps:$4 sm:$0xff]   ;;  %p4473_p9 = por %p4472_p8, %p4471_p7 }
  0x44   :  { %v4736_v56 = vld [vmem:[#allocation8 + $0xe0] ss:$16 sps:$4 sm:$0xff]   ;;  %v4740_v57 = vld [vmem:[#allocation8 + $0xec] ss:$16 sps:$4 sm:$0xff]   ;;  %v4742_v58 = vld [vmem:[#allocation8 + $0xc4] ss:$16 sps:$4 sm:$0xff]  }
  0x45   :  { %3572 = vmatmul.mubr.msk.bf16.gmra.mxu0 %vm167_vm1, %v98_v26  ;;  %3577 = vmatmul.mubr.msk.bf16.gmra.mxu1 %vm167_vm1, %v98_v26  ;;  %v4744_v59 = vld [vmem:[#allocation8 + $0xe8] ss:$16 sps:$4 sm:$0xff]   ;;  %v4746_v60 = vld [vmem:[#allocation8 + $0xc0] ss:$16 sps:$4 sm:$0xff]   ;;  %v4752_v61 = vld [vmem:[#allocation8 + $0xcc] ss:$16 sps:$4 sm:$0xff]   ;;  %p4474_p10 = pnand %p4473_p9, %p4467_p6 }
  0x46   :  { %594 = vmatpush1.bf16.msra.mxu0 %v4638_v27  ;;  %635 = vmatpush1.bf16.msra.mxu1 %v4640_v28  ;;  %v4754_v62 = vld [vmem:[#allocation8 + $0xa4] ss:$16 sps:$4 sm:$0xff]   ;;  %v4756_v63 = vld [vmem:[#allocation8 + $0xc8] ss:$16 sps:$4 sm:$0xff]   ;;  %v4758_v1 = vld [vmem:[#allocation8 + $0xa0] ss:$16 sps:$4 sm:$0xff]  }
  0x47   :  { %595 = vmatprep.subr.bf16.mxu0 %v4642_v29  ;;  %636 = vmatprep.subr.bf16.mxu1 %v4646_v30  ;;  %6565 = vst [vmem:[#allocation16_spill] sm:$0xff] %v4758_v1  ;;  %v4764_v2 = vld [vmem:[#allocation8 + $0xac] ss:$16 sps:$4 sm:$0xff]   ;;  %v4766_v3 = vld [vmem:[#allocation8 + $0x84] ss:$16 sps:$4 sm:$0xff]  }
  0x48   :  { %245 = vmatprep.mubr.bf16.mxu0 %v6303_v0  ;;  %318 = vmatprep.mubr.bf16.mxu1 %v6303_v0  ;;  %6566 = vst [vmem:[#allocation17_spill] sm:$0xff] %v4766_v3  ;;  %v4768_v4 = vld [vmem:[#allocation8 + $0xa8] ss:$16 sps:$4 sm:$0xff]   ;;  %v4770_v5 = vld [vmem:[#allocation8 + $0x80] ss:$16 sps:$4 sm:$0xff]  }
  0x49   :  { %6567 = vst [vmem:[#allocation18_spill] sm:$0xff] %v4768_v4  ;;  %6568 = vst [vmem:[#allocation19_spill] sm:$0xff] %v4770_v5  ;;  %v4776_v6 = vld [vmem:[#allocation8 + $0x8c] ss:$16 sps:$4 sm:$0xff]   ;;  %v4778_v7 = vld [vmem:[#allocation8 + $0x64] ss:$16 sps:$4 sm:$0xff]  }
  0x4a   :  { %596 = vmatpush1.bf16.msra.mxu0 %v4648_v31  ;;  %637 = vmatpush1.bf16.msra.mxu1 %v4652_v32  ;;  %6569 = vst [vmem:[#allocation20_spill] sm:$0xff] %v4776_v6  ;;  %6570 = vst [vmem:[#allocation21_spill] sm:$0xff] %v4778_v7  ;;  %v4780_v8 = vld [vmem:[#allocation8 + $0x88] ss:$16 sps:$4 sm:$0xff]   ;;  %v4782_v9 = vld [vmem:[#allocation8 + $0x60] ss:$16 sps:$4 sm:$0xff]  }
  0x4b   :  { %597 = vmatprep.subr.bf16.mxu0 %v4662_v35  ;;  %638 = vmatprep.subr.bf16.mxu1 %v4666_v36  ;;  %6571 = vst [vmem:[#allocation22_spill] sm:$0xff] %v4780_v8  ;;  %6572 = vst [vmem:[#allocation23_spill] sm:$0xff] %v4782_v9  ;;  %v4788_v10 = vld [vmem:[#allocation8 + $0x6c] ss:$16 sps:$4 sm:$0xff]   ;;  %v4790_v11 = vld [vmem:[#allocation8 + $0x44] ss:$16 sps:$4 sm:$0xff]  }
  0x4c   :  { %6573 = vst [vmem:[#allocation24_spill] sm:$0xff] %v4788_v10  ;;  %6574 = vst [vmem:[#allocation25_spill] sm:$0xff] %v4790_v11  ;;  %v4792_v12 = vld [vmem:[#allocation8 + $0x68] ss:$16 sps:$4 sm:$0xff]   ;;  %v4794_v14 = vld [vmem:[#allocation8 + $0x40] ss:$16 sps:$4 sm:$0xff]  }
  0x4d   :  { %3573 = vmatmul.mubr.msk.bf16.gmra.mxu0 %vm167_vm1, %v99_v37  ;;  %3578 = vmatmul.mubr.msk.bf16.gmra.mxu1 %vm167_vm1, %v99_v37  ;;  %6575 = vst [vmem:[#allocation26_spill] sm:$0xff] %v4792_v12  ;;  %6576 = vst [vmem:[#allocation27_spill] sm:$0xff] %v4794_v14  ;;  %v4800_v22 = vld [vmem:[#allocation8 + $0x4c] ss:$16 sps:$4 sm:$0xff]   ;;  %v4802_v23 = vld [vmem:[#allocation8 + $0x24] ss:$16 sps:$4 sm:$0xff]  }
  0x4e   :  { %598 = vmatpush1.bf16.msra.mxu0 %v4670_v38  ;;  %639 = vmatpush1.bf16.msra.mxu1 %v4674_v39  ;;  %6577 = vst [vmem:[#allocation28_spill] sm:$0xff] %v4800_v22  ;;  %6578 = vst [vmem:[#allocation29_spill] sm:$0xff] %v4802_v23  ;;  %v4804_v26 = vld [vmem:[#allocation8 + $0x48] ss:$16 sps:$4 sm:$0xff]   ;;  %v4806_v33 = vld [vmem:[#allocation8 + $0x20] ss:$16 sps:$4 sm:$0xff]  }
  0x4f   :  { %599 = vmatprep.subr.bf16.mxu0 %v4678_v40  ;;  %640 = vmatprep.subr.bf16.mxu1 %v4680_v41  ;;  %6579 = vst [vmem:[#allocation30_spill] sm:$0xff] %v4804_v26  ;;  %6580 = vst [vmem:[#allocation31_spill] sm:$0xff] %v4806_v33  ;;  %v4812_v34 = vld [vmem:[#allocation8 + $0x2c] ss:$16 sps:$4 sm:$0xff]   ;;  %v4814_v37 = vld [vmem:[#allocation8 + $0x4] ss:$16 sps:$4 sm:$0xff]  }
  0x50   :  { %255 = vmatprep.mubr.bf16.mxu0 %v6303_v0  ;;  %328 = vmatprep.mubr.bf16.mxu1 %v6303_v0  ;;  %6581 = vst [vmem:[#allocation32_spill] sm:$0xff] %v4812_v34  ;;  %6582 = vst [vmem:[#allocation33_spill] sm:$0xff] %v4814_v37  ;;  %v4816_v44 = vld [vmem:[#allocation8 + $0x28] ss:$16 sps:$4 sm:$0xff]   ;;  %v4818_v45 = vld [vmem:[#allocation8] ss:$16 sps:$4 sm:$0xff]  }
  0x51   :  { %6583 = vst [vmem:[#allocation34_spill] sm:$0xff] %v4816_v44  ;;  %6584 = vst [vmem:[#allocation35_spill] sm:$0xff] %v4818_v45 }
  0x52   :  { %600 = vmatpush1.bf16.msra.mxu0 %v4682_v42  ;;  %641 = vmatpush1.bf16.msra.mxu1 %v4684_v43 }
  0x53   :  { %601 = vmatprep.subr.bf16.mxu0 %v4696_v46  ;;  %642 = vmatprep.subr.bf16.mxu1 %v4698_v47 }
  0x55   :  { %3574 = vmatmul.mubr.msk.bf16.gmra.mxu0 %vm167_vm1, %v100_v50  ;;  %3579 = vmatmul.mubr.msk.bf16.gmra.mxu1 %vm167_vm1, %v100_v50  ;;  %v4824_v50 = vld [vmem:[#allocation8 + $0xc] ss:$16 sps:$4 sm:$0xff]  }
  0x56   :  { %602 = vmatpush1.bf16.msra.mxu0 %v4704_v48  ;;  %643 = vmatpush1.bf16.msra.mxu1 %v4706_v49  ;;  %6585 = vst [vmem:[#allocation36_spill] sm:$0xff] %v4824_v50 }
  0x57   :  { %603 = vmatprep.subr.bf16.mxu0 %v4708_v51  ;;  %644 = vmatprep.subr.bf16.mxu1 %v4710_v52 }
  0x58   :  { %621 = vmatprep.mubr.bf16.mxu0 %v6303_v0  ;;  %662 = vmatprep.mubr.bf16.mxu1 %v6303_v0 }
  0x5a   :  { %604 = vmatpush1.bf16.msra.mxu0 %v4716_v53  ;;  %645 = vmatpush1.bf16.msra.mxu1 %v4718_v54 }
  0x5b   :  { %924 = vmatprep.subr.bf16.mxu0 %v4734_v55  ;;  %965 = vmatprep.subr.bf16.mxu1 %v4740_v57 }
  0x5d   :  { %622 = vmatmul.mubr.bf16.vlgmr.msra.gmra.mxu0 %v6303_v0  ;;  %663 = vmatmul.mubr.bf16.vlgmr.msra.gmra.mxu1 %v6303_v0 }
  0x5e   :  { %956 = vmatprep.mubr.bf16.mxu0 %v6303_v0  ;;  %997 = vmatprep.mubr.bf16.mxu1 %v6303_v0  ;;  %v4826_v0 = vld [vmem:[#allocation8 + $0x8] ss:$16 sps:$4 sm:$0xff]  }
  0x5f   :  { %925 = vmatpush1.bf16.msra.mxu0 %v4736_v56  ;;  %966 = vmatpush1.bf16.msra.mxu1 %v4744_v59  ;;  %6586 = vst [vmem:[#allocation37_spill] sm:$0xff] %v4826_v0 }
  0x60   :  { %926 = vmatprep.subr.bf16.mxu0 %v4742_v58  ;;  %967 = vmatprep.subr.bf16.mxu1 %v4752_v61 }
  0x63   :  { %927 = vmatpush1.bf16.msra.mxu0 %v4746_v60  ;;  %968 = vmatpush1.bf16.msra.mxu1 %v4756_v63 }
  0x64   :  { %928 = vmatprep.subr.bf16.mxu0 %v4754_v62  ;;  %969 = vmatprep.subr.bf16.mxu1 %v4764_v2 }
  0x67   :  { %929 = vmatpush1.bf16.msra.mxu0 %v4758_v1  ;;  %970 = vmatpush1.bf16.msra.mxu1 %v4768_v4 }
  0x68   :  { %930 = vmatprep.subr.bf16.mxu0 %v4766_v3  ;;  %971 = vmatprep.subr.bf16.mxu1 %v4776_v6 }
  0x6b   :  { %931 = vmatpush1.bf16.msra.mxu0 %v4770_v5  ;;  %972 = vmatpush1.bf16.msra.mxu1 %v4780_v8 }
  0x6c   :  { %932 = vmatprep.subr.bf16.mxu0 %v4778_v7  ;;  %973 = vmatprep.subr.bf16.mxu1 %v4788_v10 }
  0x6f   :  { %933 = vmatpush1.bf16.msra.mxu0 %v4782_v9  ;;  %974 = vmatpush1.bf16.msra.mxu1 %v4792_v12 }
  0x70   :  { %934 = vmatprep.subr.bf16.mxu0 %v4790_v11  ;;  %975 = vmatprep.subr.bf16.mxu1 %v4800_v22  ;;  %v4892_v22 = vld [vmem:[#allocation6 + $0x4c] ss:$16 sps:$4 sm:$0xff]  }
  0x71   :  { %6609 = vst [vmem:[#allocation59_spill] sm:$0xff] %v4892_v22 }
  0x73   :  { %935 = vmatpush1.bf16.msra.mxu0 %v4794_v14  ;;  %976 = vmatpush1.bf16.msra.mxu1 %v4804_v26  ;;  %v4852_v26 = vld [vmem:[#allocation6 + $0xc8] ss:$16 sps:$4 sm:$0xff]   ;;  %v4890_v14 = vld [vmem:[#allocation6 + $0x44] ss:$16 sps:$4 sm:$0xff]  }
  0x74   :  { %936 = vmatprep.subr.bf16.mxu0 %v4802_v23  ;;  %977 = vmatprep.subr.bf16.mxu1 %v4812_v34  ;;  %v4832_v23 = vld [vmem:[#allocation6 + $0xe4] ss:$16 sps:$4 sm:$0xff]   ;;  %v4834_v34 = vld [vmem:[#allocation6 + $0xec] ss:$16 sps:$4 sm:$0xff]   ;;  %6595 = vst [vmem:[#allocation45_spill] sm:$0xff] %v4852_v26  ;;  %6608 = vst [vmem:[#allocation58_spill] sm:$0xff] %v4890_v14 }
  0x75   :  { %6588 = vst [vmem:[#allocation38_spill] sm:$0xff] %v4832_v23  ;;  %6589 = vst [vmem:[#allocation39_spill] sm:$0xff] %v4834_v34 }
  0x77   :  { %937 = vmatpush1.bf16.msra.mxu0 %v4806_v33  ;;  %978 = vmatpush1.bf16.msra.mxu1 %v4816_v44  ;;  %v6587_v33 = vmov 0   ;;  %v4838_v44 = vld [vmem:[#allocation6 + $0xe8] ss:$16 sps:$4 sm:$0xff]  }
  0x78   :  { %938 = vmatprep.subr.bf16.mxu0 %v4814_v37  ;;  %979 = vmatprep.subr.bf16.mxu1 %v4824_v50  ;;  %v4836_v37 = vld [vmem:[#allocation6 + $0xe0] ss:$16 sps:$4 sm:$0xff]   ;;  %6591 = vst [vmem:[#allocation41_spill] sm:$0xff] %v4838_v44 }
  0x79   :  { %6590 = vst [vmem:[#allocation40_spill] sm:$0xff] %v4836_v37  ;;  %v4850_v50 = vld [vmem:[#allocation6 + $0xc0] ss:$16 sps:$4 sm:$0xff]  }
  0x7a   :  { %6594 = vst [vmem:[#allocation44_spill] sm:$0xff] %v4850_v50 }
  0x7b   :  { %939 = vmatpush1.bf16.msra.mxu0 %v4818_v45  ;;  %980 = vmatpush1.bf16.msra.mxu1 %v4826_v0  ;;  %v4845_v0 = vld [vmem:[#allocation6 + $0xc4] ss:$16 sps:$4 sm:$0xff]   ;;  %v4847_v45 = vld [vmem:[#allocation6 + $0xcc] ss:$16 sps:$4 sm:$0xff]  }
  0x7c   :  { %1166 = vmatprep.subr.bf16.mxu0 %v4832_v23  ;;  %1207 = vmatprep.subr.bf16.mxu1 %v4834_v34  ;;  %6592 = vst [vmem:[#allocation42_spill] sm:$0xff] %v4845_v0  ;;  %6593 = vst [vmem:[#allocation43_spill] sm:$0xff] %v4847_v45  ;;  %v4862_v34 = vld [vmem:[#allocation6 + $0xa0] ss:$16 sps:$4 sm:$0xff]   ;;  %v4864_v23 = vld [vmem:[#allocation6 + $0xa8] ss:$16 sps:$4 sm:$0xff]  }
  0x7d   :  { %6598 = vst [vmem:[#allocation48_spill] sm:$0xff] %v4862_v34  ;;  %6599 = vst [vmem:[#allocation49_spill] sm:$0xff] %v4864_v23 }
  0x7e   :  { %957 = vmatmul.mubr.bf16.vlgmr.msra.gmra.mxu0 %v6587_v33  ;;  %998 = vmatmul.mubr.bf16.vlgmr.msra.gmra.mxu1 %v6587_v33 }
  0x7f   :  { %1198 = vmatprep.mubr.bf16.mxu0 %v6587_v33  ;;  %1167 = vmatpush1.bf16.msra.mxu0 %v4836_v37  ;;  %v4858_v37 = vld [vmem:[#allocation6 + $0xa4] ss:$16 sps:$4 sm:$0xff]  }
  0x80   :  { %1208 = vmatpush1.bf16.msra.mxu1 %v4838_v44  ;;  %1239 = vmatprep.mubr.bf16.mxu1 %v6587_v33  ;;  %6596 = vst [vmem:[#allocation46_spill] sm:$0xff] %v4858_v37  ;;  %v4860_v44 = vld [vmem:[#allocation6 + $0xac] ss:$16 sps:$4 sm:$0xff]  }
  0x81   :  { %1168 = vmatprep.subr.bf16.mxu0 %v4845_v0  ;;  %1209 = vmatprep.subr.bf16.mxu1 %v4847_v45  ;;  %6597 = vst [vmem:[#allocation47_spill] sm:$0xff] %v4860_v44  ;;  %v4870_v45 = vld [vmem:[#allocation6 + $0x84] ss:$16 sps:$4 sm:$0xff]   ;;  %v4876_v0 = vld [vmem:[#allocation6 + $0x88] ss:$16 sps:$4 sm:$0xff]  }
  0x82   :  { %6600 = vst [vmem:[#allocation50_spill] sm:$0xff] %v4870_v45  ;;  %6603 = vst [vmem:[#allocation53_spill] sm:$0xff] %v4876_v0 }
  0x83   :  { %1169 = vmatpush1.bf16.msra.mxu0 %v4850_v50  ;;  %v4872_v50 = vld [vmem:[#allocation6 + $0x8c] ss:$16 sps:$4 sm:$0xff]  }
  0x84   :  { %1210 = vmatpush1.bf16.msra.mxu1 %v4852_v26  ;;  %1170 = vmatprep.subr.bf16.mxu0 %v4858_v37  ;;  %6601 = vst [vmem:[#allocation51_spill] sm:$0xff] %v4872_v50  ;;  %v4874_v26 = vld [vmem:[#allocation6 + $0x80] ss:$16 sps:$4 sm:$0xff]   ;;  %v4888_v37 = vld [vmem:[#allocation6 + $0x68] ss:$16 sps:$4 sm:$0xff]  }
  0x85   :  { %1211 = vmatprep.subr.bf16.mxu1 %v4860_v44  ;;  %6602 = vst [vmem:[#allocation52_spill] sm:$0xff] %v4874_v26  ;;  %v4882_v44 = vld [vmem:[#allocation6 + $0x64] ss:$16 sps:$4 sm:$0xff]   ;;  %6607 = vst [vmem:[#allocation57_spill] sm:$0xff] %v4888_v37 }
  0x86   :  { %6604 = vst [vmem:[#allocation54_spill] sm:$0xff] %v4882_v44 }
  0x87   :  { %1171 = vmatpush1.bf16.msra.mxu0 %v4862_v34  ;;  %v4884_v34 = vld [vmem:[#allocation6 + $0x6c] ss:$16 sps:$4 sm:$0xff]  }
  0x88   :  { %1212 = vmatpush1.bf16.msra.mxu1 %v4864_v23  ;;  %1172 = vmatprep.subr.bf16.mxu0 %v4870_v45  ;;  %6605 = vst [vmem:[#allocation55_spill] sm:$0xff] %v4884_v34  ;;  %v4886_v23 = vld [vmem:[#allocation6 + $0x60] ss:$16 sps:$4 sm:$0xff]   ;;  %v4906_v45 = vld [vmem:[#allocation6 + $0x2c] ss:$16 sps:$4 sm:$0xff]  }
  0x89   :  { %1213 = vmatprep.subr.bf16.mxu1 %v4872_v50  ;;  %6606 = vst [vmem:[#allocation56_spill] sm:$0xff] %v4886_v23  ;;  %v4903_v50 = vld [vmem:[#allocation6 + $0x24] ss:$16 sps:$4 sm:$0xff]   ;;  %6613 = vst [vmem:[#allocation63_spill] sm:$0xff] %v4906_v45 }
  0x8a   :  { %6612 = vst [vmem:[#allocation62_spill] sm:$0xff] %v4903_v50 }
  0x8b   :  { %1173 = vmatpush1.bf16.msra.mxu0 %v4874_v26  ;;  %v4897_v26 = vld [vmem:[#allocation6 + $0x40] ss:$16 sps:$4 sm:$0xff]  }
  0x8c   :  { %1214 = vmatpush1.bf16.msra.mxu1 %v4876_v0  ;;  %1174 = vmatprep.subr.bf16.mxu0 %v4882_v44  ;;  %6610 = vst [vmem:[#allocation60_spill] sm:$0xff] %v4897_v26  ;;  %v4901_v0 = vld [vmem:[#allocation6 + $0x48] ss:$16 sps:$4 sm:$0xff]   ;;  %v4909_v44 = vld [vmem:[#allocation6 + $0x20] ss:$16 sps:$4 sm:$0xff]  }
  0x8d   :  { %1215 = vmatprep.subr.bf16.mxu1 %v4884_v34  ;;  %6611 = vst [vmem:[#allocation61_spill] sm:$0xff] %v4901_v0  ;;  %6614 = vst [vmem:[#allocation64_spill] sm:$0xff] %v4909_v44 }
  0x8f   :  { %1175 = vmatpush1.bf16.msra.mxu0 %v4886_v23  ;;  %v4913_v23 = vld [vmem:[#allocation6 + $0x28] ss:$16 sps:$4 sm:$0xff]  }
  0x90   :  { %1216 = vmatpush1.bf16.msra.mxu1 %v4888_v37  ;;  %1176 = vmatprep.subr.bf16.mxu0 %v4890_v14  ;;  %6615 = vst [vmem:[#allocation65_spill] sm:$0xff] %v4913_v23  ;;  %v4915_v37 = vld [vmem:[#allocation6 + $0x4] ss:$16 sps:$4 sm:$0xff]   ;;  %v4918_v14 = vld [vmem:[#allocation6 + $0xc] ss:$16 sps:$4 sm:$0xff]  }
  0x91   :  { %1217 = vmatprep.subr.bf16.mxu1 %v4892_v22  ;;  %6616 = vst [vmem:[#allocation66_spill] sm:$0xff] %v4915_v37  ;;  %6617 = vst [vmem:[#allocation67_spill] sm:$0xff] %v4918_v14  ;;  %v4921_v22 = vld [vmem:[#allocation6] ss:$16 sps:$4 sm:$0xff]  }
  0x92   :  { %6618 = vst [vmem:[#allocation68_spill] sm:$0xff] %v4921_v22 }
  0x93   :  { %1177 = vmatpush1.bf16.msra.mxu0 %v4897_v26  ;;  %v4925_v26 = vld [vmem:[#allocation6 + $0x8] ss:$16 sps:$4 sm:$0xff]  }
  0x94   :  { %1218 = vmatpush1.bf16.msra.mxu1 %v4901_v0  ;;  %1178 = vmatprep.subr.bf16.mxu0 %v4903_v50  ;;  %6619 = vst [vmem:[#allocation69_spill] sm:$0xff] %v4925_v26 }
  0x95   :  { %1219 = vmatprep.subr.bf16.mxu1 %v4906_v45  ;;  %v111_v45 = vlaneseq }
  0x97   :  { %1179 = vmatpush1.bf16.msra.mxu0 %v4909_v44  ;;  %v4932_v44 = vshrl.u32 %v111_v45, 7 }
  0x98   :  { %1220 = vmatpush1.bf16.msra.mxu1 %v4913_v23  ;;  %1180 = vmatprep.subr.bf16.mxu0 %v4915_v37 }
  0x99   :  { %1221 = vmatprep.subr.bf16.mxu1 %v4918_v14  ;;  %6620 = vst [vmem:[#allocation70_spill] sm:$0xff] %v4932_v44  ;;  %v6369_v50 = vsub.s32 2, %v4932_v44  ;;  %v6376_v23 = vsub.s32 0, %v4932_v44  ;;  %v6379_v37 = vsub.s32 3, %v4932_v44  ;;  %v109_v14 = vld [vmem:[%s6296_s3] sm:$0xf] }
  0x9a   :  { %v6384_v9 = vsub.s32 1, %v4932_v44 }
  0x9b   :  { %1181 = vmatpush1.bf16.msra.mxu0 %v4921_v22  ;;  %v4954_v34 = vrot.slane %v109_v14, %v6379_v37 }
  0x9c   :  { %1222 = vmatpush1.bf16.msra.mxu1 %v4925_v26  ;;  %1280 = vmatprep.subr.bf16.mxu0 %v4600_v13  ;;  %v4944_v13 = vrot.slane %v109_v14, %v6369_v50  ;;  %v114_v26 = vrot.slane %v109_v14, %v6376_v23  ;;  %v4969_v37 = vrot.slane %v109_v14, %v6384_v9 }
  0x9d   :  { %1321 = vmatprep.subr.bf16.mxu1 %v4602_v15 }
  0x9e   :  { %6625 = vst [vmem:[#allocation75_spill] sm:$0xff] %v4969_v37 }
  0xfd   :  { %v227_v22 = vpop.f32.mrf.mxu0  ;;  %v4940_v0 = vpop.f32.mrf.mxu1 }
  0xff   :  { %v4946_v15 = vpop.f32.mrf.mxu0  ;;  %v4948_v45 = vpop.f32.mrf.mxu1 }
 0x101   :  { %v231_v11 = vpop.f32.mrf.mxu0  ;;  %v304_v12 = vpop.f32.mrf.mxu1 }
 0x102   :  { %v4957_v10 = vadd.f32 %v231_v11, %v114_v26  ;;  %v4960_v50 = vadd.f32 %v304_v12, %v4944_v13 }
 0x103   :  { %v4962_v7 = vpop.f32.mrf.mxu0  ;;  %v306_v8 = vpop.f32.mrf.mxu1 }
 0x104   :  { %6621 = vst [vmem:[#allocation71_spill] sm:$0xff] %v4957_v10  ;;  %6622 = vst [vmem:[#allocation72_spill] sm:$0xff] %v4960_v50  ;;  %v4965_v5 = vadd.f32 %v306_v8, %v4954_v34 }
 0x105   :  { %6623 = vst [vmem:[#allocation73_spill] sm:$0xff] %v4962_v7  ;;  %v237_v23 = vpop.f32.mrf.mxu0  ;;  %v310_v6 = vpop.f32.mrf.mxu1 }
 0x106   :  { %6624 = vst [vmem:[#allocation74_spill] sm:$0xff] %v4965_v5  ;;  %v4971_v3 = vadd.f32 %v237_v23, %v114_v26  ;;  %v4974_v11 = vadd.f32 %v310_v6, %v4944_v13 }
 0x107   :  { %v239_v10 = vpop.f32.mrf.mxu0  ;;  %v312_v12 = vpop.f32.mrf.mxu1 }
 0x108   :  { %6626 = vst [vmem:[#allocation76_spill] sm:$0xff] %v4971_v3  ;;  %6627 = vst [vmem:[#allocation77_spill] sm:$0xff] %v4974_v11  ;;  %v4977_v50 = vadd.f32 %v239_v10, %v4969_v37  ;;  %v4980_v7 = vadd.f32 %v312_v12, %v4954_v34 }
 0x109   :  { %v241_v8 = vpop.f32.mrf.mxu0  ;;  %v314_v5 = vpop.f32.mrf.mxu1 }
 0x10a   :  { %6628 = vst [vmem:[#allocation78_spill] sm:$0xff] %v4977_v50  ;;  %6629 = vst [vmem:[#allocation79_spill] sm:$0xff] %v4980_v7  ;;  %v4982_v4 = vadd.f32 %v241_v8, %v114_v26  ;;  %v4985_v14 = vadd.f32 %v314_v5, %v4944_v13 }
 0x10b   :  { %v243_v23 = vpop.f32.mrf.mxu0  ;;  %v316_v9 = vpop.f32.mrf.mxu1 }
 0x10c   :  { %6630 = vst [vmem:[#allocation80_spill] sm:$0xff] %v4982_v4  ;;  %6631 = vst [vmem:[#allocation81_spill] sm:$0xff] %v4985_v14  ;;  %v4988_v6 = vadd.f32 %v243_v23, %v4969_v37  ;;  %v4991_v11 = vadd.f32 %v316_v9, %v4954_v34 }
 0x10d   :  { %v247_v10 = vpop.f32.mrf.mxu0  ;;  %v320_v50 = vpop.f32.mrf.mxu1 }
 0x10e   :  { %6632 = vst [vmem:[#allocation82_spill] sm:$0xff] %v4988_v6  ;;  %6633 = vst [vmem:[#allocation83_spill] sm:$0xff] %v4991_v11  ;;  %v4993_v3 = vadd.f32 %v247_v10, %v114_v26  ;;  %v4996_v12 = vadd.f32 %v320_v50, %v4944_v13 }
 0x10f   :  { %v249_v8 = vpop.f32.mrf.mxu0  ;;  %v322_v4 = vpop.f32.mrf.mxu1 }
 0x110   :  { %6634 = vst [vmem:[#allocation84_spill] sm:$0xff] %v4993_v3  ;;  %6635 = vst [vmem:[#allocation85_spill] sm:$0xff] %v4996_v12  ;;  %v4999_v5 = vadd.f32 %v249_v8, %v4969_v37  ;;  %v5002_v14 = vadd.f32 %v322_v4, %v4954_v34 }
 0x111   :  { %v251_v23 = vpop.f32.mrf.mxu0  ;;  %v324_v6 = vpop.f32.mrf.mxu1 }
 0x112   :  { %6636 = vst [vmem:[#allocation86_spill] sm:$0xff] %v4999_v5  ;;  %6637 = vst [vmem:[#allocation87_spill] sm:$0xff] %v5002_v14  ;;  %v5004_v7 = vadd.f32 %v251_v23, %v114_v26  ;;  %v5007_v9 = vadd.f32 %v324_v6, %v4944_v13 }
 0x113   :  { %v253_v10 = vpop.f32.mrf.mxu0  ;;  %v326_v3 = vpop.f32.mrf.mxu1 }
 0x114   :  { %6638 = vst [vmem:[#allocation88_spill] sm:$0xff] %v5004_v7  ;;  %6639 = vst [vmem:[#allocation89_spill] sm:$0xff] %v5007_v9  ;;  %v5010_v50 = vadd.f32 %v253_v10, %v4969_v37  ;;  %v5013_v12 = vadd.f32 %v326_v3, %v4954_v34 }
 0x115   :  { %v257_v8 = vpop.f32.mrf.mxu0  ;;  %v330_v5 = vpop.f32.mrf.mxu1 }
 0x116   :  { %6640 = vst [vmem:[#allocation90_spill] sm:$0xff] %v5010_v50  ;;  %6641 = vst [vmem:[#allocation91_spill] sm:$0xff] %v5013_v12  ;;  %v5015_v11 = vadd.f32 %v257_v8, %v114_v26  ;;  %v5018_v4 = vadd.f32 %v330_v5, %v4944_v13  ;;  %v228_v12 = vadd.f32 %v227_v22, %v114_v26 }
 0x117   :  { %v259_v23 = vpop.f32.mrf.mxu0  ;;  %v332_v7 = vpop.f32.mrf.mxu1 }
 0x118   :  { %6642 = vst [vmem:[#allocation92_spill] sm:$0xff] %v5015_v11  ;;  %6643 = vst [vmem:[#allocation93_spill] sm:$0xff] %v5018_v4  ;;  %v5021_v6 = vadd.f32 %v259_v23, %v4969_v37  ;;  %v5024_v9 = vadd.f32 %v332_v7, %v4954_v34  ;;  %v230_v7 = vadd.f32 %v4946_v15, %v4969_v37 }
 0x119   :  { %v261_v10 = vpop.f32.mrf.mxu0  ;;  %v334_v50 = vpop.f32.mrf.mxu1 }
 0x11a   :  { %6644 = vst [vmem:[#allocation94_spill] sm:$0xff] %v5021_v6  ;;  %6645 = vst [vmem:[#allocation95_spill] sm:$0xff] %v5024_v9  ;;  %v5026_v14 = vadd.f32 %v261_v10, %v114_v26  ;;  %v5029_v3 = vadd.f32 %v334_v50, %v4944_v13 }
 0x11b   :  { %v263_v8 = vpop.f32.mrf.mxu0  ;;  %v336_v11 = vpop.f32.mrf.mxu1 }
 0x11c   :  { %6646 = vst [vmem:[#allocation96_spill] sm:$0xff] %v5026_v14  ;;  %6647 = vst [vmem:[#allocation97_spill] sm:$0xff] %v5029_v3  ;;  %v5032_v5 = vadd.f32 %v263_v8, %v4969_v37  ;;  %v5035_v4 = vadd.f32 %v336_v11, %v4954_v34  ;;  %v303_v11 = vadd.f32 %v4948_v45, %v4954_v34 }
 0x11d   :  { %v623_v23 = vpop.f32.mrf.mxu0  ;;  %v664_v6 = vpop.f32.mrf.mxu1 }
 0x11e   :  { %6648 = vst [vmem:[#allocation98_spill] sm:$0xff] %v5032_v5  ;;  %6649 = vst [vmem:[#allocation99_spill] sm:$0xff] %v5035_v4  ;;  %v671_v9 = vadd.f32 %v623_v23, %v228_v12  ;;  %v301_v5 = vadd.f32 %v4940_v0, %v4944_v13 }
 0x11f   :  { %v625_v10 = vpop.f32.mrf.mxu0  ;;  %v666_v14 = vpop.f32.mrf.mxu1 }
 0x120   :  { %v3612_v44 = vmul.f32 -1.442695, %v671_v9  ;;  %v672_v50 = vadd.f32 %v625_v10, %v230_v7  ;;  %v674_v4 = vadd.f32 %v666_v14, %v303_v11  ;;  %v673_v23 = vadd.f32 %v664_v6, %v301_v5  ;;  %v6673_v5 = vld [vmem:[#allocation39_spill] sm:$0xff] }
 0x121   :  { %v627_v3 = vpop.f32.mrf.mxu0  ;;  %v668_v1 = vpop.f32.mrf.mxu1 }
 0x122   :  { %3938 = vpow2.f32 %v3612_v44  ;;  %v3613_v22 = vmul.f32 -1.442695, %v672_v50  ;;  %v3614_v15 = vmul.f32 -1.442695, %v674_v4 }
 0x123   :  { %v628_v26 = vpop.f32.mrf.mxu0  ;;  %v669_v8 = vpop.f32.mrf.mxu1 }
 0x124   :  { %3940 = vpow2.f32 %v3613_v22  ;;  %v371_v22 = vld [vmem:[%s6299_s6] sm:$0xf]  ;;  %v6674_v26 = vld [vmem:[#allocation70_spill] sm:$0xff] }
 0x125   :  { %3942 = vpow2.f32 %v3614_v15  ;;  %v6675_v8 = vsub.s32 0, %v6674_v26 }
 0x127   :  { %v5119_v11 = vrot.slane %v371_v22, %v6675_v8 }
 0x12f   :  { %v3939_v12 = vpop.eup %3938 }
 0x130   :  { %v678_v37 = vadd.f32 1.0, %v3939_v12 }
 0x131   :  { %v3941_v9 = vpop.eup %3940 }
 0x132   :  { %3944 = vrcp.f32 %v678_v37  ;;  %v684_v1 = vadd.f32 1.0, %v3941_v9  ;;  %v3943_v44 = vpop.eup %3942  ;;  %v6672_v37 = vld [vmem:[#allocation38_spill] sm:$0xff]  ;;  %v6676_v9 = vsub.s32 1, %v6674_v26 }
 0x133   :  { %3946 = vtanh.f32 %v673_v23  ;;  %v691_v50 = vadd.f32 1.0, %v3943_v44 }
 0x134   :  { %3948 = vrcp.f32 %v684_v1  ;;  %v5123_v1 = vrot.slane %v371_v22, %v6676_v9 }
 0x135   :  { %3950 = vrcp.f32 %v691_v50 }
 0x13f   :  { %v3945_v3 = vpop.eup %3944 }
 0x140   :  { %v3947_v7 = vpop.eup %3946 }
 0x141   :  { %v3949_v10 = vpop.eup %3948  ;;  %v695_v45 = vmul.f32 %v3947_v7, %v3945_v3 }
 0x142   :  { %v694_v34 = vmul.f32 0.0, %v3949_v10  ;;  %v3951_v0 = vpop.eup %3950 }
 0x144   :  { %v5043_v14 = vadd.f32 %v695_v45, %v694_v34 }
 0x146   :  { %3952 = vtanh.f32 %v5043_v14 }
 0x153   :  { %v3953_v13 = vpop.eup %3952 }
 0x154   :  { %v698_v4 = vmul.f32 %v3953_v13, %v3951_v0 }
 0x156   :  { %v699_v6 = vpack.c.bf16 %v698_v4, %v698_v4 }
 0x158   :  { %1199 = vmatmul.mubr.bf16.vlgmr.msra.gmra.mxu0 %v699_v6  ;;  %1240 = vmatmul.mubr.bf16.vlgmr.msra.gmra.mxu1 %v699_v6 }
 0x159   :  { %1281 = vmatpush1.bf16.msra.mxu0 %v4604_v16  ;;  %1322 = vmatpush1.bf16.msra.mxu1 %v4606_v17  ;;  %v958_v16 = vpop.f32.mrf.mxu0 }
 0x15a   :  { %1282 = vmatprep.subr.bf16.mxu0 %v4608_v18  ;;  %1323 = vmatprep.subr.bf16.mxu1 %v4612_v19  ;;  %v999_v19 = vpop.f32.mrf.mxu1 }
 0x15b   :  { %1312 = vmatprep.mubr.bf16.mxu0 %v6587_v33  ;;  %1353 = vmatprep.mubr.bf16.mxu1 %v6587_v33  ;;  %v960_v17 = vpop.f32.mrf.mxu0 }
 0x15d   :  { %1283 = vmatpush1.bf16.msra.mxu0 %v4614_v20  ;;  %1324 = vmatpush1.bf16.msra.mxu1 %v4616_v21  ;;  %v962_v18 = vpop.f32.mrf.mxu0  ;;  %v1001_v21 = vpop.f32.mrf.mxu1 }
 0x15e   :  { %1284 = vmatprep.subr.bf16.mxu0 %v4630_v24  ;;  %1325 = vmatprep.subr.bf16.mxu1 %v4632_v25 }
 0x15f   :  { %v963_v20 = vpop.f32.mrf.mxu0  ;;  %v1003_v24 = vpop.f32.mrf.mxu1 }
 0x161   :  { %1285 = vmatpush1.bf16.msra.mxu0 %v4638_v27  ;;  %1326 = vmatpush1.bf16.msra.mxu1 %v4640_v28  ;;  %v1004_v25 = vpop.f32.mrf.mxu1  ;;  %v6650_v27 = vld [vmem:[#allocation16_spill] sm:$0xff]  ;;  %v6651_v28 = vld [vmem:[#allocation18_spill] sm:$0xff] }
 0x162   :  { %1286 = vmatprep.subr.bf16.mxu0 %v4642_v29  ;;  %1327 = vmatprep.subr.bf16.mxu1 %v4646_v30  ;;  %v6652_v29 = vld [vmem:[#allocation17_spill] sm:$0xff]  ;;  %v6653_v30 = vld [vmem:[#allocation20_spill] sm:$0xff]  ;;  %v6678_v25 = vsub.s32 2, %v6674_v26 }
 0x165   :  { %1287 = vmatpush1.bf16.msra.mxu0 %v4648_v31  ;;  %1328 = vmatpush1.bf16.msra.mxu1 %v4652_v32  ;;  %v6654_v31 = vld [vmem:[#allocation19_spill] sm:$0xff]  ;;  %v6655_v32 = vld [vmem:[#allocation22_spill] sm:$0xff] }
 0x166   :  { %1288 = vmatprep.subr.bf16.mxu0 %v4662_v35  ;;  %1329 = vmatprep.subr.bf16.mxu1 %v4666_v36  ;;  %v6656_v35 = vld [vmem:[#allocation21_spill] sm:$0xff]  ;;  %v6657_v36 = vld [vmem:[#allocation24_spill] sm:$0xff] }
 0x169   :  { %1289 = vmatpush1.bf16.msra.mxu0 %v4670_v38  ;;  %1330 = vmatpush1.bf16.msra.mxu1 %v4674_v39  ;;  %v6658_v38 = vld [vmem:[#allocation23_spill] sm:$0xff]  ;;  %v6659_v39 = vld [vmem:[#allocation26_spill] sm:$0xff] }
 0x16a   :  { %1290 = vmatprep.subr.bf16.mxu0 %v4678_v40  ;;  %1331 = vmatprep.subr.bf16.mxu1 %v4680_v41  ;;  %v6660_v40 = vld [vmem:[#allocation25_spill] sm:$0xff]  ;;  %v6661_v41 = vld [vmem:[#allocation28_spill] sm:$0xff] }
 0x16d   :  { %1291 = vmatpush1.bf16.msra.mxu0 %v4682_v42  ;;  %1332 = vmatpush1.bf16.msra.mxu1 %v4684_v43  ;;  %v6662_v42 = vld [vmem:[#allocation27_spill] sm:$0xff]  ;;  %v6663_v43 = vld [vmem:[#allocation30_spill] sm:$0xff] }
 0x16e   :  { %1292 = vmatprep.subr.bf16.mxu0 %v4696_v46  ;;  %1333 = vmatprep.subr.bf16.mxu1 %v4698_v47  ;;  %v6664_v46 = vld [vmem:[#allocation29_spill] sm:$0xff]  ;;  %v6665_v47 = vld [vmem:[#allocation32_spill] sm:$0xff] }
 0x171   :  { %1293 = vmatpush1.bf16.msra.mxu0 %v4704_v48  ;;  %1334 = vmatpush1.bf16.msra.mxu1 %v4706_v49  ;;  %v6666_v48 = vld [vmem:[#allocation31_spill] sm:$0xff]  ;;  %v6667_v49 = vld [vmem:[#allocation34_spill] sm:$0xff] }
 0x172   :  { %1294 = vmatprep.subr.bf16.mxu0 %v4708_v51  ;;  %1335 = vmatprep.subr.bf16.mxu1 %v4710_v52  ;;  %v6668_v51 = vld [vmem:[#allocation33_spill] sm:$0xff]  ;;  %v6669_v52 = vld [vmem:[#allocation36_spill] sm:$0xff] }
 0x175   :  { %1295 = vmatpush1.bf16.msra.mxu0 %v4716_v53  ;;  %1336 = vmatpush1.bf16.msra.mxu1 %v4718_v54  ;;  %v6670_v53 = vld [vmem:[#allocation35_spill] sm:$0xff]  ;;  %v6671_v54 = vld [vmem:[#allocation37_spill] sm:$0xff] }
 0x176   :  { %1392 = vmatprep.subr.bf16.mxu0 %v4734_v55  ;;  %1433 = vmatprep.subr.bf16.mxu1 %v4740_v57 }
 0x178   :  { %1313 = vmatmul.mubr.bf16.vlgmr.msra.gmra.mxu0 %v699_v6  ;;  %1354 = vmatmul.mubr.bf16.vlgmr.msra.gmra.mxu1 %v699_v6 }
 0x179   :  { %1393 = vmatpush1.bf16.msra.mxu0 %v4736_v56  ;;  %1434 = vmatpush1.bf16.msra.mxu1 %v4744_v59 }
 0x17a   :  { %1394 = vmatprep.subr.bf16.mxu0 %v4742_v58  ;;  %1435 = vmatprep.subr.bf16.mxu1 %v4752_v61 }
 0x17b   :  { %1424 = vmatprep.mubr.bf16.mxu0 %v6587_v33  ;;  %1465 = vmatprep.mubr.bf16.mxu1 %v6587_v33 }
 0x17d   :  { %1395 = vmatpush1.bf16.msra.mxu0 %v4746_v60  ;;  %1436 = vmatpush1.bf16.msra.mxu1 %v4756_v63 }
 0x17e   :  { %1396 = vmatprep.subr.bf16.mxu0 %v4754_v62  ;;  %1437 = vmatprep.subr.bf16.mxu1 %v4764_v2 }
 0x181   :  { %1397 = vmatpush1.bf16.msra.mxu0 %v6650_v27  ;;  %1438 = vmatpush1.bf16.msra.mxu1 %v6651_v28 }
 0x182   :  { %1398 = vmatprep.subr.bf16.mxu0 %v6652_v29  ;;  %1439 = vmatprep.subr.bf16.mxu1 %v6653_v30 }
 0x185   :  { %1399 = vmatpush1.bf16.msra.mxu0 %v6654_v31  ;;  %1440 = vmatpush1.bf16.msra.mxu1 %v6655_v32 }
 0x186   :  { %1400 = vmatprep.subr.bf16.mxu0 %v6656_v35  ;;  %1441 = vmatprep.subr.bf16.mxu1 %v6657_v36 }
 0x189   :  { %1401 = vmatpush1.bf16.msra.mxu0 %v6658_v38  ;;  %1442 = vmatpush1.bf16.msra.mxu1 %v6659_v39 }
 0x18a   :  { %1402 = vmatprep.subr.bf16.mxu0 %v6660_v40  ;;  %1443 = vmatprep.subr.bf16.mxu1 %v6661_v41 }
 0x18d   :  { %1403 = vmatpush1.bf16.msra.mxu0 %v6662_v42  ;;  %1444 = vmatpush1.bf16.msra.mxu1 %v6663_v43 }
 0x18e   :  { %1404 = vmatprep.subr.bf16.mxu0 %v6664_v46  ;;  %1445 = vmatprep.subr.bf16.mxu1 %v6665_v47 }
 0x191   :  { %1405 = vmatpush1.bf16.msra.mxu0 %v6666_v48  ;;  %1446 = vmatpush1.bf16.msra.mxu1 %v6667_v49 }
 0x192   :  { %1406 = vmatprep.subr.bf16.mxu0 %v6668_v51  ;;  %1447 = vmatprep.subr.bf16.mxu1 %v6669_v52 }
 0x195   :  { %1407 = vmatpush1.bf16.msra.mxu0 %v6670_v53  ;;  %1448 = vmatpush1.bf16.msra.mxu1 %v6671_v54 }
 0x196   :  { %1474 = vmatprep.subr.bf16.mxu0 %v6672_v37  ;;  %1515 = vmatprep.subr.bf16.mxu1 %v6673_v5 }
 0x218   :  { %v1200_v15 = vpop.f32.mrf.mxu0  ;;  %v1241_v12 = vpop.f32.mrf.mxu1 }
 0x219   :  { %v1201_v23 = vadd.f32 %v1200_v15, %v958_v16  ;;  %v6677_v16 = vsub.s32 3, %v6674_v26  ;;  %v1242_v8 = vadd.f32 %v1241_v12, %v999_v19  ;;  %v6681_v26 = vld [vmem:[#allocation71_spill] sm:$0xff] }
 0x21a   :  { %v1202_v44 = vpop.f32.mrf.mxu0  ;;  %v1243_v3 = vpop.f32.mrf.mxu1 }
 0x21b   :  { %v1248_v7 = vadd.f32 %v1201_v23, %v5119_v11  ;;  %v1203_v10 = vadd.f32 %v1202_v44, %v960_v17  ;;  %v5129_v18 = vrot.slane %v371_v22, %v6677_v16  ;;  %v1244_v20 = vadd.f32 %v1243_v3, %v1001_v21  ;;  %v6679_v3 = vld [vmem:[#allocation75_spill] sm:$0xff] }
 0x21c   :  { %v1204_v50 = vpop.f32.mrf.mxu0  ;;  %v1245_v34 = vpop.f32.mrf.mxu1  ;;  %v5134_v17 = vrot.slane %v371_v22, %v6678_v25 }
 0x21d   :  { %v3679_v45 = vmul.f32 -1.442695, %v1248_v7  ;;  %v1249_v0 = vadd.f32 %v1203_v10, %v5123_v1  ;;  %v1251_v24 = vadd.f32 %v1244_v20, %v5129_v18  ;;  %v6680_v34 = vld [vmem:[#allocation73_spill] sm:$0xff] }
 0x21e   :  { %v1205_v13 = vpop.f32.mrf.mxu0  ;;  %v1246_v4 = vpop.f32.mrf.mxu1  ;;  %v1250_v9 = vadd.f32 %v1242_v8, %v5134_v17 }
 0x21f   :  { %3954 = vpow2.f32 %v3679_v45  ;;  %v3680_v6 = vmul.f32 -1.442695, %v1249_v0  ;;  %v3681_v15 = vmul.f32 -1.442695, %v1251_v24  ;;  %v234_v45 = vadd.f32 %v6680_v34, %v6679_v3  ;;  %v6683_v34 = vld [vmem:[#allocation72_spill] sm:$0xff] }
 0x221   :  { %3956 = vpow2.f32 %v3680_v6 }
 0x222   :  { %3958 = vpow2.f32 %v3681_v15 }
 0x22c   :  { %v3955_v23 = vpop.eup %3954 }
 0x22d   :  { %v1255_v44 = vadd.f32 1.0, %v3955_v23 }
 0x22e   :  { %v3957_v7 = vpop.eup %3956 }
 0x22f   :  { %3960 = vrcp.f32 %v1255_v44  ;;  %v1261_v10 = vadd.f32 1.0, %v3957_v7  ;;  %v3959_v12 = vpop.eup %3958 }
 0x230   :  { %3962 = vtanh.f32 %v1250_v9  ;;  %v1268_v15 = vadd.f32 1.0, %v3959_v12 }
 0x231   :  { %3964 = vrcp.f32 %v1261_v10 }
 0x238   :  { %v1314_v50 = vpop.f32.mrf.mxu0  ;;  %v1355_v21 = vpop.f32.mrf.mxu1 }
 0x239   :  { %v1362_v22 = vadd.f32 %v1314_v50, %v6681_v26  ;;  %v6682_v50 = vld [vmem:[#allocation74_spill] sm:$0xff] }
 0x23a   :  { %v1316_v0 = vpop.f32.mrf.mxu0  ;;  %v1357_v19 = vpop.f32.mrf.mxu1 }
 0x23b   :  { %v3682_v13 = vmul.f32 -1.442695, %v1362_v22  ;;  %v1363_v4 = vadd.f32 %v1316_v0, %v234_v45  ;;  %v1365_v3 = vadd.f32 %v1357_v19, %v6682_v50  ;;  %v1364_v45 = vadd.f32 %v1355_v21, %v6683_v34  ;;  %v6685_v19 = vld [vmem:[#allocation41_spill] sm:$0xff]  ;;  %v6686_v21 = vld [vmem:[#allocation42_spill] sm:$0xff] }
 0x23c   :  { %v3961_v6 = vpop.eup %3960  ;;  %v1318_v16 = vpop.f32.mrf.mxu0  ;;  %v6690_v50 = vld [vmem:[#allocation46_spill] sm:$0xff] }
 0x23d   :  { %v1359_v20 = vpop.f32.mrf.mxu1  ;;  %v3963_v24 = vpop.eup %3962  ;;  %3966 = vpow2.f32 %v3682_v13  ;;  %v3683_v25 = vmul.f32 -1.442695, %v1363_v4  ;;  %v3684_v26 = vmul.f32 -1.442695, %v1365_v3  ;;  %v6691_v3 = vld [vmem:[#allocation47_spill] sm:$0xff] }
 0x23e   :  { %v3965_v8 = vpop.eup %3964  ;;  %v1319_v23 = vpop.f32.mrf.mxu0  ;;  %v1272_v7 = vmul.f32 %v3963_v24, %v3961_v6  ;;  %v6684_v24 = vld [vmem:[#allocation40_spill] sm:$0xff] }
 0x23f   :  { %v1360_v9 = vpop.f32.mrf.mxu1  ;;  %v1271_v44 = vmul.f32 0.0, %v3965_v8  ;;  %3968 = vpow2.f32 %v3683_v25  ;;  %v6687_v25 = vld [vmem:[#allocation43_spill] sm:$0xff] }
 0x240   :  { %3970 = vrcp.f32 %v1268_v15  ;;  %v6688_v9 = vld [vmem:[#allocation44_spill] sm:$0xff] }
 0x241   :  { %v5140_v10 = vadd.f32 %v1272_v7, %v1271_v44  ;;  %v6689_v44 = vld [vmem:[#allocation45_spill] sm:$0xff] }
 0x243   :  { %3972 = vtanh.f32 %v5140_v10 }
 0x244   :  { %3974 = vtanh.f32 %v1364_v45 }
 0x245   :  { %3976 = vpow2.f32 %v3684_v26 }
 0x24a   :  { %v3967_v22 = vpop.eup %3966 }
 0x24b   :  { %v1369_v0 = vadd.f32 1.0, %v3967_v22  ;;  %v6692_v22 = vld [vmem:[#allocation48_spill] sm:$0xff] }
 0x24c   :  { %v3969_v13 = vpop.eup %3968 }
 0x24d   :  { %3978 = vrcp.f32 %v1369_v0  ;;  %v1375_v12 = vadd.f32 1.0, %v3969_v13  ;;  %v3971_v4 = vpop.eup %3970  ;;  %v6693_v0 = vld [vmem:[#allocation49_spill] sm:$0xff] }
 0x24f   :  { %3980 = vrcp.f32 %v1375_v12  ;;  %v6694_v12 = vld [vmem:[#allocation50_spill] sm:$0xff] }
 0x250   :  { %v3973_v6 = vpop.eup %3972 }
 0x251   :  { %v1275_v16 = vmul.f32 %v3973_v6, %v3971_v4  ;;  %v3975_v8 = vpop.eup %3974  ;;  %v6695_v4 = vld [vmem:[#allocation51_spill] sm:$0xff]  ;;  %v6696_v6 = vld [vmem:[#allocation52_spill] sm:$0xff] }
 0x252   :  { %v3977_v15 = vpop.eup %3976 }
 0x253   :  { %v1391_v20 = vpack.c.bf16 %v1275_v16, %v1275_v16  ;;  %v1382_v45 = vadd.f32 1.0, %v3977_v15  ;;  %v6697_v16 = vld [vmem:[#allocation53_spill] sm:$0xff] }
 0x254   :  { %v6705_v15 = vld [vmem:[#allocation61_spill] sm:$0xff] }
 0x255   :  { %1425 = vmatmul.mubr.bf16.vlgmr.msra.gmra.mxu0 %v1391_v20  ;;  %1466 = vmatmul.mubr.bf16.vlgmr.msra.gmra.mxu1 %v1391_v20  ;;  %3982 = vrcp.f32 %v1382_v45  ;;  %v6698_v20 = vld [vmem:[#allocation54_spill] sm:$0xff]  ;;  %v6711_v45 = vld [vmem:[#allocation67_spill] sm:$0xff] }
 0x256   :  { %1475 = vmatpush1.bf16.msra.mxu0 %v6684_v24  ;;  %1516 = vmatpush1.bf16.msra.mxu1 %v6685_v19  ;;  %v6700_v24 = vld [vmem:[#allocation56_spill] sm:$0xff]  ;;  %v6701_v19 = vld [vmem:[#allocation57_spill] sm:$0xff] }
 0x257   :  { %1476 = vmatprep.subr.bf16.mxu0 %v6686_v21  ;;  %1517 = vmatprep.subr.bf16.mxu1 %v6687_v25  ;;  %v6702_v21 = vld [vmem:[#allocation58_spill] sm:$0xff]  ;;  %v6703_v25 = vld [vmem:[#allocation59_spill] sm:$0xff] }
 0x258   :  { %1506 = vmatprep.mubr.bf16.mxu0 %v6587_v33  ;;  %1547 = vmatprep.mubr.bf16.mxu1 %v6587_v33 }
 0x25a   :  { %v3979_v23 = vpop.eup %3978  ;;  %1477 = vmatpush1.bf16.msra.mxu0 %v6688_v9  ;;  %1518 = vmatpush1.bf16.msra.mxu1 %v6689_v44  ;;  %v6707_v9 = vld [vmem:[#allocation63_spill] sm:$0xff] }
 0x25b   :  { %v1386_v7 = vmul.f32 %v3979_v23, %v3975_v8  ;;  %1478 = vmatprep.subr.bf16.mxu0 %v6690_v50  ;;  %1519 = vmatprep.subr.bf16.mxu1 %v6691_v3  ;;  %v6704_v8 = vld [vmem:[#allocation60_spill] sm:$0xff]  ;;  %v6706_v23 = vld [vmem:[#allocation62_spill] sm:$0xff]  ;;  %v6709_v3 = vld [vmem:[#allocation65_spill] sm:$0xff] }
 0x25c   :  { %v3981_v34 = vpop.eup %3980  ;;  %v6708_v50 = vld [vmem:[#allocation64_spill] sm:$0xff] }
 0x25d   :  { %v1385_v26 = vmul.f32 %v3981_v34, %v5043_v14  ;;  %v6699_v14 = vld [vmem:[#allocation55_spill] sm:$0xff]  ;;  %v6710_v34 = vld [vmem:[#allocation66_spill] sm:$0xff] }
 0x25e   :  { %1479 = vmatpush1.bf16.msra.mxu0 %v6692_v22  ;;  %1520 = vmatpush1.bf16.msra.mxu1 %v6693_v0  ;;  %v6712_v22 = vld [vmem:[#allocation68_spill] sm:$0xff]  ;;  %v6713_v0 = vld [vmem:[#allocation69_spill] sm:$0xff] }
 0x25f   :  { %v5158_v13 = vadd.f32 %v1386_v7, %v1385_v26  ;;  %1480 = vmatprep.subr.bf16.mxu0 %v6694_v12  ;;  %1521 = vmatprep.subr.bf16.mxu1 %v6695_v4  ;;  %v5183_v4 = vld [vmem:[#allocation3 + $0xe4] ss:$16 sps:$4 sm:$0xff]  }
 0x261   :  { %3984 = vtanh.f32 %v5158_v13 }
 0x262   :  { %1481 = vmatpush1.bf16.msra.mxu0 %v6696_v6  ;;  %1522 = vmatpush1.bf16.msra.mxu1 %v6697_v16  ;;  %v3983_v44 = vpop.eup %3982  ;;  %v5186_v6 = vld [vmem:[#allocation3 + $0xec] ss:$16 sps:$4 sm:$0xff]   ;;  %v5191_v16 = vld [vmem:[#allocation3 + $0xe0] ss:$16 sps:$4 sm:$0xff]  }
 0x263   :  { %1482 = vmatprep.subr.bf16.mxu0 %v6698_v20  ;;  %1523 = vmatprep.subr.bf16.mxu1 %v6699_v14  ;;  %v5194_v20 = vld [vmem:[#allocation3 + $0xe8] ss:$16 sps:$4 sm:$0xff]   ;;  %v5197_v14 = vld [vmem:[#allocation3 + $0xc4] ss:$16 sps:$4 sm:$0xff]  }
 0x266   :  { %1483 = vmatpush1.bf16.msra.mxu0 %v6700_v24  ;;  %1524 = vmatpush1.bf16.msra.mxu1 %v6701_v19  ;;  %v5200_v24 = vld [vmem:[#allocation3 + $0xcc] ss:$16 sps:$4 sm:$0xff]   ;;  %v5205_v19 = vld [vmem:[#allocation3 + $0xc0] ss:$16 sps:$4 sm:$0xff]  }
 0x267   :  { %1484 = vmatprep.subr.bf16.mxu0 %v6702_v21  ;;  %1525 = vmatprep.subr.bf16.mxu1 %v6703_v25  ;;  %6714 = vst [vmem:[#allocation16_spill] sm:$0xff] %v5200_v24  ;;  %6715 = vst [vmem:[#allocation18_spill] sm:$0xff] %v5205_v19  ;;  %v5208_v21 = vld [vmem:[#allocation3 + $0xc8] ss:$16 sps:$4 sm:$0xff]   ;;  %v5211_v25 = vld [vmem:[#allocation3 + $0xa4] ss:$16 sps:$4 sm:$0xff]  }
 0x268   :  { %6716 = vst [vmem:[#allocation17_spill] sm:$0xff] %v5208_v21  ;;  %6717 = vst [vmem:[#allocation20_spill] sm:$0xff] %v5211_v25 }
 0x26a   :  { %1485 = vmatpush1.bf16.msra.mxu0 %v6704_v8  ;;  %1526 = vmatpush1.bf16.msra.mxu1 %v6705_v15  ;;  %v5214_v8 = vld [vmem:[#allocation3 + $0xac] ss:$16 sps:$4 sm:$0xff]   ;;  %v5217_v15 = vld [vmem:[#allocation3 + $0xa0] ss:$16 sps:$4 sm:$0xff]  }
 0x26b   :  { %1486 = vmatprep.subr.bf16.mxu0 %v6706_v23  ;;  %1527 = vmatprep.subr.bf16.mxu1 %v6707_v9  ;;  %6718 = vst [vmem:[#allocation19_spill] sm:$0xff] %v5214_v8  ;;  %6719 = vst [vmem:[#allocation22_spill] sm:$0xff] %v5217_v15  ;;  %v5220_v23 = vld [vmem:[#allocation3 + $0xa8] ss:$16 sps:$4 sm:$0xff]   ;;  %v5223_v9 = vld [vmem:[#allocation3 + $0x84] ss:$16 sps:$4 sm:$0xff]  }
 0x26c   :  { %6720 = vst [vmem:[#allocation21_spill] sm:$0xff] %v5220_v23  ;;  %6721 = vst [vmem:[#allocation24_spill] sm:$0xff] %v5223_v9 }
 0x26e   :  { %v3985_v7 = vpop.eup %3984  ;;  %1487 = vmatpush1.bf16.msra.mxu0 %v6708_v50  ;;  %1528 = vmatpush1.bf16.msra.mxu1 %v6709_v3  ;;  %v5232_v50 = vld [vmem:[#allocation3 + $0x88] ss:$16 sps:$4 sm:$0xff]   ;;  %v5235_v3 = vld [vmem:[#allocation3 + $0x64] ss:$16 sps:$4 sm:$0xff]  }
 0x26f   :  { %1488 = vmatprep.subr.bf16.mxu0 %v6710_v34  ;;  %1529 = vmatprep.subr.bf16.mxu1 %v6711_v45  ;;  %v1389_v26 = vmul.f32 %v3985_v7, %v3983_v44  ;;  %v5226_v44 = vld [vmem:[#allocation3 + $0x8c] ss:$16 sps:$4 sm:$0xff]   ;;  %v5229_v7 = vld [vmem:[#allocation3 + $0x80] ss:$16 sps:$4 sm:$0xff]   ;;  %6724 = vst [vmem:[#allocation25_spill] sm:$0xff] %v5232_v50  ;;  %6725 = vst [vmem:[#allocation28_spill] sm:$0xff] %v5235_v3 }
 0x270   :  { %6722 = vst [vmem:[#allocation23_spill] sm:$0xff] %v5226_v44  ;;  %6723 = vst [vmem:[#allocation26_spill] sm:$0xff] %v5229_v7  ;;  %v5238_v34 = vld [vmem:[#allocation3 + $0x6c] ss:$16 sps:$4 sm:$0xff]   ;;  %v5241_v45 = vld [vmem:[#allocation3 + $0x60] ss:$16 sps:$4 sm:$0xff]  }
 0x271   :  { %v5181_v12 = vpack.c.bf16 %v1389_v26, %v1389_v26  ;;  %6726 = vst [vmem:[#allocation27_spill] sm:$0xff] %v5238_v34  ;;  %6727 = vst [vmem:[#allocation30_spill] sm:$0xff] %v5241_v45  ;;  %v5244_v26 = vld [vmem:[#allocation3 + $0x68] ss:$16 sps:$4 sm:$0xff]  }
 0x272   :  { %1489 = vmatpush1.bf16.msra.mxu0 %v6712_v22  ;;  %1530 = vmatpush1.bf16.msra.mxu1 %v6713_v0  ;;  %6728 = vst [vmem:[#allocation29_spill] sm:$0xff] %v5244_v26  ;;  %v5247_v22 = vld [vmem:[#allocation3 + $0x44] ss:$16 sps:$4 sm:$0xff]   ;;  %v5250_v0 = vld [vmem:[#allocation3 + $0x4c] ss:$16 sps:$4 sm:$0xff]  }
 0x273   :  { %1588 = vmatprep.subr.bf16.mxu0 %v5183_v4  ;;  %1629 = vmatprep.subr.bf16.mxu1 %v5186_v6  ;;  %6729 = vst [vmem:[#allocation32_spill] sm:$0xff] %v5247_v22  ;;  %6730 = vst [vmem:[#allocation31_spill] sm:$0xff] %v5250_v0 }
 0x275   :  { %1507 = vmatmul.mubr.bf16.vlgmr.msra.gmra.mxu0 %v5181_v12  ;;  %1548 = vmatmul.mubr.bf16.vlgmr.msra.gmra.mxu1 %v5181_v12 }
 0x276   :  { %1589 = vmatpush1.bf16.msra.mxu0 %v5191_v16  ;;  %1630 = vmatpush1.bf16.msra.mxu1 %v5194_v20 }
 0x277   :  { %1590 = vmatprep.subr.bf16.mxu0 %v5197_v14  ;;  %1631 = vmatprep.subr.bf16.mxu1 %v5200_v24 }
 0x278   :  { %1620 = vmatprep.mubr.bf16.mxu0 %v6587_v33  ;;  %1661 = vmatprep.mubr.bf16.mxu1 %v6587_v33 }
 0x27a   :  { %1591 = vmatpush1.bf16.msra.mxu0 %v5205_v19  ;;  %1632 = vmatpush1.bf16.msra.mxu1 %v5208_v21 }
 0x27b   :  { %1592 = vmatprep.subr.bf16.mxu0 %v5211_v25  ;;  %1633 = vmatprep.subr.bf16.mxu1 %v5214_v8 }
 0x27e   :  { %1593 = vmatpush1.bf16.msra.mxu0 %v5217_v15  ;;  %1634 = vmatpush1.bf16.msra.mxu1 %v5220_v23 }
 0x27f   :  { %1594 = vmatprep.subr.bf16.mxu0 %v5223_v9  ;;  %1635 = vmatprep.subr.bf16.mxu1 %v5226_v44 }
 0x282   :  { %1595 = vmatpush1.bf16.msra.mxu0 %v5229_v7  ;;  %1636 = vmatpush1.bf16.msra.mxu1 %v5232_v50 }
 0x283   :  { %1596 = vmatprep.subr.bf16.mxu0 %v5235_v3  ;;  %1637 = vmatprep.subr.bf16.mxu1 %v5238_v34  ;;  %v5253_v3 = vld [vmem:[#allocation3 + $0x40] ss:$16 sps:$4 sm:$0xff]   ;;  %v5256_v34 = vld [vmem:[#allocation3 + $0x48] ss:$16 sps:$4 sm:$0xff]  }
 0x284   :  { %6731 = vst [vmem:[#allocation34_spill] sm:$0xff] %v5253_v3  ;;  %6732 = vst [vmem:[#allocation33_spill] sm:$0xff] %v5256_v34 }
 0x286   :  { %1597 = vmatpush1.bf16.msra.mxu0 %v5241_v45  ;;  %1638 = vmatpush1.bf16.msra.mxu1 %v5244_v26  ;;  %v5259_v45 = vld [vmem:[#allocation3 + $0x24] ss:$16 sps:$4 sm:$0xff]   ;;  %v5262_v26 = vld [vmem:[#allocation3 + $0x2c] ss:$16 sps:$4 sm:$0xff]  }
 0x287   :  { %1598 = vmatprep.subr.bf16.mxu0 %v5247_v22  ;;  %1639 = vmatprep.subr.bf16.mxu1 %v5250_v0  ;;  %6733 = vst [vmem:[#allocation36_spill] sm:$0xff] %v5259_v45  ;;  %6734 = vst [vmem:[#allocation35_spill] sm:$0xff] %v5262_v26  ;;  %v5265_v22 = vld [vmem:[#allocation3 + $0x20] ss:$16 sps:$4 sm:$0xff]   ;;  %v5268_v0 = vld [vmem:[#allocation3 + $0x28] ss:$16 sps:$4 sm:$0xff]  }
 0x288   :  { %6735 = vst [vmem:[#allocation37_spill] sm:$0xff] %v5265_v22  ;;  %6736 = vst [vmem:[#allocation38_spill] sm:$0xff] %v5268_v0 }
 0x28a   :  { %1599 = vmatpush1.bf16.msra.mxu0 %v5253_v3  ;;  %1640 = vmatpush1.bf16.msra.mxu1 %v5256_v34  ;;  %v5271_v3 = vld [vmem:[#allocation3 + $0x4] ss:$16 sps:$4 sm:$0xff]   ;;  %v5274_v34 = vld [vmem:[#allocation3 + $0xc] ss:$16 sps:$4 sm:$0xff]  }
 0x28b   :  { %1600 = vmatprep.subr.bf16.mxu0 %v5259_v45  ;;  %1641 = vmatprep.subr.bf16.mxu1 %v5262_v26  ;;  %6737 = vst [vmem:[#allocation39_spill] sm:$0xff] %v5271_v3  ;;  %6738 = vst [vmem:[#allocation70_spill] sm:$0xff] %v5274_v34  ;;  %v5277_v45 = vld [vmem:[#allocation3] ss:$16 sps:$4 sm:$0xff]   ;;  %v5280_v26 = vld [vmem:[#allocation3 + $0x8] ss:$16 sps:$4 sm:$0xff]  }
 0x28c   :  { %6739 = vst [vmem:[#allocation75_spill] sm:$0xff] %v5277_v45  ;;  %6740 = vst [vmem:[#allocation73_spill] sm:$0xff] %v5280_v26 }
 0x28e   :  { %1601 = vmatpush1.bf16.msra.mxu0 %v5265_v22  ;;  %1642 = vmatpush1.bf16.msra.mxu1 %v5268_v0 }
 0x28f   :  { %1602 = vmatprep.subr.bf16.mxu0 %v5271_v3  ;;  %1643 = vmatprep.subr.bf16.mxu1 %v5274_v34 }
 0x292   :  { %1603 = vmatpush1.bf16.msra.mxu0 %v5277_v45  ;;  %1644 = vmatpush1.bf16.msra.mxu1 %v5280_v26 }
 0x293   :  { %1700 = vmatprep.subr.bf16.mxu0 %v4734_v55  ;;  %1741 = vmatprep.subr.bf16.mxu1 %v4740_v57 }
 0x295   :  { %1621 = vmatmul.mubr.bf16.vlgmr.msra.gmra.mxu0 %v5181_v12  ;;  %1662 = vmatmul.mubr.bf16.vlgmr.msra.gmra.mxu1 %v5181_v12 }
 0x296   :  { %1701 = vmatpush1.bf16.msra.mxu0 %v4736_v56  ;;  %1742 = vmatpush1.bf16.msra.mxu1 %v4744_v59 }
 0x297   :  { %1702 = vmatprep.subr.bf16.mxu0 %v4742_v58  ;;  %1743 = vmatprep.subr.bf16.mxu1 %v4752_v61 }
 0x298   :  { %1732 = vmatprep.mubr.bf16.mxu0 %v6587_v33  ;;  %1773 = vmatprep.mubr.bf16.mxu1 %v6587_v33 }
 0x29a   :  { %1703 = vmatpush1.bf16.msra.mxu0 %v4746_v60  ;;  %1744 = vmatpush1.bf16.msra.mxu1 %v4756_v63 }
 0x29b   :  { %1704 = vmatprep.subr.bf16.mxu0 %v4754_v62  ;;  %1745 = vmatprep.subr.bf16.mxu1 %v4764_v2 }
 0x29e   :  { %1705 = vmatpush1.bf16.msra.mxu0 %v6650_v27  ;;  %1746 = vmatpush1.bf16.msra.mxu1 %v6651_v28 }
 0x29f   :  { %1706 = vmatprep.subr.bf16.mxu0 %v6652_v29  ;;  %1747 = vmatprep.subr.bf16.mxu1 %v6653_v30 }
 0x2a2   :  { %1707 = vmatpush1.bf16.msra.mxu0 %v6654_v31  ;;  %1748 = vmatpush1.bf16.msra.mxu1 %v6655_v32 }
 0x2a3   :  { %1708 = vmatprep.subr.bf16.mxu0 %v6656_v35  ;;  %1749 = vmatprep.subr.bf16.mxu1 %v6657_v36 }
 0x2a6   :  { %1709 = vmatpush1.bf16.msra.mxu0 %v6658_v38  ;;  %1750 = vmatpush1.bf16.msra.mxu1 %v6659_v39 }
 0x2a7   :  { %1710 = vmatprep.subr.bf16.mxu0 %v6660_v40  ;;  %1751 = vmatprep.subr.bf16.mxu1 %v6661_v41 }
 0x2aa   :  { %1711 = vmatpush1.bf16.msra.mxu0 %v6662_v42  ;;  %1752 = vmatpush1.bf16.msra.mxu1 %v6663_v43 }
 0x2ab   :  { %1712 = vmatprep.subr.bf16.mxu0 %v6664_v46  ;;  %1753 = vmatprep.subr.bf16.mxu1 %v6665_v47 }
 0x2ae   :  { %1713 = vmatpush1.bf16.msra.mxu0 %v6666_v48  ;;  %1754 = vmatpush1.bf16.msra.mxu1 %v6667_v49 }
 0x2af   :  { %1714 = vmatprep.subr.bf16.mxu0 %v6668_v51  ;;  %1755 = vmatprep.subr.bf16.mxu1 %v6669_v52 }
 0x2b2   :  { %1715 = vmatpush1.bf16.msra.mxu0 %v6670_v53  ;;  %1756 = vmatpush1.bf16.msra.mxu1 %v6671_v54 }
 0x2b3   :  { %1782 = vmatprep.subr.bf16.mxu0 %v6672_v37  ;;  %1823 = vmatprep.subr.bf16.mxu1 %v6673_v5  ;;  %v6741_v5 = vld [vmem:[#allocation76_spill] sm:$0xff] }
 0x315   :  { %v1426_v55 = vpop.f32.mrf.mxu0  ;;  %v1467_v56 = vpop.f32.mrf.mxu1 }
 0x317   :  { %v1428_v57 = vpop.f32.mrf.mxu0  ;;  %v1469_v58 = vpop.f32.mrf.mxu1 }
 0x319   :  { %v1430_v59 = vpop.f32.mrf.mxu0  ;;  %v1471_v60 = vpop.f32.mrf.mxu1 }
 0x31b   :  { %v1431_v61 = vpop.f32.mrf.mxu0  ;;  %v1472_v62 = vpop.f32.mrf.mxu1 }
 0x335   :  { %v1508_v63 = vpop.f32.mrf.mxu0  ;;  %v1549_v2 = vpop.f32.mrf.mxu1 }
 0x336   :  { %v1509_v27 = vadd.f32 %v1508_v63, %v1426_v55  ;;  %v1550_v46 = vadd.f32 %v1549_v2, %v1467_v56  ;;  %v6742_v56 = vld [vmem:[#allocation78_spill] sm:$0xff] }
 0x337   :  { %v1510_v28 = vpop.f32.mrf.mxu0  ;;  %v1551_v29 = vpop.f32.mrf.mxu1 }
 0x338   :  { %v1556_v30 = vadd.f32 %v1509_v27, %v5119_v11  ;;  %v1511_v31 = vadd.f32 %v1510_v28, %v1428_v57  ;;  %v1552_v42 = vadd.f32 %v1551_v29, %v1469_v58  ;;  %v1558_v49 = vadd.f32 %v1550_v46, %v5134_v17 }
 0x339   :  { %v1512_v32 = vpop.f32.mrf.mxu0  ;;  %v1553_v35 = vpop.f32.mrf.mxu1 }
 0x33a   :  { %v3685_v36 = vmul.f32 -1.442695, %v1556_v30  ;;  %v1557_v38 = vadd.f32 %v1511_v31, %v5123_v1  ;;  %v1559_v43 = vadd.f32 %v1552_v42, %v5129_v18 }
 0x33b   :  { %v1513_v39 = vpop.f32.mrf.mxu0  ;;  %v1554_v40 = vpop.f32.mrf.mxu1 }
 0x33c   :  { %3986 = vpow2.f32 %v3685_v36  ;;  %v3686_v41 = vmul.f32 -1.442695, %v1557_v38  ;;  %v3687_v47 = vmul.f32 -1.442695, %v1559_v43  ;;  %v6743_v38 = vld [vmem:[#allocation79_spill] sm:$0xff]  ;;  %v6744_v40 = vld [vmem:[#allocation77_spill] sm:$0xff] }
 0x33e   :  { %3988 = vpow2.f32 %v3686_v41 }
 0x33f   :  { %3990 = vpow2.f32 %v3687_v47 }
 0x349   :  { %v3987_v48 = vpop.eup %3986 }
 0x34a   :  { %v1563_v51 = vadd.f32 1.0, %v3987_v48 }
 0x34b   :  { %v3989_v52 = vpop.eup %3988 }
 0x34c   :  { %3992 = vrcp.f32 %v1563_v51  ;;  %v1569_v53 = vadd.f32 1.0, %v3989_v52  ;;  %v3991_v58 = vpop.eup %3990 }
 0x34d   :  { %3994 = vtanh.f32 %v1558_v49  ;;  %v1576_v29 = vadd.f32 1.0, %v3991_v58  ;;  %v5347_v58 = vld [vmem:[#allocation6 + $0xc0] ss:$16 sps:$4 sm:$0xff]  }
 0x34e   :  { %3996 = vrcp.f32 %v1569_v53  ;;  %v5333_v53 = vld [vmem:[#allocation6 + $0xe0] ss:$16 sps:$4 sm:$0xff]  }
 0x355   :  { %v1622_v54 = vpop.f32.mrf.mxu0  ;;  %v1663_v37 = vpop.f32.mrf.mxu1 }
 0x356   :  { %v1670_v12 = vadd.f32 %v1622_v54, %v6741_v5  ;;  %v1672_v41 = vadd.f32 %v1663_v37, %v6744_v40  ;;  %v5336_v54 = vld [vmem:[#allocation6 + $0xe8] ss:$16 sps:$4 sm:$0xff]   ;;  %v5339_v37 = vld [vmem:[#allocation6 + $0xc4] ss:$16 sps:$4 sm:$0xff]   ;;  %v5342_v5 = vld [vmem:[#allocation6 + $0xcc] ss:$16 sps:$4 sm:$0xff]  }
 0x357   :  { %v1624_v55 = vpop.f32.mrf.mxu0  ;;  %v1665_v57 = vpop.f32.mrf.mxu1  ;;  %v5390_v40 = vld [vmem:[#allocation6 + $0x68] ss:$16 sps:$4 sm:$0xff]  }
 0x358   :  { %v3688_v59 = vmul.f32 -1.442695, %v1670_v12  ;;  %v1671_v60 = vadd.f32 %v1624_v55, %v6742_v56  ;;  %v1673_v39 = vadd.f32 %v1665_v57, %v6743_v38  ;;  %v5384_v38 = vld [vmem:[#allocation6 + $0x6c] ss:$16 sps:$4 sm:$0xff]  }
 0x359   :  { %v3993_v61 = vpop.eup %3992  ;;  %v1626_v62 = vpop.f32.mrf.mxu0 }
 0x35a   :  { %v1667_v63 = vpop.f32.mrf.mxu1  ;;  %v3995_v2 = vpop.eup %3994  ;;  %3998 = vpow2.f32 %v3688_v59  ;;  %v3689_v27 = vmul.f32 -1.442695, %v1671_v60  ;;  %v3690_v42 = vmul.f32 -1.442695, %v1673_v39  ;;  %v5350_v59 = vld [vmem:[#allocation6 + $0xc8] ss:$16 sps:$4 sm:$0xff]  }
 0x35b   :  { %v3997_v28 = vpop.eup %3996  ;;  %v1627_v30 = vpop.f32.mrf.mxu0  ;;  %v1580_v32 = vmul.f32 %v3995_v2, %v3993_v61  ;;  %v5353_v60 = vld [vmem:[#allocation6 + $0xa4] ss:$16 sps:$4 sm:$0xff]   ;;  %v5356_v61 = vld [vmem:[#allocation6 + $0xac] ss:$16 sps:$4 sm:$0xff]   ;;  %v5387_v39 = vld [vmem:[#allocation6 + $0x60] ss:$16 sps:$4 sm:$0xff]  }
 0x35c   :  { %v1668_v31 = vpop.f32.mrf.mxu1  ;;  %v1579_v35 = vmul.f32 %v3997_v28, %v5140_v10  ;;  %4000 = vpow2.f32 %v3689_v27  ;;  %v5360_v27 = vld [vmem:[#allocation6 + $0xa0] ss:$16 sps:$4 sm:$0xff]   ;;  %v5363_v28 = vld [vmem:[#allocation6 + $0xa8] ss:$16 sps:$4 sm:$0xff]   ;;  %v5368_v30 = vld [vmem:[#allocation6 + $0x84] ss:$16 sps:$4 sm:$0xff]  }
 0x35d   :  { %4002 = vrcp.f32 %v1576_v29  ;;  %v5371_v31 = vld [vmem:[#allocation6 + $0x8c] ss:$16 sps:$4 sm:$0xff]  }
 0x35e   :  { %v5328_v36 = vadd.f32 %v1580_v32, %v1579_v35  ;;  %v5378_v32 = vld [vmem:[#allocation6 + $0x88] ss:$16 sps:$4 sm:$0xff]   ;;  %v5381_v35 = vld [vmem:[#allocation6 + $0x64] ss:$16 sps:$4 sm:$0xff]  }
 0x360   :  { %4004 = vtanh.f32 %v5328_v36 }
 0x361   :  { %4006 = vtanh.f32 %v1672_v41  ;;  %v5393_v41 = vld [vmem:[#allocation6 + $0x44] ss:$16 sps:$4 sm:$0xff]  }
 0x362   :  { %4008 = vpow2.f32 %v3690_v42  ;;  %v5396_v42 = vld [vmem:[#allocation6 + $0x4c] ss:$16 sps:$4 sm:$0xff]  }
 0x367   :  { %v3999_v43 = vpop.eup %3998 }
 0x368   :  { %v1677_v46 = vadd.f32 1.0, %v3999_v43  ;;  %v5399_v43 = vld [vmem:[#allocation6 + $0x40] ss:$16 sps:$4 sm:$0xff]  }
 0x369   :  { %v4001_v47 = vpop.eup %4000 }
 0x36a   :  { %4010 = vrcp.f32 %v1677_v46  ;;  %v1683_v48 = vadd.f32 1.0, %v4001_v47  ;;  %v4003_v49 = vpop.eup %4002  ;;  %v5402_v46 = vld [vmem:[#allocation6 + $0x48] ss:$16 sps:$4 sm:$0xff]   ;;  %v5405_v47 = vld [vmem:[#allocation6 + $0x24] ss:$16 sps:$4 sm:$0xff]  }
 0x36c   :  { %4012 = vrcp.f32 %v1683_v48  ;;  %v5408_v48 = vld [vmem:[#allocation6 + $0x2c] ss:$16 sps:$4 sm:$0xff]  }
 0x36d   :  { %v4005_v10 = vpop.eup %4004 }
 0x36e   :  { %v1583_v51 = vmul.f32 %v4005_v10, %v4003_v49  ;;  %v4007_v12 = vpop.eup %4006 }
 0x36f   :  { %v4009_v55 = vpop.eup %4008 }
 0x370   :  { %v1699_v52 = vpack.c.bf16 %v1583_v51, %v1583_v51  ;;  %v1690_v63 = vadd.f32 1.0, %v4009_v55  ;;  %v5411_v51 = vld [vmem:[#allocation6 + $0x20] ss:$16 sps:$4 sm:$0xff]   ;;  %v5420_v55 = vld [vmem:[#allocation6 + $0xc] ss:$16 sps:$4 sm:$0xff]  }
 0x372   :  { %1733 = vmatmul.mubr.bf16.vlgmr.msra.gmra.mxu0 %v1699_v52  ;;  %1774 = vmatmul.mubr.bf16.vlgmr.msra.gmra.mxu1 %v1699_v52  ;;  %4014 = vrcp.f32 %v1690_v63  ;;  %v5414_v52 = vld [vmem:[#allocation6 + $0x28] ss:$16 sps:$4 sm:$0xff]  }
 0x373   :  { %1783 = vmatpush1.bf16.msra.mxu0 %v5333_v53  ;;  %1824 = vmatpush1.bf16.msra.mxu1 %v5336_v54  ;;  %v5426_v63 = vld [vmem:[#allocation6 + $0x8] ss:$16 sps:$4 sm:$0xff]  }
 0x374   :  { %1784 = vmatprep.subr.bf16.mxu0 %v5339_v37  ;;  %1825 = vmatprep.subr.bf16.mxu1 %v5342_v5 }
 0x375   :  { %1814 = vmatprep.mubr.bf16.mxu0 %v6587_v33  ;;  %1855 = vmatprep.mubr.bf16.mxu1 %v6587_v33 }
 0x377   :  { %v4011_v57 = vpop.eup %4010  ;;  %1785 = vmatpush1.bf16.msra.mxu0 %v5347_v58  ;;  %1826 = vmatpush1.bf16.msra.mxu1 %v5350_v59 }
 0x378   :  { %v1694_v56 = vmul.f32 %v4011_v57, %v4007_v12  ;;  %1786 = vmatprep.subr.bf16.mxu0 %v5353_v60  ;;  %1827 = vmatprep.subr.bf16.mxu1 %v5356_v61  ;;  %v5417_v12 = vld [vmem:[#allocation6 + $0x4] ss:$16 sps:$4 sm:$0xff]  }
 0x379   :  { %v4013_v62 = vpop.eup %4012 }
 0x37a   :  { %v1693_v2 = vmul.f32 %v4013_v62, %v5158_v13  ;;  %v5375_v13 = vld [vmem:[#allocation6 + $0x80] ss:$16 sps:$4 sm:$0xff]  }
 0x37b   :  { %1787 = vmatpush1.bf16.msra.mxu0 %v5360_v27  ;;  %1828 = vmatpush1.bf16.msra.mxu1 %v5363_v28  ;;  %v5423_v62 = vld [vmem:[#allocation6] ss:$16 sps:$4 sm:$0xff]  }
 0x37c   :  { %v5366_v29 = vadd.f32 %v1694_v56, %v1693_v2  ;;  %1788 = vmatprep.subr.bf16.mxu0 %v5368_v30  ;;  %1829 = vmatprep.subr.bf16.mxu1 %v5371_v31  ;;  %v6745_v2 = vld [vmem:[#allocation28_spill] sm:$0xff] }
 0x37e   :  { %4016 = vtanh.f32 %v5366_v29 }
 0x37f   :  { %1789 = vmatpush1.bf16.msra.mxu0 %v5375_v13  ;;  %1830 = vmatpush1.bf16.msra.mxu1 %v5378_v32  ;;  %v4015_v49 = vpop.eup %4014 }
 0x380   :  { %1790 = vmatprep.subr.bf16.mxu0 %v5381_v35  ;;  %1831 = vmatprep.subr.bf16.mxu1 %v5384_v38 }
 0x383   :  { %1791 = vmatpush1.bf16.msra.mxu0 %v5387_v39  ;;  %1832 = vmatpush1.bf16.msra.mxu1 %v5390_v40 }
 0x384   :  { %1792 = vmatprep.subr.bf16.mxu0 %v5393_v41  ;;  %1833 = vmatprep.subr.bf16.mxu1 %v5396_v42 }
 0x387   :  { %1793 = vmatpush1.bf16.msra.mxu0 %v5399_v43  ;;  %1834 = vmatpush1.bf16.msra.mxu1 %v5402_v46 }
 0x388   :  { %1794 = vmatprep.subr.bf16.mxu0 %v5405_v47  ;;  %1835 = vmatprep.subr.bf16.mxu1 %v5408_v48 }
 0x38b   :  { %v4017_v10 = vpop.eup %4016  ;;  %1795 = vmatpush1.bf16.msra.mxu0 %v5411_v51  ;;  %1836 = vmatpush1.bf16.msra.mxu1 %v5414_v52 }
 0x38c   :  { %1796 = vmatprep.subr.bf16.mxu0 %v5417_v12  ;;  %1837 = vmatprep.subr.bf16.mxu1 %v5420_v55  ;;  %v1697_v57 = vmul.f32 %v4017_v10, %v4015_v49  ;;  %v6746_v49 = vld [vmem:[#allocation27_spill] sm:$0xff]  ;;  %v6747_v10 = vld [vmem:[#allocation30_spill] sm:$0xff] }
 0x38e   :  { %v1698_v56 = vpack.c.bf16 %v1697_v57, %v1697_v57  ;;  %v6748_v57 = vld [vmem:[#allocation29_spill] sm:$0xff] }
 0x38f   :  { %1797 = vmatpush1.bf16.msra.mxu0 %v5423_v62  ;;  %1838 = vmatpush1.bf16.msra.mxu1 %v5426_v63 }
 0x390   :  { %1896 = vmatprep.subr.bf16.mxu0 %v5183_v4  ;;  %1937 = vmatprep.subr.bf16.mxu1 %v5186_v6 }
 0x392   :  { %1815 = vmatmul.mubr.bf16.vlgmr.msra.gmra.mxu0 %v1698_v56  ;;  %1856 = vmatmul.mubr.bf16.vlgmr.msra.gmra.mxu1 %v1698_v56 }
 0x393   :  { %1897 = vmatpush1.bf16.msra.mxu0 %v5191_v16  ;;  %1938 = vmatpush1.bf16.msra.mxu1 %v5194_v20 }
 0x394   :  { %1898 = vmatprep.subr.bf16.mxu0 %v5197_v14  ;;  %1939 = vmatprep.subr.bf16.mxu1 %v5200_v24 }
 0x395   :  { %1928 = vmatprep.mubr.bf16.mxu0 %v6587_v33  ;;  %1969 = vmatprep.mubr.bf16.mxu1 %v6587_v33 }
 0x397   :  { %1899 = vmatpush1.bf16.msra.mxu0 %v5205_v19  ;;  %1940 = vmatpush1.bf16.msra.mxu1 %v5208_v21 }
 0x398   :  { %1900 = vmatprep.subr.bf16.mxu0 %v5211_v25  ;;  %1941 = vmatprep.subr.bf16.mxu1 %v5214_v8  ;;  %v6749_v8 = vld [vmem:[#allocation32_spill] sm:$0xff] }
 0x39b   :  { %1901 = vmatpush1.bf16.msra.mxu0 %v5217_v15  ;;  %1942 = vmatpush1.bf16.msra.mxu1 %v5220_v23  ;;  %v6750_v15 = vld [vmem:[#allocation31_spill] sm:$0xff]  ;;  %v6751_v23 = vld [vmem:[#allocation34_spill] sm:$0xff] }
 0x39c   :  { %1902 = vmatprep.subr.bf16.mxu0 %v5223_v9  ;;  %1943 = vmatprep.subr.bf16.mxu1 %v5226_v44  ;;  %v6752_v9 = vld [vmem:[#allocation33_spill] sm:$0xff]  ;;  %v6753_v44 = vld [vmem:[#allocation36_spill] sm:$0xff] }
 0x39f   :  { %1903 = vmatpush1.bf16.msra.mxu0 %v5229_v7  ;;  %1944 = vmatpush1.bf16.msra.mxu1 %v5232_v50  ;;  %v6754_v7 = vld [vmem:[#allocation35_spill] sm:$0xff] }
 0x3a0   :  { %1904 = vmatprep.subr.bf16.mxu0 %v6745_v2  ;;  %1945 = vmatprep.subr.bf16.mxu1 %v6746_v49 }
 0x3a3   :  { %1905 = vmatpush1.bf16.msra.mxu0 %v6747_v10  ;;  %1946 = vmatpush1.bf16.msra.mxu1 %v6748_v57 }
 0x3a4   :  { %1906 = vmatprep.subr.bf16.mxu0 %v6749_v8  ;;  %1947 = vmatprep.subr.bf16.mxu1 %v6750_v15  ;;  %v5463_v15 = vld [vmem:[#allocation8 + $0xe4] ss:$16 sps:$4 sm:$0xff]  }
 0x3a5   :  { %6755 = vst [vmem:[#allocation71_spill] sm:$0xff] %v5463_v15 }
 0x3a7   :  { %1907 = vmatpush1.bf16.msra.mxu0 %v6751_v23  ;;  %1948 = vmatpush1.bf16.msra.mxu1 %v6752_v9  ;;  %v5466_v9 = vld [vmem:[#allocation8 + $0xec] ss:$16 sps:$4 sm:$0xff]  }
 0x3a8   :  { %1908 = vmatprep.subr.bf16.mxu0 %v6753_v44  ;;  %1949 = vmatprep.subr.bf16.mxu1 %v6754_v7  ;;  %6756 = vst [vmem:[#allocation74_spill] sm:$0xff] %v5466_v9 }
 0x3ab   :  { %1909 = vmatpush1.bf16.msra.mxu0 %v5265_v22  ;;  %1950 = vmatpush1.bf16.msra.mxu1 %v5268_v0  ;;  %v5469_v22 = vld [vmem:[#allocation8 + $0xe0] ss:$16 sps:$4 sm:$0xff]  }
 0x3ac   :  { %1910 = vmatprep.subr.bf16.mxu0 %v5271_v3  ;;  %1951 = vmatprep.subr.bf16.mxu1 %v5274_v34  ;;  %6757 = vst [vmem:[#allocation72_spill] sm:$0xff] %v5469_v22  ;;  %v5472_v3 = vld [vmem:[#allocation8 + $0xe8] ss:$16 sps:$4 sm:$0xff]  }
 0x3ad   :  { %6758 = vst [vmem:[#allocation40_spill] sm:$0xff] %v5472_v3 }
 0x3af   :  { %1911 = vmatpush1.bf16.msra.mxu0 %v5277_v45  ;;  %1952 = vmatpush1.bf16.msra.mxu1 %v5280_v26  ;;  %v5475_v45 = vld [vmem:[#allocation8 + $0xc4] ss:$16 sps:$4 sm:$0xff]   ;;  %v5478_v26 = vld [vmem:[#allocation8 + $0xcc] ss:$16 sps:$4 sm:$0xff]  }
 0x3b0   :  { %2008 = vmatprep.subr.bf16.mxu0 %v5463_v15  ;;  %2049 = vmatprep.subr.bf16.mxu1 %v5466_v9  ;;  %6759 = vst [vmem:[#allocation41_spill] sm:$0xff] %v5475_v45  ;;  %6760 = vst [vmem:[#allocation42_spill] sm:$0xff] %v5478_v26  ;;  %v5498_v9 = vld [vmem:[#allocation8 + $0xa8] ss:$16 sps:$4 sm:$0xff]  }
 0x3b1   :  { %6766 = vst [vmem:[#allocation48_spill] sm:$0xff] %v5498_v9 }
 0x3b2   :  { %1929 = vmatmul.mubr.bf16.vlgmr.msra.gmra.mxu0 %v1698_v56  ;;  %1970 = vmatmul.mubr.bf16.vlgmr.msra.gmra.mxu1 %v1698_v56  ;;  %v5483_v56 = vld [vmem:[#allocation8 + $0xc0] ss:$16 sps:$4 sm:$0xff]  }
 0x3b3   :  { %2009 = vmatpush1.bf16.msra.mxu0 %v5469_v22  ;;  %2050 = vmatpush1.bf16.msra.mxu1 %v5472_v3  ;;  %6761 = vst [vmem:[#allocation43_spill] sm:$0xff] %v5483_v56  ;;  %v5486_v22 = vld [vmem:[#allocation8 + $0xc8] ss:$16 sps:$4 sm:$0xff]   ;;  %v5489_v3 = vld [vmem:[#allocation8 + $0xa4] ss:$16 sps:$4 sm:$0xff]  }
 0x3b4   :  { %2010 = vmatprep.subr.bf16.mxu0 %v5475_v45  ;;  %2051 = vmatprep.subr.bf16.mxu1 %v5478_v26  ;;  %6762 = vst [vmem:[#allocation44_spill] sm:$0xff] %v5486_v22  ;;  %6763 = vst [vmem:[#allocation45_spill] sm:$0xff] %v5489_v3  ;;  %v5492_v45 = vld [vmem:[#allocation8 + $0xac] ss:$16 sps:$4 sm:$0xff]   ;;  %v5495_v26 = vld [vmem:[#allocation8 + $0xa0] ss:$16 sps:$4 sm:$0xff]  }
 0x3b5   :  { %2040 = vmatprep.mubr.bf16.mxu0 %v6587_v33  ;;  %2081 = vmatprep.mubr.bf16.mxu1 %v6587_v33  ;;  %6764 = vst [vmem:[#allocation46_spill] sm:$0xff] %v5492_v45  ;;  %6765 = vst [vmem:[#allocation47_spill] sm:$0xff] %v5495_v26 }
 0x3b7   :  { %2011 = vmatpush1.bf16.msra.mxu0 %v5483_v56  ;;  %2052 = vmatpush1.bf16.msra.mxu1 %v5486_v22  ;;  %v5501_v56 = vld [vmem:[#allocation8 + $0x84] ss:$16 sps:$4 sm:$0xff]   ;;  %v5504_v22 = vld [vmem:[#allocation8 + $0x8c] ss:$16 sps:$4 sm:$0xff]  }
 0x3b8   :  { %2012 = vmatprep.subr.bf16.mxu0 %v5489_v3  ;;  %2053 = vmatprep.subr.bf16.mxu1 %v5492_v45  ;;  %6767 = vst [vmem:[#allocation49_spill] sm:$0xff] %v5501_v56  ;;  %6768 = vst [vmem:[#allocation50_spill] sm:$0xff] %v5504_v22  ;;  %v5507_v3 = vld [vmem:[#allocation8 + $0x80] ss:$16 sps:$4 sm:$0xff]   ;;  %v5510_v45 = vld [vmem:[#allocation8 + $0x88] ss:$16 sps:$4 sm:$0xff]  }
 0x3b9   :  { %6769 = vst [vmem:[#allocation51_spill] sm:$0xff] %v5507_v3  ;;  %6770 = vst [vmem:[#allocation52_spill] sm:$0xff] %v5510_v45 }
 0x3bb   :  { %2013 = vmatpush1.bf16.msra.mxu0 %v5495_v26  ;;  %2054 = vmatpush1.bf16.msra.mxu1 %v5498_v9  ;;  %v5513_v26 = vld [vmem:[#allocation8 + $0x64] ss:$16 sps:$4 sm:$0xff]   ;;  %v5516_v9 = vld [vmem:[#allocation8 + $0x6c] ss:$16 sps:$4 sm:$0xff]  }
 0x3bc   :  { %2014 = vmatprep.subr.bf16.mxu0 %v5501_v56  ;;  %2055 = vmatprep.subr.bf16.mxu1 %v5504_v22  ;;  %6771 = vst [vmem:[#allocation53_spill] sm:$0xff] %v5513_v26  ;;  %6772 = vst [vmem:[#allocation54_spill] sm:$0xff] %v5516_v9  ;;  %v5519_v56 = vld [vmem:[#allocation8 + $0x60] ss:$16 sps:$4 sm:$0xff]   ;;  %v5522_v22 = vld [vmem:[#allocation8 + $0x68] ss:$16 sps:$4 sm:$0xff]  }
 0x3bd   :  { %6773 = vst [vmem:[#allocation55_spill] sm:$0xff] %v5519_v56  ;;  %6774 = vst [vmem:[#allocation56_spill] sm:$0xff] %v5522_v22 }
 0x3bf   :  { %2015 = vmatpush1.bf16.msra.mxu0 %v5507_v3  ;;  %2056 = vmatpush1.bf16.msra.mxu1 %v5510_v45  ;;  %v5525_v3 = vld [vmem:[#allocation8 + $0x44] ss:$16 sps:$4 sm:$0xff]   ;;  %v5528_v45 = vld [vmem:[#allocation8 + $0x4c] ss:$16 sps:$4 sm:$0xff]  }
 0x3c0   :  { %2016 = vmatprep.subr.bf16.mxu0 %v5513_v26  ;;  %2057 = vmatprep.subr.bf16.mxu1 %v5516_v9  ;;  %6775 = vst [vmem:[#allocation57_spill] sm:$0xff] %v5525_v3  ;;  %6776 = vst [vmem:[#allocation58_spill] sm:$0xff] %v5528_v45  ;;  %v5531_v26 = vld [vmem:[#allocation8 + $0x40] ss:$16 sps:$4 sm:$0xff]   ;;  %v5534_v9 = vld [vmem:[#allocation8 + $0x48] ss:$16 sps:$4 sm:$0xff]  }
 0x3c1   :  { %6777 = vst [vmem:[#allocation59_spill] sm:$0xff] %v5531_v26  ;;  %6778 = vst [vmem:[#allocation60_spill] sm:$0xff] %v5534_v9 }
 0x3c3   :  { %2017 = vmatpush1.bf16.msra.mxu0 %v5519_v56  ;;  %2058 = vmatpush1.bf16.msra.mxu1 %v5522_v22  ;;  %v5537_v56 = vld [vmem:[#allocation8 + $0x24] ss:$16 sps:$4 sm:$0xff]   ;;  %v5540_v22 = vld [vmem:[#allocation8 + $0x2c] ss:$16 sps:$4 sm:$0xff]  }
 0x3c4   :  { %2018 = vmatprep.subr.bf16.mxu0 %v5525_v3  ;;  %2059 = vmatprep.subr.bf16.mxu1 %v5528_v45  ;;  %6779 = vst [vmem:[#allocation61_spill] sm:$0xff] %v5537_v56  ;;  %6780 = vst [vmem:[#allocation62_spill] sm:$0xff] %v5540_v22  ;;  %v5543_v3 = vld [vmem:[#allocation8 + $0x20] ss:$16 sps:$4 sm:$0xff]   ;;  %v5546_v45 = vld [vmem:[#allocation8 + $0x28] ss:$16 sps:$4 sm:$0xff]  }
 0x3c5   :  { %6781 = vst [vmem:[#allocation63_spill] sm:$0xff] %v5543_v3  ;;  %6782 = vst [vmem:[#allocation64_spill] sm:$0xff] %v5546_v45 }
 0x3c7   :  { %2019 = vmatpush1.bf16.msra.mxu0 %v5531_v26  ;;  %2060 = vmatpush1.bf16.msra.mxu1 %v5534_v9  ;;  %v5549_v26 = vld [vmem:[#allocation8 + $0x4] ss:$16 sps:$4 sm:$0xff]   ;;  %v5552_v9 = vld [vmem:[#allocation8 + $0xc] ss:$16 sps:$4 sm:$0xff]  }
 0x3c8   :  { %2020 = vmatprep.subr.bf16.mxu0 %v5537_v56  ;;  %2061 = vmatprep.subr.bf16.mxu1 %v5540_v22  ;;  %6783 = vst [vmem:[#allocation65_spill] sm:$0xff] %v5549_v26  ;;  %6784 = vst [vmem:[#allocation66_spill] sm:$0xff] %v5552_v9  ;;  %v5555_v56 = vld [vmem:[#allocation8] ss:$16 sps:$4 sm:$0xff]   ;;  %v5558_v22 = vld [vmem:[#allocation8 + $0x8] ss:$16 sps:$4 sm:$0xff]  }
 0x3c9   :  { %6785 = vst [vmem:[#allocation67_spill] sm:$0xff] %v5555_v56  ;;  %6786 = vst [vmem:[#allocation68_spill] sm:$0xff] %v5558_v22 }
 0x3cb   :  { %2021 = vmatpush1.bf16.msra.mxu0 %v5543_v3  ;;  %2062 = vmatpush1.bf16.msra.mxu1 %v5546_v45  ;;  %v5561_v3 = vld [vmem:[#allocation6 + $0xe4] ss:$16 sps:$4 sm:$0xff]   ;;  %v5564_v45 = vld [vmem:[#allocation6 + $0xec] ss:$16 sps:$4 sm:$0xff]  }
 0x3cc   :  { %2022 = vmatprep.subr.bf16.mxu0 %v5549_v26  ;;  %2063 = vmatprep.subr.bf16.mxu1 %v5552_v9  ;;  %6787 = vst [vmem:[#allocation69_spill] sm:$0xff] %v5561_v3  ;;  %6788 = vst [vmem:[#allocation76_spill] sm:$0xff] %v5564_v45 }
 0x3cf   :  { %2023 = vmatpush1.bf16.msra.mxu0 %v5555_v56  ;;  %2064 = vmatpush1.bf16.msra.mxu1 %v5558_v22 }
 0x3d0   :  { %2090 = vmatprep.subr.bf16.mxu0 %v5561_v3  ;;  %2131 = vmatprep.subr.bf16.mxu1 %v5564_v45 }
 0x432   :  { %v1734_v26 = vpop.f32.mrf.mxu0  ;;  %v1775_v15 = vpop.f32.mrf.mxu1 }
 0x434   :  { %v1736_v34 = vpop.f32.mrf.mxu0  ;;  %v1777_v9 = vpop.f32.mrf.mxu1 }
 0x436   :  { %v1738_v0 = vpop.f32.mrf.mxu0  ;;  %v1779_v7 = vpop.f32.mrf.mxu1 }
 0x438   :  { %v1739_v44 = vpop.f32.mrf.mxu0  ;;  %v1780_v56 = vpop.f32.mrf.mxu1 }
 0x452   :  { %v1816_v23 = vpop.f32.mrf.mxu0  ;;  %v1857_v8 = vpop.f32.mrf.mxu1 }
 0x453   :  { %v1817_v57 = vadd.f32 %v1816_v23, %v1734_v26  ;;  %v1858_v56 = vadd.f32 %v1857_v8, %v1775_v15  ;;  %v6790_v8 = vld [vmem:[#allocation82_spill] sm:$0xff] }
 0x454   :  { %v1818_v22 = vpop.f32.mrf.mxu0  ;;  %v1859_v10 = vpop.f32.mrf.mxu1 }
 0x455   :  { %v1864_v49 = vadd.f32 %v1817_v57, %v5119_v11  ;;  %v1819_v3 = vadd.f32 %v1818_v22, %v1736_v34  ;;  %v1860_v44 = vadd.f32 %v1859_v10, %v1777_v9  ;;  %v1866_v24 = vadd.f32 %v1858_v56, %v5134_v17 }
 0x456   :  { %v1820_v2 = vpop.f32.mrf.mxu0  ;;  %v1861_v50 = vpop.f32.mrf.mxu1 }
 0x457   :  { %v3691_v25 = vmul.f32 -1.442695, %v1864_v49  ;;  %v1865_v45 = vadd.f32 %v1819_v3, %v5123_v1  ;;  %v1867_v7 = vadd.f32 %v1860_v44, %v5129_v18 }
 0x458   :  { %v1821_v21 = vpop.f32.mrf.mxu0  ;;  %v1862_v19 = vpop.f32.mrf.mxu1 }
 0x459   :  { %4018 = vpow2.f32 %v3691_v25  ;;  %v3692_v0 = vmul.f32 -1.442695, %v1865_v45  ;;  %v3693_v23 = vmul.f32 -1.442695, %v1867_v7  ;;  %v6789_v25 = vld [vmem:[#allocation80_spill] sm:$0xff] }
 0x45b   :  { %4020 = vpow2.f32 %v3692_v0 }
 0x45c   :  { %4022 = vpow2.f32 %v3693_v23 }
 0x466   :  { %v4019_v26 = vpop.eup %4018 }
 0x467   :  { %v1871_v57 = vadd.f32 1.0, %v4019_v26 }
 0x468   :  { %v4021_v34 = vpop.eup %4020 }
 0x469   :  { %4024 = vrcp.f32 %v1871_v57  ;;  %v1877_v50 = vadd.f32 1.0, %v4021_v34  ;;  %v4023_v22 = vpop.eup %4022 }
 0x46a   :  { %4026 = vtanh.f32 %v1866_v24  ;;  %v1884_v23 = vadd.f32 1.0, %v4023_v22 }
 0x46b   :  { %4028 = vrcp.f32 %v1877_v50 }
 0x472   :  { %v1930_v21 = vpop.f32.mrf.mxu0  ;;  %v1971_v19 = vpop.f32.mrf.mxu1 }
 0x473   :  { %v1978_v3 = vadd.f32 %v1930_v21, %v6789_v25  ;;  %v6791_v21 = vld [vmem:[#allocation83_spill] sm:$0xff] }
 0x474   :  { %v1932_v45 = vpop.f32.mrf.mxu0  ;;  %v1973_v9 = vpop.f32.mrf.mxu1 }
 0x475   :  { %v3694_v2 = vmul.f32 -1.442695, %v1978_v3  ;;  %v1979_v15 = vadd.f32 %v1932_v45, %v6790_v8  ;;  %v1981_v25 = vadd.f32 %v1973_v9, %v6791_v21  ;;  %v6792_v3 = vld [vmem:[#allocation81_spill] sm:$0xff] }
 0x476   :  { %v4025_v49 = vpop.eup %4024  ;;  %v1934_v10 = vpop.f32.mrf.mxu0  ;;  %v1980_v45 = vadd.f32 %v1971_v19, %v6792_v3  ;;  %v6793_v3 = vld [vmem:[#allocation16_spill] sm:$0xff] }
 0x477   :  { %v1975_v0 = vpop.f32.mrf.mxu1  ;;  %v4027_v44 = vpop.eup %4026  ;;  %4030 = vpow2.f32 %v3694_v2  ;;  %v3695_v7 = vmul.f32 -1.442695, %v1979_v15  ;;  %v3696_v8 = vmul.f32 -1.442695, %v1981_v25 }
 0x478   :  { %v4029_v56 = vpop.eup %4028  ;;  %v1935_v24 = vpop.f32.mrf.mxu0  ;;  %v1888_v57 = vmul.f32 %v4027_v44, %v4025_v49 }
 0x479   :  { %v1976_v26 = vpop.f32.mrf.mxu1  ;;  %v1887_v34 = vmul.f32 %v4029_v56, %v5328_v36  ;;  %4032 = vpow2.f32 %v3695_v7 }
 0x47a   :  { %4034 = vrcp.f32 %v1884_v23 }
 0x47b   :  { %v5574_v50 = vadd.f32 %v1888_v57, %v1887_v34 }
 0x47d   :  { %4036 = vtanh.f32 %v5574_v50 }
 0x47e   :  { %4038 = vtanh.f32 %v1980_v45  ;;  %v6794_v45 = vld [vmem:[#allocation18_spill] sm:$0xff] }
 0x47f   :  { %4040 = vpow2.f32 %v3696_v8  ;;  %v6795_v8 = vld [vmem:[#allocation17_spill] sm:$0xff] }
 0x484   :  { %v4031_v2 = vpop.eup %4030 }
 0x485   :  { %v1985_v15 = vadd.f32 1.0, %v4031_v2  ;;  %v6798_v2 = vld [vmem:[#allocation22_spill] sm:$0xff] }
 0x486   :  { %v4033_v22 = vpop.eup %4032 }
 0x487   :  { %4042 = vrcp.f32 %v1985_v15  ;;  %v1991_v49 = vadd.f32 1.0, %v4033_v22  ;;  %v4035_v10 = vpop.eup %4034  ;;  %v6802_v15 = vld [vmem:[#allocation26_spill] sm:$0xff]  ;;  %v6803_v22 = vld [vmem:[#allocation25_spill] sm:$0xff] }
 0x489   :  { %4044 = vrcp.f32 %v1991_v49  ;;  %v6804_v49 = vld [vmem:[#allocation28_spill] sm:$0xff] }
 0x48a   :  { %v4037_v36 = vpop.eup %4036 }
 0x48b   :  { %v1891_v0 = vmul.f32 %v4037_v36, %v4035_v10  ;;  %v4039_v19 = vpop.eup %4038  ;;  %v6805_v10 = vld [vmem:[#allocation27_spill] sm:$0xff]  ;;  %v6806_v36 = vld [vmem:[#allocation30_spill] sm:$0xff] }
 0x48c   :  { %v4041_v9 = vpop.eup %4040 }
 0x48d   :  { %v2007_v44 = vpack.c.bf16 %v1891_v0, %v1891_v0  ;;  %v1998_v24 = vadd.f32 1.0, %v4041_v9  ;;  %v6807_v0 = vld [vmem:[#allocation29_spill] sm:$0xff]  ;;  %v6810_v9 = vld [vmem:[#allocation34_spill] sm:$0xff] }
 0x48f   :  { %2041 = vmatmul.mubr.bf16.vlgmr.msra.gmra.mxu0 %v2007_v44  ;;  %2082 = vmatmul.mubr.bf16.vlgmr.msra.gmra.mxu1 %v2007_v44  ;;  %4046 = vrcp.f32 %v1998_v24  ;;  %v6808_v44 = vld [vmem:[#allocation32_spill] sm:$0xff]  ;;  %v6814_v24 = vld [vmem:[#allocation37_spill] sm:$0xff] }
 0x490   :  { %2091 = vmatpush1.bf16.msra.mxu0 %v5333_v53  ;;  %2132 = vmatpush1.bf16.msra.mxu1 %v5336_v54 }
 0x491   :  { %2092 = vmatprep.subr.bf16.mxu0 %v5339_v37  ;;  %2133 = vmatprep.subr.bf16.mxu1 %v5342_v5 }
 0x492   :  { %2122 = vmatprep.mubr.bf16.mxu0 %v6587_v33  ;;  %2163 = vmatprep.mubr.bf16.mxu1 %v6587_v33 }
 0x494   :  { %v4043_v7 = vpop.eup %4042  ;;  %2093 = vmatpush1.bf16.msra.mxu0 %v5347_v58  ;;  %2134 = vmatpush1.bf16.msra.mxu1 %v5350_v59 }
 0x495   :  { %v2002_v56 = vmul.f32 %v4043_v7, %v4039_v19  ;;  %2094 = vmatprep.subr.bf16.mxu0 %v5353_v60  ;;  %2135 = vmatprep.subr.bf16.mxu1 %v5356_v61  ;;  %v6809_v19 = vld [vmem:[#allocation31_spill] sm:$0xff]  ;;  %v6811_v7 = vld [vmem:[#allocation33_spill] sm:$0xff] }
 0x496   :  { %v4045_v23 = vpop.eup %4044 }
 0x497   :  { %v2001_v26 = vmul.f32 %v4045_v23, %v5366_v29  ;;  %v6813_v23 = vld [vmem:[#allocation35_spill] sm:$0xff] }
 0x498   :  { %2095 = vmatpush1.bf16.msra.mxu0 %v5360_v27  ;;  %2136 = vmatpush1.bf16.msra.mxu1 %v5363_v28 }
 0x499   :  { %v5592_v57 = vadd.f32 %v2002_v56, %v2001_v26  ;;  %2096 = vmatprep.subr.bf16.mxu0 %v5368_v30  ;;  %2137 = vmatprep.subr.bf16.mxu1 %v5371_v31  ;;  %v6812_v56 = vld [vmem:[#allocation36_spill] sm:$0xff]  ;;  %v6815_v26 = vld [vmem:[#allocation38_spill] sm:$0xff] }
 0x49b   :  { %4048 = vtanh.f32 %v5592_v57 }
 0x49c   :  { %2097 = vmatpush1.bf16.msra.mxu0 %v5375_v13  ;;  %2138 = vmatpush1.bf16.msra.mxu1 %v5378_v32  ;;  %v4047_v29 = vpop.eup %4046 }
 0x49d   :  { %2098 = vmatprep.subr.bf16.mxu0 %v5381_v35  ;;  %2139 = vmatprep.subr.bf16.mxu1 %v5384_v38 }
 0x4a0   :  { %2099 = vmatpush1.bf16.msra.mxu0 %v5387_v39  ;;  %2140 = vmatpush1.bf16.msra.mxu1 %v5390_v40 }
 0x4a1   :  { %2100 = vmatprep.subr.bf16.mxu0 %v5393_v41  ;;  %2141 = vmatprep.subr.bf16.mxu1 %v5396_v42 }
 0x4a4   :  { %2101 = vmatpush1.bf16.msra.mxu0 %v5399_v43  ;;  %2142 = vmatpush1.bf16.msra.mxu1 %v5402_v46 }
 0x4a5   :  { %2102 = vmatprep.subr.bf16.mxu0 %v5405_v47  ;;  %2143 = vmatprep.subr.bf16.mxu1 %v5408_v48 }
 0x4a8   :  { %v4049_v34 = vpop.eup %4048  ;;  %2103 = vmatpush1.bf16.msra.mxu0 %v5411_v51  ;;  %2144 = vmatpush1.bf16.msra.mxu1 %v5414_v52 }
 0x4a9   :  { %2104 = vmatprep.subr.bf16.mxu0 %v5417_v12  ;;  %2145 = vmatprep.subr.bf16.mxu1 %v5420_v55  ;;  %v2005_v21 = vmul.f32 %v4049_v34, %v4047_v29  ;;  %v6816_v29 = vld [vmem:[#allocation39_spill] sm:$0xff]  ;;  %v6817_v34 = vld [vmem:[#allocation70_spill] sm:$0xff] }
 0x4ab   :  { %v2006_v25 = vpack.c.bf16 %v2005_v21, %v2005_v21  ;;  %v6818_v21 = vld [vmem:[#allocation75_spill] sm:$0xff] }
 0x4ac   :  { %2105 = vmatpush1.bf16.msra.mxu0 %v5423_v62  ;;  %2146 = vmatpush1.bf16.msra.mxu1 %v5426_v63 }
 0x4ad   :  { %2204 = vmatprep.subr.bf16.mxu0 %v5183_v4  ;;  %2245 = vmatprep.subr.bf16.mxu1 %v5186_v6  ;;  %v6796_v4 = vld [vmem:[#allocation20_spill] sm:$0xff]  ;;  %v6797_v6 = vld [vmem:[#allocation19_spill] sm:$0xff] }
 0x4af   :  { %2123 = vmatmul.mubr.bf16.vlgmr.msra.gmra.mxu0 %v2006_v25  ;;  %2164 = vmatmul.mubr.bf16.vlgmr.msra.gmra.mxu1 %v2006_v25 }
 0x4b0   :  { %2205 = vmatpush1.bf16.msra.mxu0 %v5191_v16  ;;  %2246 = vmatpush1.bf16.msra.mxu1 %v5194_v20  ;;  %v6799_v16 = vld [vmem:[#allocation21_spill] sm:$0xff]  ;;  %v6800_v20 = vld [vmem:[#allocation24_spill] sm:$0xff] }
 0x4b1   :  { %2206 = vmatprep.subr.bf16.mxu0 %v5197_v14  ;;  %2247 = vmatprep.subr.bf16.mxu1 %v6793_v3  ;;  %v6801_v14 = vld [vmem:[#allocation23_spill] sm:$0xff]  ;;  %v6819_v3 = vld [vmem:[#allocation73_spill] sm:$0xff] }
 0x4b2   :  { %2236 = vmatprep.mubr.bf16.mxu0 %v6587_v33  ;;  %2277 = vmatprep.mubr.bf16.mxu1 %v6587_v33 }
 0x4b4   :  { %2207 = vmatpush1.bf16.msra.mxu0 %v6794_v45  ;;  %2248 = vmatpush1.bf16.msra.mxu1 %v6795_v8  ;;  %v6820_v45 = vld [vmem:[#allocation71_spill] sm:$0xff]  ;;  %v6821_v8 = vld [vmem:[#allocation74_spill] sm:$0xff] }
 0x4b5   :  { %2208 = vmatprep.subr.bf16.mxu0 %v6796_v4  ;;  %2249 = vmatprep.subr.bf16.mxu1 %v6797_v6  ;;  %v6822_v4 = vld [vmem:[#allocation72_spill] sm:$0xff] }
 0x4b6   :  { %v6823_v6 = vld [vmem:[#allocation40_spill] sm:$0xff] }
 0x4b8   :  { %2209 = vmatpush1.bf16.msra.mxu0 %v6798_v2  ;;  %2250 = vmatpush1.bf16.msra.mxu1 %v6799_v16  ;;  %v6824_v2 = vld [vmem:[#allocation41_spill] sm:$0xff]  ;;  %v6825_v16 = vld [vmem:[#allocation42_spill] sm:$0xff] }
 0x4b9   :  { %2210 = vmatprep.subr.bf16.mxu0 %v6800_v20  ;;  %2251 = vmatprep.subr.bf16.mxu1 %v6801_v14  ;;  %v6826_v20 = vld [vmem:[#allocation43_spill] sm:$0xff]  ;;  %v6827_v14 = vld [vmem:[#allocation44_spill] sm:$0xff] }
 0x4bc   :  { %2211 = vmatpush1.bf16.msra.mxu0 %v6802_v15  ;;  %2252 = vmatpush1.bf16.msra.mxu1 %v6803_v22  ;;  %v6828_v15 = vld [vmem:[#allocation45_spill] sm:$0xff]  ;;  %v6829_v22 = vld [vmem:[#allocation46_spill] sm:$0xff] }
 0x4bd   :  { %2212 = vmatprep.subr.bf16.mxu0 %v6804_v49  ;;  %2253 = vmatprep.subr.bf16.mxu1 %v6805_v10  ;;  %v6831_v49 = vld [vmem:[#allocation48_spill] sm:$0xff]  ;;  %v6832_v10 = vld [vmem:[#allocation49_spill] sm:$0xff] }
 0x4c0   :  { %2213 = vmatpush1.bf16.msra.mxu0 %v6806_v36  ;;  %2254 = vmatpush1.bf16.msra.mxu1 %v6807_v0  ;;  %v6833_v36 = vld [vmem:[#allocation50_spill] sm:$0xff]  ;;  %v6834_v0 = vld [vmem:[#allocation51_spill] sm:$0xff] }
 0x4c1   :  { %2214 = vmatprep.subr.bf16.mxu0 %v6808_v44  ;;  %2255 = vmatprep.subr.bf16.mxu1 %v6809_v19  ;;  %v6835_v44 = vld [vmem:[#allocation52_spill] sm:$0xff]  ;;  %v6836_v19 = vld [vmem:[#allocation53_spill] sm:$0xff] }
 0x4c4   :  { %2215 = vmatpush1.bf16.msra.mxu0 %v6810_v9  ;;  %2256 = vmatpush1.bf16.msra.mxu1 %v6811_v7  ;;  %v6837_v9 = vld [vmem:[#allocation54_spill] sm:$0xff]  ;;  %v6838_v7 = vld [vmem:[#allocation55_spill] sm:$0xff] }
 0x4c5   :  { %2216 = vmatprep.subr.bf16.mxu0 %v6812_v56  ;;  %2257 = vmatprep.subr.bf16.mxu1 %v6813_v23  ;;  %v6839_v56 = vld [vmem:[#allocation56_spill] sm:$0xff]  ;;  %v6840_v23 = vld [vmem:[#allocation57_spill] sm:$0xff] }
 0x4c8   :  { %2217 = vmatpush1.bf16.msra.mxu0 %v6814_v24  ;;  %2258 = vmatpush1.bf16.msra.mxu1 %v6815_v26  ;;  %v6841_v24 = vld [vmem:[#allocation58_spill] sm:$0xff]  ;;  %v6842_v26 = vld [vmem:[#allocation59_spill] sm:$0xff] }
 0x4c9   :  { %2218 = vmatprep.subr.bf16.mxu0 %v6816_v29  ;;  %2259 = vmatprep.subr.bf16.mxu1 %v6817_v34  ;;  %v6843_v29 = vld [vmem:[#allocation60_spill] sm:$0xff]  ;;  %v6844_v34 = vld [vmem:[#allocation61_spill] sm:$0xff] }
 0x4cc   :  { %2219 = vmatpush1.bf16.msra.mxu0 %v6818_v21  ;;  %2260 = vmatpush1.bf16.msra.mxu1 %v6819_v3  ;;  %v6845_v21 = vld [vmem:[#allocation62_spill] sm:$0xff]  ;;  %v6846_v3 = vld [vmem:[#allocation63_spill] sm:$0xff] }
 0x4cd   :  { %2316 = vmatprep.subr.bf16.mxu0 %v6820_v45  ;;  %2357 = vmatprep.subr.bf16.mxu1 %v6821_v8 }
 0x4cf   :  { %2237 = vmatmul.mubr.bf16.vlgmr.msra.gmra.mxu0 %v2006_v25  ;;  %2278 = vmatmul.mubr.bf16.vlgmr.msra.gmra.mxu1 %v2006_v25  ;;  %v6830_v25 = vld [vmem:[#allocation47_spill] sm:$0xff] }
 0x4d0   :  { %2317 = vmatpush1.bf16.msra.mxu0 %v6822_v4  ;;  %2358 = vmatpush1.bf16.msra.mxu1 %v6823_v6 }
 0x4d1   :  { %2318 = vmatprep.subr.bf16.mxu0 %v6824_v2  ;;  %2359 = vmatprep.subr.bf16.mxu1 %v6825_v16 }
 0x4d2   :  { %2348 = vmatprep.mubr.bf16.mxu0 %v6587_v33  ;;  %2389 = vmatprep.mubr.bf16.mxu1 %v6587_v33 }
 0x4d4   :  { %2319 = vmatpush1.bf16.msra.mxu0 %v6826_v20  ;;  %2360 = vmatpush1.bf16.msra.mxu1 %v6827_v14 }
 0x4d5   :  { %2320 = vmatprep.subr.bf16.mxu0 %v6828_v15  ;;  %2361 = vmatprep.subr.bf16.mxu1 %v6829_v22 }
 0x4d8   :  { %2321 = vmatpush1.bf16.msra.mxu0 %v6830_v25  ;;  %2362 = vmatpush1.bf16.msra.mxu1 %v6831_v49 }
 0x4d9   :  { %2322 = vmatprep.subr.bf16.mxu0 %v6832_v10  ;;  %2363 = vmatprep.subr.bf16.mxu1 %v6833_v36 }
 0x4dc   :  { %2323 = vmatpush1.bf16.msra.mxu0 %v6834_v0  ;;  %2364 = vmatpush1.bf16.msra.mxu1 %v6835_v44 }
 0x4dd   :  { %2324 = vmatprep.subr.bf16.mxu0 %v6836_v19  ;;  %2365 = vmatprep.subr.bf16.mxu1 %v6837_v9  ;;  %v6847_v19 = vld [vmem:[#allocation64_spill] sm:$0xff]  ;;  %v6848_v9 = vld [vmem:[#allocation65_spill] sm:$0xff] }
 0x4e0   :  { %2325 = vmatpush1.bf16.msra.mxu0 %v6838_v7  ;;  %2366 = vmatpush1.bf16.msra.mxu1 %v6839_v56  ;;  %v6849_v7 = vld [vmem:[#allocation66_spill] sm:$0xff]  ;;  %v6850_v56 = vld [vmem:[#allocation67_spill] sm:$0xff] }
 0x4e1   :  { %2326 = vmatprep.subr.bf16.mxu0 %v6840_v23  ;;  %2367 = vmatprep.subr.bf16.mxu1 %v6841_v24  ;;  %v6851_v23 = vld [vmem:[#allocation68_spill] sm:$0xff]  ;;  %v6852_v24 = vld [vmem:[#allocation69_spill] sm:$0xff] }
 0x4e4   :  { %2327 = vmatpush1.bf16.msra.mxu0 %v6842_v26  ;;  %2368 = vmatpush1.bf16.msra.mxu1 %v6843_v29  ;;  %v6853_v26 = vld [vmem:[#allocation76_spill] sm:$0xff] }
 0x4e5   :  { %2328 = vmatprep.subr.bf16.mxu0 %v6844_v34  ;;  %2369 = vmatprep.subr.bf16.mxu1 %v6845_v21 }
 0x4e8   :  { %2329 = vmatpush1.bf16.msra.mxu0 %v6846_v3  ;;  %2370 = vmatpush1.bf16.msra.mxu1 %v6847_v19 }
 0x4e9   :  { %2330 = vmatprep.subr.bf16.mxu0 %v6848_v9  ;;  %2371 = vmatprep.subr.bf16.mxu1 %v6849_v7 }
 0x4ec   :  { %2331 = vmatpush1.bf16.msra.mxu0 %v6850_v56  ;;  %2372 = vmatpush1.bf16.msra.mxu1 %v6851_v23 }
 0x4ed   :  { %2398 = vmatprep.subr.bf16.mxu0 %v6852_v24  ;;  %2439 = vmatprep.subr.bf16.mxu1 %v6853_v26 }
 0x54f   :  { %v2042_v29 = vpop.f32.mrf.mxu0  ;;  %v2083_v34 = vpop.f32.mrf.mxu1 }
 0x551   :  { %v2044_v44 = vpop.f32.mrf.mxu0  ;;  %v2085_v21 = vpop.f32.mrf.mxu1 }
 0x553   :  { %v2046_v0 = vpop.f32.mrf.mxu0  ;;  %v2087_v3 = vpop.f32.mrf.mxu1 }
 0x555   :  { %v2047_v36 = vpop.f32.mrf.mxu0  ;;  %v2088_v19 = vpop.f32.mrf.mxu1 }
 0x56f   :  { %v2124_v10 = vpop.f32.mrf.mxu0  ;;  %v2165_v9 = vpop.f32.mrf.mxu1 }
 0x570   :  { %v2125_v49 = vadd.f32 %v2124_v10, %v2042_v29  ;;  %v2166_v3 = vadd.f32 %v2165_v9, %v2083_v34  ;;  %v6855_v9 = vld [vmem:[#allocation86_spill] sm:$0xff] }
 0x571   :  { %v2126_v7 = vpop.f32.mrf.mxu0  ;;  %v2167_v25 = vpop.f32.mrf.mxu1 }
 0x572   :  { %v2172_v56 = vadd.f32 %v2125_v49, %v5119_v11  ;;  %v2127_v23 = vadd.f32 %v2126_v7, %v2044_v44  ;;  %v2168_v36 = vadd.f32 %v2167_v25, %v2085_v21  ;;  %v2174_v16 = vadd.f32 %v2166_v3, %v5134_v17 }
 0x573   :  { %v2128_v22 = vpop.f32.mrf.mxu0  ;;  %v2169_v24 = vpop.f32.mrf.mxu1 }
 0x574   :  { %v3697_v15 = vmul.f32 -1.442695, %v2172_v56  ;;  %v2173_v26 = vadd.f32 %v2127_v23, %v5123_v1  ;;  %v2175_v19 = vadd.f32 %v2168_v36, %v5129_v18 }
 0x575   :  { %v2129_v14 = vpop.f32.mrf.mxu0  ;;  %v2170_v20 = vpop.f32.mrf.mxu1 }
 0x576   :  { %4050 = vpow2.f32 %v3697_v15  ;;  %v3698_v0 = vmul.f32 -1.442695, %v2173_v26  ;;  %v3699_v10 = vmul.f32 -1.442695, %v2175_v19  ;;  %v6854_v15 = vld [vmem:[#allocation84_spill] sm:$0xff] }
 0x578   :  { %4052 = vpow2.f32 %v3698_v0 }
 0x579   :  { %4054 = vpow2.f32 %v3699_v10 }
 0x583   :  { %v4051_v29 = vpop.eup %4050 }
 0x584   :  { %v2179_v49 = vadd.f32 1.0, %v4051_v29 }
 0x585   :  { %v4053_v44 = vpop.eup %4052 }
 0x586   :  { %4056 = vrcp.f32 %v2179_v49  ;;  %v2185_v22 = vadd.f32 1.0, %v4053_v44  ;;  %v4055_v23 = vpop.eup %4054 }
 0x587   :  { %4058 = vtanh.f32 %v2174_v16  ;;  %v2192_v10 = vadd.f32 1.0, %v4055_v23 }
 0x588   :  { %4060 = vrcp.f32 %v2185_v22 }
 0x58f   :  { %v2238_v14 = vpop.f32.mrf.mxu0  ;;  %v2279_v20 = vpop.f32.mrf.mxu1 }
 0x590   :  { %v2286_v7 = vadd.f32 %v2238_v14, %v6854_v15  ;;  %v6856_v14 = vld [vmem:[#allocation87_spill] sm:$0xff] }
 0x591   :  { %v2240_v56 = vpop.f32.mrf.mxu0  ;;  %v2281_v25 = vpop.f32.mrf.mxu1 }
 0x592   :  { %v3700_v24 = vmul.f32 -1.442695, %v2286_v7  ;;  %v2287_v26 = vadd.f32 %v2240_v56, %v6855_v9  ;;  %v2289_v15 = vadd.f32 %v2281_v25, %v6856_v14  ;;  %v6857_v7 = vld [vmem:[#allocation85_spill] sm:$0xff] }
 0x593   :  { %v4057_v34 = vpop.eup %4056  ;;  %v2242_v21 = vpop.f32.mrf.mxu0  ;;  %v2288_v56 = vadd.f32 %v2279_v20, %v6857_v7  ;;  %v5823_v14 = vld [vmem:[#allocation3 + $0x4] ss:$16 sps:$4 sm:$0xff]   ;;  %v5829_v7 = vld [vmem:[#allocation3] ss:$16 sps:$4 sm:$0xff]  }
 0x594   :  { %v2283_v0 = vpop.f32.mrf.mxu1  ;;  %v4059_v36 = vpop.eup %4058  ;;  %4062 = vpow2.f32 %v3700_v24  ;;  %v3701_v19 = vmul.f32 -1.442695, %v2287_v26  ;;  %v3702_v9 = vmul.f32 -1.442695, %v2289_v15  ;;  %6872 = vst [vmem:[#allocation24_spill] sm:$0xff] %v5823_v14  ;;  %6874 = vst [vmem:[#allocation26_spill] sm:$0xff] %v5829_v7 }
 0x595   :  { %v4061_v3 = vpop.eup %4060  ;;  %v2243_v16 = vpop.f32.mrf.mxu0  ;;  %v2196_v49 = vmul.f32 %v4059_v36, %v4057_v34  ;;  %v5826_v15 = vld [vmem:[#allocation3 + $0xc] ss:$16 sps:$4 sm:$0xff]  }
 0x596   :  { %v2284_v29 = vpop.f32.mrf.mxu1  ;;  %v2195_v44 = vmul.f32 %v4061_v3, %v5574_v50  ;;  %4064 = vpow2.f32 %v3701_v19  ;;  %v5811_v16 = vld [vmem:[#allocation3 + $0x24] ss:$16 sps:$4 sm:$0xff]   ;;  %6873 = vst [vmem:[#allocation23_spill] sm:$0xff] %v5826_v15 }
 0x597   :  { %4066 = vrcp.f32 %v2192_v10  ;;  %v5808_v10 = vld [vmem:[#allocation3 + $0x48] ss:$16 sps:$4 sm:$0xff]   ;;  %6868 = vst [vmem:[#allocation20_spill] sm:$0xff] %v5811_v16  ;;  %v5814_v29 = vld [vmem:[#allocation3 + $0x2c] ss:$16 sps:$4 sm:$0xff]  }
 0x598   :  { %v5692_v22 = vadd.f32 %v2196_v49, %v2195_v44  ;;  %6867 = vst [vmem:[#allocation17_spill] sm:$0xff] %v5808_v10  ;;  %6869 = vst [vmem:[#allocation19_spill] sm:$0xff] %v5814_v29  ;;  %v5817_v49 = vld [vmem:[#allocation3 + $0x20] ss:$16 sps:$4 sm:$0xff]   ;;  %v5820_v44 = vld [vmem:[#allocation3 + $0x28] ss:$16 sps:$4 sm:$0xff]  }
 0x599   :  { %6870 = vst [vmem:[#allocation22_spill] sm:$0xff] %v5817_v49  ;;  %6871 = vst [vmem:[#allocation21_spill] sm:$0xff] %v5820_v44 }
 0x59a   :  { %4068 = vtanh.f32 %v5692_v22 }
 0x59b   :  { %4070 = vtanh.f32 %v2288_v56  ;;  %v5832_v56 = vld [vmem:[#allocation3 + $0x8] ss:$16 sps:$4 sm:$0xff]  }
 0x59c   :  { %4072 = vpow2.f32 %v3702_v9  ;;  %6875 = vst [vmem:[#allocation25_spill] sm:$0xff] %v5832_v56  ;;  %v6876_v9 = vld [vmem:[#allocation42_spill] sm:$0xff] }
 0x5a1   :  { %v4063_v24 = vpop.eup %4062 }
 0x5a2   :  { %v2293_v26 = vadd.f32 1.0, %v4063_v24  ;;  %v6877_v24 = vld [vmem:[#allocation43_spill] sm:$0xff] }
 0x5a3   :  { %v4065_v23 = vpop.eup %4064 }
 0x5a4   :  { %4074 = vrcp.f32 %v2293_v26  ;;  %v2299_v34 = vadd.f32 1.0, %v4065_v23  ;;  %v4067_v21 = vpop.eup %4066  ;;  %v6880_v26 = vld [vmem:[#allocation46_spill] sm:$0xff]  ;;  %v6881_v23 = vld [vmem:[#allocation47_spill] sm:$0xff] }
 0x5a6   :  { %4076 = vrcp.f32 %v2299_v34  ;;  %v6885_v34 = vld [vmem:[#allocation51_spill] sm:$0xff] }
 0x5a7   :  { %v4069_v50 = vpop.eup %4068 }
 0x5a8   :  { %v2199_v0 = vmul.f32 %v4069_v50, %v4067_v21  ;;  %v4071_v20 = vpop.eup %4070  ;;  %v6886_v21 = vld [vmem:[#allocation52_spill] sm:$0xff]  ;;  %v6887_v50 = vld [vmem:[#allocation53_spill] sm:$0xff] }
 0x5a9   :  { %v4073_v25 = vpop.eup %4072 }
 0x5aa   :  { %v2315_v36 = vpack.c.bf16 %v2199_v0, %v2199_v0  ;;  %v6888_v0 = vld [vmem:[#allocation54_spill] sm:$0xff] }
 0x5ac   :  { %2349 = vmatmul.mubr.bf16.vlgmr.msra.gmra.mxu0 %v2315_v36  ;;  %2390 = vmatmul.mubr.bf16.vlgmr.msra.gmra.mxu1 %v2315_v36  ;;  %v6889_v36 = vld [vmem:[#allocation55_spill] sm:$0xff] }
 0x5ad   :  { %2399 = vmatpush1.bf16.msra.mxu0 %v5333_v53  ;;  %2440 = vmatpush1.bf16.msra.mxu1 %v5336_v54  ;;  %v2306_v54 = vadd.f32 1.0, %v4073_v25  ;;  %v6891_v25 = vld [vmem:[#allocation57_spill] sm:$0xff] }
 0x5ae   :  { %2400 = vmatprep.subr.bf16.mxu0 %v5339_v37  ;;  %2441 = vmatprep.subr.bf16.mxu1 %v5342_v5 }
 0x5af   :  { %2430 = vmatprep.mubr.bf16.mxu0 %v6587_v33  ;;  %2471 = vmatprep.mubr.bf16.mxu1 %v6587_v33  ;;  %4078 = vrcp.f32 %v2306_v54  ;;  %v6895_v54 = vld [vmem:[#allocation61_spill] sm:$0xff] }
 0x5b1   :  { %v4075_v19 = vpop.eup %4074  ;;  %2401 = vmatpush1.bf16.msra.mxu0 %v5347_v58  ;;  %2442 = vmatpush1.bf16.msra.mxu1 %v5350_v59 }
 0x5b2   :  { %v2310_v3 = vmul.f32 %v4075_v19, %v4071_v20  ;;  %2402 = vmatprep.subr.bf16.mxu0 %v5353_v60  ;;  %2443 = vmatprep.subr.bf16.mxu1 %v5356_v61  ;;  %v6890_v20 = vld [vmem:[#allocation56_spill] sm:$0xff]  ;;  %v6892_v19 = vld [vmem:[#allocation58_spill] sm:$0xff] }
 0x5b3   :  { %v4077_v53 = vpop.eup %4076 }
 0x5b4   :  { %v2309_v37 = vmul.f32 %v4077_v53, %v5592_v57  ;;  %v5805_v57 = vld [vmem:[#allocation3 + $0x40] ss:$16 sps:$4 sm:$0xff]   ;;  %v6894_v53 = vld [vmem:[#allocation60_spill] sm:$0xff] }
 0x5b5   :  { %2403 = vmatpush1.bf16.msra.mxu0 %v5360_v27  ;;  %2444 = vmatpush1.bf16.msra.mxu1 %v5363_v28  ;;  %v5735_v27 = vld [vmem:[#allocation3 + $0xe4] ss:$16 sps:$4 sm:$0xff]   ;;  %v5738_v28 = vld [vmem:[#allocation3 + $0xec] ss:$16 sps:$4 sm:$0xff]   ;;  %6866 = vst [vmem:[#allocation18_spill] sm:$0xff] %v5805_v57 }
 0x5b6   :  { %v5710_v5 = vadd.f32 %v2310_v3, %v2309_v37  ;;  %2404 = vmatprep.subr.bf16.mxu0 %v5368_v30  ;;  %2445 = vmatprep.subr.bf16.mxu1 %v5371_v31  ;;  %v5743_v30 = vld [vmem:[#allocation3 + $0xe0] ss:$16 sps:$4 sm:$0xff]   ;;  %v5746_v31 = vld [vmem:[#allocation3 + $0xe8] ss:$16 sps:$4 sm:$0xff]  }
 0x5b7   :  { %v6893_v3 = vld [vmem:[#allocation59_spill] sm:$0xff]  ;;  %v6896_v37 = vld [vmem:[#allocation62_spill] sm:$0xff] }
 0x5b8   :  { %4080 = vtanh.f32 %v5710_v5 }
 0x5b9   :  { %2405 = vmatpush1.bf16.msra.mxu0 %v5375_v13  ;;  %2446 = vmatpush1.bf16.msra.mxu1 %v5378_v32  ;;  %v5749_v13 = vld [vmem:[#allocation3 + $0xc4] ss:$16 sps:$4 sm:$0xff]   ;;  %v5752_v32 = vld [vmem:[#allocation3 + $0xcc] ss:$16 sps:$4 sm:$0xff]  }
 0x5ba   :  { %2406 = vmatprep.subr.bf16.mxu0 %v5381_v35  ;;  %2447 = vmatprep.subr.bf16.mxu1 %v5384_v38  ;;  %v5757_v35 = vld [vmem:[#allocation3 + $0xc0] ss:$16 sps:$4 sm:$0xff]   ;;  %v5760_v38 = vld [vmem:[#allocation3 + $0xc8] ss:$16 sps:$4 sm:$0xff]  }
 0x5bc   :  { %v4079_v58 = vpop.eup %4078 }
 0x5bd   :  { %2407 = vmatpush1.bf16.msra.mxu0 %v5387_v39  ;;  %2448 = vmatpush1.bf16.msra.mxu1 %v5390_v40  ;;  %v5763_v39 = vld [vmem:[#allocation3 + $0xa4] ss:$16 sps:$4 sm:$0xff]   ;;  %v5766_v40 = vld [vmem:[#allocation3 + $0xac] ss:$16 sps:$4 sm:$0xff]  }
 0x5be   :  { %2408 = vmatprep.subr.bf16.mxu0 %v5393_v41  ;;  %2449 = vmatprep.subr.bf16.mxu1 %v5396_v42  ;;  %v5769_v41 = vld [vmem:[#allocation3 + $0xa0] ss:$16 sps:$4 sm:$0xff]   ;;  %v5772_v42 = vld [vmem:[#allocation3 + $0xa8] ss:$16 sps:$4 sm:$0xff]  }
 0x5c1   :  { %2409 = vmatpush1.bf16.msra.mxu0 %v5399_v43  ;;  %2450 = vmatpush1.bf16.msra.mxu1 %v5402_v46  ;;  %v5775_v43 = vld [vmem:[#allocation3 + $0x84] ss:$16 sps:$4 sm:$0xff]   ;;  %v5778_v46 = vld [vmem:[#allocation3 + $0x8c] ss:$16 sps:$4 sm:$0xff]  }
 0x5c2   :  { %2410 = vmatprep.subr.bf16.mxu0 %v5405_v47  ;;  %2451 = vmatprep.subr.bf16.mxu1 %v5408_v48  ;;  %v5781_v47 = vld [vmem:[#allocation3 + $0x80] ss:$16 sps:$4 sm:$0xff]   ;;  %v5784_v48 = vld [vmem:[#allocation3 + $0x88] ss:$16 sps:$4 sm:$0xff]  }
 0x5c3   :  { %6858 = vst [vmem:[#allocation78_spill] sm:$0xff] %v5781_v47  ;;  %6859 = vst [vmem:[#allocation79_spill] sm:$0xff] %v5784_v48 }
 0x5c5   :  { %v4081_v59 = vpop.eup %4080  ;;  %2411 = vmatpush1.bf16.msra.mxu0 %v5411_v51  ;;  %2452 = vmatpush1.bf16.msra.mxu1 %v5414_v52  ;;  %v5787_v51 = vld [vmem:[#allocation3 + $0x64] ss:$16 sps:$4 sm:$0xff]   ;;  %v5790_v52 = vld [vmem:[#allocation3 + $0x6c] ss:$16 sps:$4 sm:$0xff]  }
 0x5c6   :  { %2412 = vmatprep.subr.bf16.mxu0 %v5417_v12  ;;  %2453 = vmatprep.subr.bf16.mxu1 %v5420_v55  ;;  %v2313_v60 = vmul.f32 %v4081_v59, %v4079_v58  ;;  %6860 = vst [vmem:[#allocation77_spill] sm:$0xff] %v5787_v51  ;;  %6861 = vst [vmem:[#allocation80_spill] sm:$0xff] %v5790_v52  ;;  %v5793_v12 = vld [vmem:[#allocation3 + $0x60] ss:$16 sps:$4 sm:$0xff]   ;;  %v5796_v55 = vld [vmem:[#allocation3 + $0x68] ss:$16 sps:$4 sm:$0xff]  }
 0x5c7   :  { %6862 = vst [vmem:[#allocation82_spill] sm:$0xff] %v5793_v12  ;;  %6863 = vst [vmem:[#allocation83_spill] sm:$0xff] %v5796_v55  ;;  %v6897_v58 = vld [vmem:[#allocation63_spill] sm:$0xff]  ;;  %v6898_v59 = vld [vmem:[#allocation64_spill] sm:$0xff] }
 0x5c8   :  { %v5731_v61 = vpack.c.bf16 %v2313_v60, %v2313_v60  ;;  %v6899_v60 = vld [vmem:[#allocation65_spill] sm:$0xff] }
 0x5c9   :  { %2413 = vmatpush1.bf16.msra.mxu0 %v5423_v62  ;;  %2454 = vmatpush1.bf16.msra.mxu1 %v5426_v63  ;;  %v5799_v62 = vld [vmem:[#allocation3 + $0x44] ss:$16 sps:$4 sm:$0xff]   ;;  %v5802_v63 = vld [vmem:[#allocation3 + $0x4c] ss:$16 sps:$4 sm:$0xff]  }
 0x5ca   :  { %2512 = vmatprep.subr.bf16.mxu0 %v5735_v27  ;;  %2553 = vmatprep.subr.bf16.mxu1 %v5738_v28  ;;  %6864 = vst [vmem:[#allocation81_spill] sm:$0xff] %v5799_v62  ;;  %6865 = vst [vmem:[#allocation16_spill] sm:$0xff] %v5802_v63 }
 0x5cc   :  { %2431 = vmatmul.mubr.bf16.vlgmr.msra.gmra.mxu0 %v5731_v61  ;;  %2472 = vmatmul.mubr.bf16.vlgmr.msra.gmra.mxu1 %v5731_v61 }
 0x5cd   :  { %2513 = vmatpush1.bf16.msra.mxu0 %v5743_v30  ;;  %2554 = vmatpush1.bf16.msra.mxu1 %v5746_v31 }
 0x5ce   :  { %2514 = vmatprep.subr.bf16.mxu0 %v5749_v13  ;;  %2555 = vmatprep.subr.bf16.mxu1 %v5752_v32 }
 0x5cf   :  { %2544 = vmatprep.mubr.bf16.mxu0 %v6587_v33  ;;  %2585 = vmatprep.mubr.bf16.mxu1 %v6587_v33 }
 0x5d1   :  { %2515 = vmatpush1.bf16.msra.mxu0 %v5757_v35  ;;  %2556 = vmatpush1.bf16.msra.mxu1 %v5760_v38 }
 0x5d2   :  { %2516 = vmatprep.subr.bf16.mxu0 %v5763_v39  ;;  %2557 = vmatprep.subr.bf16.mxu1 %v5766_v40 }
 0x5d5   :  { %2517 = vmatpush1.bf16.msra.mxu0 %v5769_v41  ;;  %2558 = vmatpush1.bf16.msra.mxu1 %v5772_v42 }
 0x5d6   :  { %2518 = vmatprep.subr.bf16.mxu0 %v5775_v43  ;;  %2559 = vmatprep.subr.bf16.mxu1 %v5778_v46 }
 0x5d9   :  { %2519 = vmatpush1.bf16.msra.mxu0 %v5781_v47  ;;  %2560 = vmatpush1.bf16.msra.mxu1 %v5784_v48 }
 0x5da   :  { %2520 = vmatprep.subr.bf16.mxu0 %v5787_v51  ;;  %2561 = vmatprep.subr.bf16.mxu1 %v5790_v52 }
 0x5dd   :  { %2521 = vmatpush1.bf16.msra.mxu0 %v5793_v12  ;;  %2562 = vmatpush1.bf16.msra.mxu1 %v5796_v55 }
 0x5de   :  { %2522 = vmatprep.subr.bf16.mxu0 %v5799_v62  ;;  %2563 = vmatprep.subr.bf16.mxu1 %v5802_v63 }
 0x5e1   :  { %2523 = vmatpush1.bf16.msra.mxu0 %v5805_v57  ;;  %2564 = vmatpush1.bf16.msra.mxu1 %v5808_v10 }
 0x5e2   :  { %2524 = vmatprep.subr.bf16.mxu0 %v5811_v16  ;;  %2565 = vmatprep.subr.bf16.mxu1 %v5814_v29 }
 0x5e5   :  { %2525 = vmatpush1.bf16.msra.mxu0 %v5817_v49  ;;  %2566 = vmatpush1.bf16.msra.mxu1 %v5820_v44 }
 0x5e6   :  { %2526 = vmatprep.subr.bf16.mxu0 %v5823_v14  ;;  %2567 = vmatprep.subr.bf16.mxu1 %v5826_v15 }
 0x5e9   :  { %2527 = vmatpush1.bf16.msra.mxu0 %v5829_v7  ;;  %2568 = vmatpush1.bf16.msra.mxu1 %v5832_v56 }
 0x5ea   :  { %2624 = vmatprep.subr.bf16.mxu0 %v6820_v45  ;;  %2665 = vmatprep.subr.bf16.mxu1 %v6821_v8  ;;  %v6878_v45 = vld [vmem:[#allocation44_spill] sm:$0xff]  ;;  %v6879_v8 = vld [vmem:[#allocation45_spill] sm:$0xff] }
 0x5ec   :  { %2545 = vmatmul.mubr.bf16.vlgmr.msra.gmra.mxu0 %v5731_v61  ;;  %2586 = vmatmul.mubr.bf16.vlgmr.msra.gmra.mxu1 %v5731_v61  ;;  %v6900_v61 = vld [vmem:[#allocation66_spill] sm:$0xff] }
 0x5ed   :  { %2625 = vmatpush1.bf16.msra.mxu0 %v6822_v4  ;;  %2666 = vmatpush1.bf16.msra.mxu1 %v6823_v6  ;;  %v6882_v4 = vld [vmem:[#allocation48_spill] sm:$0xff]  ;;  %v6883_v6 = vld [vmem:[#allocation49_spill] sm:$0xff] }
 0x5ee   :  { %2626 = vmatprep.subr.bf16.mxu0 %v6824_v2  ;;  %2667 = vmatprep.subr.bf16.mxu1 %v6876_v9  ;;  %v6884_v2 = vld [vmem:[#allocation50_spill] sm:$0xff]  ;;  %v6901_v9 = vld [vmem:[#allocation67_spill] sm:$0xff] }
 0x5ef   :  { %2656 = vmatprep.mubr.bf16.mxu0 %v6587_v33  ;;  %2697 = vmatprep.mubr.bf16.mxu1 %v6587_v33 }
 0x5f1   :  { %2627 = vmatpush1.bf16.msra.mxu0 %v6877_v24  ;;  %2668 = vmatpush1.bf16.msra.mxu1 %v6878_v45  ;;  %v6902_v24 = vld [vmem:[#allocation68_spill] sm:$0xff]  ;;  %v6903_v45 = vld [vmem:[#allocation69_spill] sm:$0xff] }
 0x5f2   :  { %2628 = vmatprep.subr.bf16.mxu0 %v6879_v8  ;;  %2669 = vmatprep.subr.bf16.mxu1 %v6880_v26  ;;  %v6904_v8 = vld [vmem:[#allocation76_spill] sm:$0xff] }
 0x5f5   :  { %2629 = vmatpush1.bf16.msra.mxu0 %v6881_v23  ;;  %2670 = vmatpush1.bf16.msra.mxu1 %v6882_v4 }
 0x5f6   :  { %2630 = vmatprep.subr.bf16.mxu0 %v6883_v6  ;;  %2671 = vmatprep.subr.bf16.mxu1 %v6884_v2 }
 0x5f9   :  { %2631 = vmatpush1.bf16.msra.mxu0 %v6885_v34  ;;  %2672 = vmatpush1.bf16.msra.mxu1 %v6886_v21 }
 0x5fa   :  { %2632 = vmatprep.subr.bf16.mxu0 %v6887_v50  ;;  %2673 = vmatprep.subr.bf16.mxu1 %v6888_v0 }
 0x5fd   :  { %2633 = vmatpush1.bf16.msra.mxu0 %v6889_v36  ;;  %2674 = vmatpush1.bf16.msra.mxu1 %v6890_v20 }
 0x5fe   :  { %2634 = vmatprep.subr.bf16.mxu0 %v6891_v25  ;;  %2675 = vmatprep.subr.bf16.mxu1 %v6892_v19 }
 0x601   :  { %2635 = vmatpush1.bf16.msra.mxu0 %v6893_v3  ;;  %2676 = vmatpush1.bf16.msra.mxu1 %v6894_v53 }
 0x602   :  { %2636 = vmatprep.subr.bf16.mxu0 %v6895_v54  ;;  %2677 = vmatprep.subr.bf16.mxu1 %v6896_v37 }
 0x605   :  { %2637 = vmatpush1.bf16.msra.mxu0 %v6897_v58  ;;  %2678 = vmatpush1.bf16.msra.mxu1 %v6898_v59 }
 0x606   :  { %2638 = vmatprep.subr.bf16.mxu0 %v6899_v60  ;;  %2679 = vmatprep.subr.bf16.mxu1 %v6900_v61 }
 0x609   :  { %2639 = vmatpush1.bf16.msra.mxu0 %v6901_v9  ;;  %2680 = vmatpush1.bf16.msra.mxu1 %v6902_v24 }
 0x60a   :  { %2706 = vmatprep.subr.bf16.mxu0 %v6903_v45  ;;  %2747 = vmatprep.subr.bf16.mxu1 %v6904_v8 }
 0x66c   :  { %v2350_v26 = vpop.f32.mrf.mxu0  ;;  %v2391_v23 = vpop.f32.mrf.mxu1 }
 0x66e   :  { %v2352_v4 = vpop.f32.mrf.mxu0  ;;  %v2393_v6 = vpop.f32.mrf.mxu1 }
 0x670   :  { %v2354_v2 = vpop.f32.mrf.mxu0  ;;  %v2395_v34 = vpop.f32.mrf.mxu1 }
 0x672   :  { %v2355_v21 = vpop.f32.mrf.mxu0  ;;  %v2396_v50 = vpop.f32.mrf.mxu1 }
 0x68c   :  { %v2432_v0 = vpop.f32.mrf.mxu0  ;;  %v2473_v36 = vpop.f32.mrf.mxu1 }
 0x68d   :  { %v2433_v20 = vadd.f32 %v2432_v0, %v2350_v26  ;;  %v2474_v8 = vadd.f32 %v2473_v36, %v2391_v23  ;;  %v6906_v23 = vld [vmem:[#allocation90_spill] sm:$0xff] }
 0x68e   :  { %v2434_v25 = vpop.f32.mrf.mxu0  ;;  %v2475_v19 = vpop.f32.mrf.mxu1 }
 0x68f   :  { %v2480_v3 = vadd.f32 %v2433_v20, %v5119_v11  ;;  %v2435_v53 = vadd.f32 %v2434_v25, %v2352_v4  ;;  %v2476_v24 = vadd.f32 %v2475_v19, %v2393_v6  ;;  %v2482_v34 = vadd.f32 %v2474_v8, %v5134_v17  ;;  %v6905_v25 = vld [vmem:[#allocation88_spill] sm:$0xff] }
 0x690   :  { %v2436_v54 = vpop.f32.mrf.mxu0  ;;  %v2477_v37 = vpop.f32.mrf.mxu1 }
 0x691   :  { %v3703_v58 = vmul.f32 -1.442695, %v2480_v3  ;;  %v2481_v59 = vadd.f32 %v2435_v53, %v5123_v1  ;;  %v2483_v45 = vadd.f32 %v2476_v24, %v5129_v18 }
 0x692   :  { %v2437_v60 = vpop.f32.mrf.mxu0  ;;  %v2478_v61 = vpop.f32.mrf.mxu1 }
 0x693   :  { %4082 = vpow2.f32 %v3703_v58  ;;  %v3704_v9 = vmul.f32 -1.442695, %v2481_v59  ;;  %v3705_v26 = vmul.f32 -1.442695, %v2483_v45 }
 0x695   :  { %4084 = vpow2.f32 %v3704_v9 }
 0x696   :  { %4086 = vpow2.f32 %v3705_v26 }
 0x6a0   :  { %v4083_v2 = vpop.eup %4082 }
 0x6a1   :  { %v2487_v21 = vadd.f32 1.0, %v4083_v2 }
 0x6a2   :  { %v4085_v4 = vpop.eup %4084 }
 0x6a3   :  { %4088 = vrcp.f32 %v2487_v21  ;;  %v2493_v50 = vadd.f32 1.0, %v4085_v4  ;;  %v4087_v19 = vpop.eup %4086  ;;  %v6907_v21 = vld [vmem:[#allocation91_spill] sm:$0xff] }
 0x6a4   :  { %4090 = vtanh.f32 %v2482_v34  ;;  %v2500_v24 = vadd.f32 1.0, %v4087_v19 }
 0x6a5   :  { %4092 = vrcp.f32 %v2493_v50  ;;  %v6908_v50 = vld [vmem:[#allocation89_spill] sm:$0xff] }
 0x6ac   :  { %v2546_v0 = vpop.f32.mrf.mxu0  ;;  %v2587_v20 = vpop.f32.mrf.mxu1 }
 0x6ad   :  { %v2594_v3 = vadd.f32 %v2546_v0, %v6905_v25  ;;  %v2596_v0 = vadd.f32 %v2587_v20, %v6908_v50  ;;  %v5888_v20 = vld [vmem:[#allocation6 + $0xe8] ss:$16 sps:$4 sm:$0xff]  }
 0x6ae   :  { %v2548_v53 = vpop.f32.mrf.mxu0  ;;  %v2589_v6 = vpop.f32.mrf.mxu1 }
 0x6af   :  { %v3706_v54 = vmul.f32 -1.442695, %v2594_v3  ;;  %v2595_v36 = vadd.f32 %v2548_v53, %v6906_v23  ;;  %v2597_v4 = vadd.f32 %v2589_v6, %v6907_v21  ;;  %v5891_v6 = vld [vmem:[#allocation6 + $0xc4] ss:$16 sps:$4 sm:$0xff]  }
 0x6b0   :  { %v4089_v37 = vpop.eup %4088  ;;  %v2550_v58 = vpop.f32.mrf.mxu0 }
 0x6b1   :  { %v2591_v59 = vpop.f32.mrf.mxu1  ;;  %v4091_v60 = vpop.eup %4090  ;;  %4094 = vpow2.f32 %v3706_v54  ;;  %v3707_v61 = vmul.f32 -1.442695, %v2595_v36  ;;  %v3708_v25 = vmul.f32 -1.442695, %v2597_v4  ;;  %v5885_v58 = vld [vmem:[#allocation6 + $0xe0] ss:$16 sps:$4 sm:$0xff]  }
 0x6b2   :  { %v4093_v9 = vpop.eup %4092  ;;  %v2551_v45 = vpop.f32.mrf.mxu0  ;;  %v2504_v26 = vmul.f32 %v4091_v60, %v4089_v37  ;;  %v5894_v59 = vld [vmem:[#allocation6 + $0xcc] ss:$16 sps:$4 sm:$0xff]  }
 0x6b3   :  { %v2592_v8 = vpop.f32.mrf.mxu1  ;;  %v2503_v2 = vmul.f32 %v4093_v9, %v5692_v22  ;;  %4096 = vpow2.f32 %v3707_v61  ;;  %v5902_v45 = vld [vmem:[#allocation6 + $0xc8] ss:$16 sps:$4 sm:$0xff]  }
 0x6b4   :  { %4098 = vrcp.f32 %v2500_v24  ;;  %v5899_v24 = vld [vmem:[#allocation6 + $0xc0] ss:$16 sps:$4 sm:$0xff]  }
 0x6b5   :  { %v5880_v34 = vadd.f32 %v2504_v26, %v2503_v2  ;;  %v5905_v26 = vld [vmem:[#allocation6 + $0xa4] ss:$16 sps:$4 sm:$0xff]   ;;  %v5908_v2 = vld [vmem:[#allocation6 + $0xac] ss:$16 sps:$4 sm:$0xff]  }
 0x6b7   :  { %4100 = vtanh.f32 %v5880_v34 }
 0x6b8   :  { %4102 = vtanh.f32 %v2596_v0  ;;  %v5912_v0 = vld [vmem:[#allocation6 + $0xa0] ss:$16 sps:$4 sm:$0xff]  }
 0x6b9   :  { %4104 = vpow2.f32 %v3708_v25  ;;  %v5915_v25 = vld [vmem:[#allocation6 + $0xa8] ss:$16 sps:$4 sm:$0xff]  }
 0x6be   :  { %v4095_v3 = vpop.eup %4094 }
 0x6bf   :  { %v2601_v53 = vadd.f32 1.0, %v4095_v3 }
 0x6c0   :  { %v4097_v19 = vpop.eup %4096 }
 0x6c1   :  { %4106 = vrcp.f32 %v2601_v53  ;;  %v2607_v54 = vadd.f32 1.0, %v4097_v19  ;;  %v4099_v23 = vpop.eup %4098  ;;  %v5920_v53 = vld [vmem:[#allocation6 + $0x84] ss:$16 sps:$4 sm:$0xff]   ;;  %v5923_v19 = vld [vmem:[#allocation6 + $0x8c] ss:$16 sps:$4 sm:$0xff]  }
 0x6c3   :  { %4108 = vrcp.f32 %v2607_v54  ;;  %v5930_v54 = vld [vmem:[#allocation6 + $0x88] ss:$16 sps:$4 sm:$0xff]  }
 0x6c4   :  { %v4101_v22 = vpop.eup %4100 }
 0x6c5   :  { %v2507_v36 = vmul.f32 %v4101_v22, %v4099_v23  ;;  %v4103_v60 = vpop.eup %4102  ;;  %v5933_v23 = vld [vmem:[#allocation6 + $0x64] ss:$16 sps:$4 sm:$0xff]   ;;  %v5936_v22 = vld [vmem:[#allocation6 + $0x6c] ss:$16 sps:$4 sm:$0xff]  }
 0x6c6   :  { %v4105_v61 = vpop.eup %4104  ;;  %6909 = vst [vmem:[#allocation28_spill] sm:$0xff] %v5936_v22 }
 0x6c7   :  { %v2623_v37 = vpack.c.bf16 %v2507_v36, %v2507_v36  ;;  %v2614_v4 = vadd.f32 1.0, %v4105_v61  ;;  %v5939_v36 = vld [vmem:[#allocation6 + $0x60] ss:$16 sps:$4 sm:$0xff]   ;;  %v5948_v61 = vld [vmem:[#allocation6 + $0x4c] ss:$16 sps:$4 sm:$0xff]  }
 0x6c8   :  { %6910 = vst [vmem:[#allocation27_spill] sm:$0xff] %v5939_v36  ;;  %6913 = vst [vmem:[#allocation32_spill] sm:$0xff] %v5948_v61 }
 0x6c9   :  { %2657 = vmatmul.mubr.bf16.vlgmr.msra.gmra.mxu0 %v2623_v37  ;;  %2698 = vmatmul.mubr.bf16.vlgmr.msra.gmra.mxu1 %v2623_v37  ;;  %4110 = vrcp.f32 %v2614_v4  ;;  %v5942_v37 = vld [vmem:[#allocation6 + $0x68] ss:$16 sps:$4 sm:$0xff]   ;;  %v5960_v4 = vld [vmem:[#allocation6 + $0x2c] ss:$16 sps:$4 sm:$0xff]  }
 0x6ca   :  { %2707 = vmatpush1.bf16.msra.mxu0 %v5885_v58  ;;  %2748 = vmatpush1.bf16.msra.mxu1 %v5888_v20  ;;  %6911 = vst [vmem:[#allocation30_spill] sm:$0xff] %v5942_v37  ;;  %6917 = vst [vmem:[#allocation36_spill] sm:$0xff] %v5960_v4 }
 0x6cb   :  { %2708 = vmatprep.subr.bf16.mxu0 %v5891_v6  ;;  %2749 = vmatprep.subr.bf16.mxu1 %v5894_v59 }
 0x6cc   :  { %2738 = vmatprep.mubr.bf16.mxu0 %v6587_v33  ;;  %2779 = vmatprep.mubr.bf16.mxu1 %v6587_v33 }
 0x6ce   :  { %v4107_v9 = vpop.eup %4106  ;;  %2709 = vmatpush1.bf16.msra.mxu0 %v5899_v24  ;;  %2750 = vmatpush1.bf16.msra.mxu1 %v5902_v45 }
 0x6cf   :  { %v2618_v8 = vmul.f32 %v4107_v9, %v4103_v60  ;;  %2710 = vmatprep.subr.bf16.mxu0 %v5905_v26  ;;  %2751 = vmatprep.subr.bf16.mxu1 %v5908_v2  ;;  %v5945_v60 = vld [vmem:[#allocation6 + $0x44] ss:$16 sps:$4 sm:$0xff]   ;;  %v5951_v9 = vld [vmem:[#allocation6 + $0x40] ss:$16 sps:$4 sm:$0xff]  }
 0x6d0   :  { %v4109_v21 = vpop.eup %4108  ;;  %6912 = vst [vmem:[#allocation29_spill] sm:$0xff] %v5945_v60  ;;  %6914 = vst [vmem:[#allocation31_spill] sm:$0xff] %v5951_v9 }
 0x6d1   :  { %v2617_v50 = vmul.f32 %v4109_v21, %v5710_v5  ;;  %v5927_v5 = vld [vmem:[#allocation6 + $0x80] ss:$16 sps:$4 sm:$0xff]   ;;  %v5957_v21 = vld [vmem:[#allocation6 + $0x24] ss:$16 sps:$4 sm:$0xff]  }
 0x6d2   :  { %2711 = vmatpush1.bf16.msra.mxu0 %v5912_v0  ;;  %2752 = vmatpush1.bf16.msra.mxu1 %v5915_v25  ;;  %6916 = vst [vmem:[#allocation33_spill] sm:$0xff] %v5957_v21 }
 0x6d3   :  { %v5918_v3 = vadd.f32 %v2618_v8, %v2617_v50  ;;  %2712 = vmatprep.subr.bf16.mxu0 %v5920_v53  ;;  %2753 = vmatprep.subr.bf16.mxu1 %v5923_v19  ;;  %v5954_v8 = vld [vmem:[#allocation6 + $0x48] ss:$16 sps:$4 sm:$0xff]  }
 0x6d4   :  { %6915 = vst [vmem:[#allocation34_spill] sm:$0xff] %v5954_v8 }
 0x6d5   :  { %4112 = vtanh.f32 %v5918_v3 }
 0x6d6   :  { %2713 = vmatpush1.bf16.msra.mxu0 %v5927_v5  ;;  %2754 = vmatpush1.bf16.msra.mxu1 %v5930_v54  ;;  %v4111_v50 = vpop.eup %4110 }
 0x6d7   :  { %2714 = vmatprep.subr.bf16.mxu0 %v5933_v23  ;;  %2755 = vmatprep.subr.bf16.mxu1 %v5936_v22  ;;  %v5978_v22 = vld [vmem:[#allocation6 + $0x8] ss:$16 sps:$4 sm:$0xff]  }
 0x6da   :  { %2715 = vmatpush1.bf16.msra.mxu0 %v5939_v36  ;;  %2756 = vmatpush1.bf16.msra.mxu1 %v5942_v37  ;;  %v5963_v37 = vld [vmem:[#allocation6 + $0x20] ss:$16 sps:$4 sm:$0xff]  }
 0x6db   :  { %2716 = vmatprep.subr.bf16.mxu0 %v5945_v60  ;;  %2757 = vmatprep.subr.bf16.mxu1 %v5948_v61  ;;  %v5966_v61 = vld [vmem:[#allocation6 + $0x28] ss:$16 sps:$4 sm:$0xff]   ;;  %v5975_v36 = vld [vmem:[#allocation6] ss:$16 sps:$4 sm:$0xff]  }
 0x6de   :  { %2717 = vmatpush1.bf16.msra.mxu0 %v5951_v9  ;;  %2758 = vmatpush1.bf16.msra.mxu1 %v5954_v8  ;;  %v5969_v9 = vld [vmem:[#allocation6 + $0x4] ss:$16 sps:$4 sm:$0xff]   ;;  %v5972_v8 = vld [vmem:[#allocation6 + $0xc] ss:$16 sps:$4 sm:$0xff]  }
 0x6df   :  { %2718 = vmatprep.subr.bf16.mxu0 %v5957_v21  ;;  %2759 = vmatprep.subr.bf16.mxu1 %v5960_v4 }
 0x6e2   :  { %v4113_v60 = vpop.eup %4112  ;;  %2719 = vmatpush1.bf16.msra.mxu0 %v5963_v37  ;;  %2760 = vmatpush1.bf16.msra.mxu1 %v5966_v61 }
 0x6e3   :  { %2720 = vmatprep.subr.bf16.mxu0 %v5969_v9  ;;  %2761 = vmatprep.subr.bf16.mxu1 %v5972_v8  ;;  %v2621_v21 = vmul.f32 %v4113_v60, %v4111_v50  ;;  %v6015_v60 = vld [vmem:[#allocation8 + $0xe4] ss:$16 sps:$4 sm:$0xff]   ;;  %v6021_v50 = vld [vmem:[#allocation8 + $0xe0] ss:$16 sps:$4 sm:$0xff]  }
 0x6e4   :  { %6918 = vst [vmem:[#allocation35_spill] sm:$0xff] %v6015_v60  ;;  %6920 = vst [vmem:[#allocation38_spill] sm:$0xff] %v6021_v50 }
 0x6e5   :  { %v2622_v4 = vpack.c.bf16 %v2621_v21, %v2621_v21  ;;  %v6018_v21 = vld [vmem:[#allocation8 + $0xec] ss:$16 sps:$4 sm:$0xff]  }
 0x6e6   :  { %2721 = vmatpush1.bf16.msra.mxu0 %v5975_v36  ;;  %2762 = vmatpush1.bf16.msra.mxu1 %v5978_v22  ;;  %6919 = vst [vmem:[#allocation37_spill] sm:$0xff] %v6018_v21 }
 0x6e7   :  { %2820 = vmatprep.subr.bf16.mxu0 %v5735_v27  ;;  %2861 = vmatprep.subr.bf16.mxu1 %v5738_v28 }
 0x6e9   :  { %2739 = vmatmul.mubr.bf16.vlgmr.msra.gmra.mxu0 %v2622_v4  ;;  %2780 = vmatmul.mubr.bf16.vlgmr.msra.gmra.mxu1 %v2622_v4 }
 0x6ea   :  { %2821 = vmatpush1.bf16.msra.mxu0 %v5743_v30  ;;  %2862 = vmatpush1.bf16.msra.mxu1 %v5746_v31 }
 0x6eb   :  { %2822 = vmatprep.subr.bf16.mxu0 %v5749_v13  ;;  %2863 = vmatprep.subr.bf16.mxu1 %v5752_v32 }
 0x6ec   :  { %2852 = vmatprep.mubr.bf16.mxu0 %v6587_v33  ;;  %2893 = vmatprep.mubr.bf16.mxu1 %v6587_v33 }
 0x6ee   :  { %2823 = vmatpush1.bf16.msra.mxu0 %v5757_v35  ;;  %2864 = vmatpush1.bf16.msra.mxu1 %v5760_v38 }
 0x6ef   :  { %2824 = vmatprep.subr.bf16.mxu0 %v5763_v39  ;;  %2865 = vmatprep.subr.bf16.mxu1 %v5766_v40 }
 0x6f2   :  { %2825 = vmatpush1.bf16.msra.mxu0 %v5769_v41  ;;  %2866 = vmatpush1.bf16.msra.mxu1 %v5772_v42 }
 0x6f3   :  { %2826 = vmatprep.subr.bf16.mxu0 %v5775_v43  ;;  %2867 = vmatprep.subr.bf16.mxu1 %v5778_v46 }
 0x6f6   :  { %2827 = vmatpush1.bf16.msra.mxu0 %v5781_v47  ;;  %2868 = vmatpush1.bf16.msra.mxu1 %v5784_v48 }
 0x6f7   :  { %2828 = vmatprep.subr.bf16.mxu0 %v5787_v51  ;;  %2869 = vmatprep.subr.bf16.mxu1 %v5790_v52 }
 0x6fa   :  { %2829 = vmatpush1.bf16.msra.mxu0 %v5793_v12  ;;  %2870 = vmatpush1.bf16.msra.mxu1 %v5796_v55 }
 0x6fb   :  { %2830 = vmatprep.subr.bf16.mxu0 %v5799_v62  ;;  %2871 = vmatprep.subr.bf16.mxu1 %v5802_v63 }
 0x6fe   :  { %2831 = vmatpush1.bf16.msra.mxu0 %v5805_v57  ;;  %2872 = vmatpush1.bf16.msra.mxu1 %v5808_v10 }
 0x6ff   :  { %2832 = vmatprep.subr.bf16.mxu0 %v5811_v16  ;;  %2873 = vmatprep.subr.bf16.mxu1 %v5814_v29 }
 0x702   :  { %2833 = vmatpush1.bf16.msra.mxu0 %v5817_v49  ;;  %2874 = vmatpush1.bf16.msra.mxu1 %v5820_v44 }
 0x703   :  { %2834 = vmatprep.subr.bf16.mxu0 %v5823_v14  ;;  %2875 = vmatprep.subr.bf16.mxu1 %v5826_v15  ;;  %v6024_v14 = vld [vmem:[#allocation8 + $0xe8] ss:$16 sps:$4 sm:$0xff]  }
 0x704   :  { %6921 = vst [vmem:[#allocation39_spill] sm:$0xff] %v6024_v14 }
 0x706   :  { %2835 = vmatpush1.bf16.msra.mxu0 %v5829_v7  ;;  %2876 = vmatpush1.bf16.msra.mxu1 %v5832_v56  ;;  %v6027_v7 = vld [vmem:[#allocation8 + $0xc4] ss:$16 sps:$4 sm:$0xff]   ;;  %v6030_v56 = vld [vmem:[#allocation8 + $0xcc] ss:$16 sps:$4 sm:$0xff]  }
 0x707   :  { %2932 = vmatprep.subr.bf16.mxu0 %v6015_v60  ;;  %2973 = vmatprep.subr.bf16.mxu1 %v6018_v21  ;;  %6922 = vst [vmem:[#allocation70_spill] sm:$0xff] %v6027_v7  ;;  %6923 = vst [vmem:[#allocation75_spill] sm:$0xff] %v6030_v56  ;;  %v6050_v21 = vld [vmem:[#allocation8 + $0xa8] ss:$16 sps:$4 sm:$0xff]  }
 0x708   :  { %6929 = vst [vmem:[#allocation41_spill] sm:$0xff] %v6050_v21 }
 0x709   :  { %2853 = vmatmul.mubr.bf16.vlgmr.msra.gmra.mxu0 %v2622_v4  ;;  %2894 = vmatmul.mubr.bf16.vlgmr.msra.gmra.mxu1 %v2622_v4  ;;  %v6035_v4 = vld [vmem:[#allocation8 + $0xc0] ss:$16 sps:$4 sm:$0xff]  }
 0x70a   :  { %2933 = vmatpush1.bf16.msra.mxu0 %v6021_v50  ;;  %2974 = vmatpush1.bf16.msra.mxu1 %v6024_v14  ;;  %6924 = vst [vmem:[#allocation73_spill] sm:$0xff] %v6035_v4  ;;  %v6038_v50 = vld [vmem:[#allocation8 + $0xc8] ss:$16 sps:$4 sm:$0xff]   ;;  %v6041_v14 = vld [vmem:[#allocation8 + $0xa4] ss:$16 sps:$4 sm:$0xff]  }
 0x70b   :  { %2934 = vmatprep.subr.bf16.mxu0 %v6027_v7  ;;  %2975 = vmatprep.subr.bf16.mxu1 %v6030_v56  ;;  %6925 = vst [vmem:[#allocation71_spill] sm:$0xff] %v6038_v50  ;;  %6926 = vst [vmem:[#allocation74_spill] sm:$0xff] %v6041_v14  ;;  %v6044_v7 = vld [vmem:[#allocation8 + $0xac] ss:$16 sps:$4 sm:$0xff]   ;;  %v6047_v56 = vld [vmem:[#allocation8 + $0xa0] ss:$16 sps:$4 sm:$0xff]  }
 0x70c   :  { %2964 = vmatprep.mubr.bf16.mxu0 %v6587_v33  ;;  %3005 = vmatprep.mubr.bf16.mxu1 %v6587_v33  ;;  %6927 = vst [vmem:[#allocation72_spill] sm:$0xff] %v6044_v7  ;;  %6928 = vst [vmem:[#allocation40_spill] sm:$0xff] %v6047_v56 }
 0x70e   :  { %2935 = vmatpush1.bf16.msra.mxu0 %v6035_v4  ;;  %2976 = vmatpush1.bf16.msra.mxu1 %v6038_v50  ;;  %v6053_v4 = vld [vmem:[#allocation8 + $0x84] ss:$16 sps:$4 sm:$0xff]   ;;  %v6056_v50 = vld [vmem:[#allocation8 + $0x8c] ss:$16 sps:$4 sm:$0xff]  }
 0x70f   :  { %2936 = vmatprep.subr.bf16.mxu0 %v6041_v14  ;;  %2977 = vmatprep.subr.bf16.mxu1 %v6044_v7  ;;  %6930 = vst [vmem:[#allocation84_spill] sm:$0xff] %v6053_v4  ;;  %6931 = vst [vmem:[#allocation86_spill] sm:$0xff] %v6056_v50  ;;  %v6059_v14 = vld [vmem:[#allocation8 + $0x80] ss:$16 sps:$4 sm:$0xff]   ;;  %v6062_v7 = vld [vmem:[#allocation8 + $0x88] ss:$16 sps:$4 sm:$0xff]  }
 0x710   :  { %6932 = vst [vmem:[#allocation87_spill] sm:$0xff] %v6059_v14  ;;  %6933 = vst [vmem:[#allocation85_spill] sm:$0xff] %v6062_v7 }
 0x712   :  { %2937 = vmatpush1.bf16.msra.mxu0 %v6047_v56  ;;  %2978 = vmatpush1.bf16.msra.mxu1 %v6050_v21  ;;  %v6065_v56 = vld [vmem:[#allocation8 + $0x64] ss:$16 sps:$4 sm:$0xff]   ;;  %v6068_v21 = vld [vmem:[#allocation8 + $0x6c] ss:$16 sps:$4 sm:$0xff]  }
 0x713   :  { %2938 = vmatprep.subr.bf16.mxu0 %v6053_v4  ;;  %2979 = vmatprep.subr.bf16.mxu1 %v6056_v50  ;;  %6934 = vst [vmem:[#allocation42_spill] sm:$0xff] %v6065_v56  ;;  %6935 = vst [vmem:[#allocation43_spill] sm:$0xff] %v6068_v21  ;;  %v6071_v4 = vld [vmem:[#allocation8 + $0x60] ss:$16 sps:$4 sm:$0xff]   ;;  %v6074_v50 = vld [vmem:[#allocation8 + $0x68] ss:$16 sps:$4 sm:$0xff]  }
 0x714   :  { %6936 = vst [vmem:[#allocation44_spill] sm:$0xff] %v6071_v4  ;;  %6937 = vst [vmem:[#allocation45_spill] sm:$0xff] %v6074_v50 }
 0x716   :  { %2939 = vmatpush1.bf16.msra.mxu0 %v6059_v14  ;;  %2980 = vmatpush1.bf16.msra.mxu1 %v6062_v7  ;;  %v6077_v14 = vld [vmem:[#allocation8 + $0x44] ss:$16 sps:$4 sm:$0xff]   ;;  %v6080_v7 = vld [vmem:[#allocation8 + $0x4c] ss:$16 sps:$4 sm:$0xff]  }
 0x717   :  { %2940 = vmatprep.subr.bf16.mxu0 %v6065_v56  ;;  %2981 = vmatprep.subr.bf16.mxu1 %v6068_v21  ;;  %6938 = vst [vmem:[#allocation46_spill] sm:$0xff] %v6077_v14  ;;  %6939 = vst [vmem:[#allocation47_spill] sm:$0xff] %v6080_v7  ;;  %v6083_v56 = vld [vmem:[#allocation8 + $0x40] ss:$16 sps:$4 sm:$0xff]   ;;  %v6086_v21 = vld [vmem:[#allocation8 + $0x48] ss:$16 sps:$4 sm:$0xff]  }
 0x718   :  { %6940 = vst [vmem:[#allocation48_spill] sm:$0xff] %v6083_v56  ;;  %6941 = vst [vmem:[#allocation49_spill] sm:$0xff] %v6086_v21 }
 0x71a   :  { %2941 = vmatpush1.bf16.msra.mxu0 %v6071_v4  ;;  %2982 = vmatpush1.bf16.msra.mxu1 %v6074_v50  ;;  %v6089_v4 = vld [vmem:[#allocation8 + $0x24] ss:$16 sps:$4 sm:$0xff]   ;;  %v6092_v50 = vld [vmem:[#allocation8 + $0x2c] ss:$16 sps:$4 sm:$0xff]  }
 0x71b   :  { %2942 = vmatprep.subr.bf16.mxu0 %v6077_v14  ;;  %2983 = vmatprep.subr.bf16.mxu1 %v6080_v7  ;;  %6942 = vst [vmem:[#allocation50_spill] sm:$0xff] %v6089_v4  ;;  %6943 = vst [vmem:[#allocation51_spill] sm:$0xff] %v6092_v50  ;;  %v6095_v14 = vld [vmem:[#allocation8 + $0x20] ss:$16 sps:$4 sm:$0xff]   ;;  %v6098_v7 = vld [vmem:[#allocation8 + $0x28] ss:$16 sps:$4 sm:$0xff]  }
 0x71c   :  { %6944 = vst [vmem:[#allocation52_spill] sm:$0xff] %v6095_v14  ;;  %6945 = vst [vmem:[#allocation53_spill] sm:$0xff] %v6098_v7 }
 0x71e   :  { %2943 = vmatpush1.bf16.msra.mxu0 %v6083_v56  ;;  %2984 = vmatpush1.bf16.msra.mxu1 %v6086_v21  ;;  %v6101_v56 = vld [vmem:[#allocation8 + $0x4] ss:$16 sps:$4 sm:$0xff]   ;;  %v6104_v21 = vld [vmem:[#allocation8 + $0xc] ss:$16 sps:$4 sm:$0xff]  }
 0x71f   :  { %2944 = vmatprep.subr.bf16.mxu0 %v6089_v4  ;;  %2985 = vmatprep.subr.bf16.mxu1 %v6092_v50  ;;  %6946 = vst [vmem:[#allocation54_spill] sm:$0xff] %v6101_v56  ;;  %6947 = vst [vmem:[#allocation55_spill] sm:$0xff] %v6104_v21  ;;  %v6107_v4 = vld [vmem:[#allocation8] ss:$16 sps:$4 sm:$0xff]   ;;  %v6110_v50 = vld [vmem:[#allocation8 + $0x8] ss:$16 sps:$4 sm:$0xff]  }
 0x720   :  { %6948 = vst [vmem:[#allocation56_spill] sm:$0xff] %v6107_v4  ;;  %6949 = vst [vmem:[#allocation57_spill] sm:$0xff] %v6110_v50 }
 0x722   :  { %2945 = vmatpush1.bf16.msra.mxu0 %v6095_v14  ;;  %2986 = vmatpush1.bf16.msra.mxu1 %v6098_v7  ;;  %v6113_v14 = vld [vmem:[#allocation6 + $0xe4] ss:$16 sps:$4 sm:$0xff]   ;;  %v6116_v7 = vld [vmem:[#allocation6 + $0xec] ss:$16 sps:$4 sm:$0xff]  }
 0x723   :  { %2946 = vmatprep.subr.bf16.mxu0 %v6101_v56  ;;  %2987 = vmatprep.subr.bf16.mxu1 %v6104_v21  ;;  %6950 = vst [vmem:[#allocation58_spill] sm:$0xff] %v6113_v14  ;;  %6951 = vst [vmem:[#allocation59_spill] sm:$0xff] %v6116_v7 }
 0x726   :  { %2947 = vmatpush1.bf16.msra.mxu0 %v6107_v4  ;;  %2988 = vmatpush1.bf16.msra.mxu1 %v6110_v50 }
 0x727   :  { %3014 = vmatprep.subr.bf16.mxu0 %v6113_v14  ;;  %3055 = vmatprep.subr.bf16.mxu1 %v6116_v7 }
 0x789   :  { %v2658_v56 = vpop.f32.mrf.mxu0  ;;  %v2699_v60 = vpop.f32.mrf.mxu1 }
 0x78b   :  { %v2660_v15 = vpop.f32.mrf.mxu0  ;;  %v2701_v21 = vpop.f32.mrf.mxu1 }
 0x78d   :  { %v2662_v44 = vpop.f32.mrf.mxu0  ;;  %v2703_v49 = vpop.f32.mrf.mxu1 }
 0x78f   :  { %v2663_v29 = vpop.f32.mrf.mxu0  ;;  %v2704_v4 = vpop.f32.mrf.mxu1 }
 0x7a9   :  { %v2740_v16 = vpop.f32.mrf.mxu0  ;;  %v2781_v10 = vpop.f32.mrf.mxu1 }
 0x7aa   :  { %v2741_v57 = vadd.f32 %v2740_v16, %v2658_v56  ;;  %v2782_v4 = vadd.f32 %v2781_v10, %v2699_v60  ;;  %v6953_v10 = vld [vmem:[#allocation94_spill] sm:$0xff] }
 0x7ab   :  { %v2742_v50 = vpop.f32.mrf.mxu0  ;;  %v2783_v63 = vpop.f32.mrf.mxu1 }
 0x7ac   :  { %v2788_v62 = vadd.f32 %v2741_v57, %v5119_v11  ;;  %v2743_v14 = vadd.f32 %v2742_v50, %v2660_v15  ;;  %v2784_v29 = vadd.f32 %v2783_v63, %v2701_v21  ;;  %v2790_v47 = vadd.f32 %v2782_v4, %v5134_v17 }
 0x7ad   :  { %v2744_v55 = vpop.f32.mrf.mxu0  ;;  %v2785_v12 = vpop.f32.mrf.mxu1 }
 0x7ae   :  { %v3709_v52 = vmul.f32 -1.442695, %v2788_v62  ;;  %v2789_v7 = vadd.f32 %v2743_v14, %v5123_v1  ;;  %v2791_v49 = vadd.f32 %v2784_v29, %v5129_v18 }
 0x7af   :  { %v2745_v51 = vpop.f32.mrf.mxu0  ;;  %v2786_v48 = vpop.f32.mrf.mxu1 }
 0x7b0   :  { %4114 = vpow2.f32 %v3709_v52  ;;  %v3710_v44 = vmul.f32 -1.442695, %v2789_v7  ;;  %v3711_v16 = vmul.f32 -1.442695, %v2791_v49  ;;  %v6952_v52 = vld [vmem:[#allocation92_spill] sm:$0xff] }
 0x7b2   :  { %4116 = vpow2.f32 %v3710_v44 }
 0x7b3   :  { %4118 = vpow2.f32 %v3711_v16 }
 0x7bd   :  { %v4115_v56 = vpop.eup %4114 }
 0x7be   :  { %v2795_v57 = vadd.f32 1.0, %v4115_v56 }
 0x7bf   :  { %v4117_v15 = vpop.eup %4116 }
 0x7c0   :  { %4120 = vrcp.f32 %v2795_v57  ;;  %v2801_v12 = vadd.f32 1.0, %v4117_v15  ;;  %v4119_v14 = vpop.eup %4118 }
 0x7c1   :  { %4122 = vtanh.f32 %v2790_v47  ;;  %v2808_v16 = vadd.f32 1.0, %v4119_v14 }
 0x7c2   :  { %4124 = vrcp.f32 %v2801_v12 }
 0x7c9   :  { %v2854_v51 = vpop.f32.mrf.mxu0  ;;  %v2895_v48 = vpop.f32.mrf.mxu1 }
 0x7ca   :  { %v2902_v55 = vadd.f32 %v2854_v51, %v6952_v52  ;;  %v6954_v51 = vld [vmem:[#allocation95_spill] sm:$0xff] }
 0x7cb   :  { %v2856_v62 = vpop.f32.mrf.mxu0  ;;  %v2897_v63 = vpop.f32.mrf.mxu1 }
 0x7cc   :  { %v3712_v7 = vmul.f32 -1.442695, %v2902_v55  ;;  %v2903_v60 = vadd.f32 %v2856_v62, %v6953_v10  ;;  %v2905_v52 = vadd.f32 %v2897_v63, %v6954_v51  ;;  %v6955_v55 = vld [vmem:[#allocation93_spill] sm:$0xff]  ;;  %v6958_v51 = vld [vmem:[#allocation30_spill] sm:$0xff] }
 0x7cd   :  { %v4121_v21 = vpop.eup %4120  ;;  %v2858_v50 = vpop.f32.mrf.mxu0  ;;  %v2904_v62 = vadd.f32 %v2895_v48, %v6955_v55  ;;  %v6960_v55 = vld [vmem:[#allocation32_spill] sm:$0xff] }
 0x7ce   :  { %v2899_v44 = vpop.f32.mrf.mxu1  ;;  %v4123_v29 = vpop.eup %4122  ;;  %4126 = vpow2.f32 %v3712_v7  ;;  %v3713_v49 = vmul.f32 -1.442695, %v2903_v60  ;;  %v3714_v10 = vmul.f32 -1.442695, %v2905_v52  ;;  %v6959_v52 = vld [vmem:[#allocation29_spill] sm:$0xff] }
 0x7cf   :  { %v4125_v4 = vpop.eup %4124  ;;  %v2859_v47 = vpop.f32.mrf.mxu0  ;;  %v2812_v57 = vmul.f32 %v4123_v29, %v4121_v21 }
 0x7d0   :  { %v2900_v56 = vpop.f32.mrf.mxu1  ;;  %v2811_v15 = vmul.f32 %v4125_v4, %v5880_v34  ;;  %4128 = vpow2.f32 %v3713_v49 }
 0x7d1   :  { %4130 = vrcp.f32 %v2808_v16 }
 0x7d2   :  { %v6126_v12 = vadd.f32 %v2812_v57, %v2811_v15  ;;  %v6957_v15 = vld [vmem:[#allocation27_spill] sm:$0xff] }
 0x7d4   :  { %4132 = vtanh.f32 %v6126_v12 }
 0x7d5   :  { %4134 = vtanh.f32 %v2904_v62  ;;  %v6961_v62 = vld [vmem:[#allocation31_spill] sm:$0xff] }
 0x7d6   :  { %4136 = vpow2.f32 %v3714_v10  ;;  %v6962_v10 = vld [vmem:[#allocation34_spill] sm:$0xff] }
 0x7db   :  { %v4127_v7 = vpop.eup %4126 }
 0x7dc   :  { %v2909_v60 = vadd.f32 1.0, %v4127_v7  ;;  %v6963_v7 = vld [vmem:[#allocation33_spill] sm:$0xff] }
 0x7dd   :  { %v4129_v14 = vpop.eup %4128 }
 0x7de   :  { %4138 = vrcp.f32 %v2909_v60  ;;  %v2915_v21 = vadd.f32 1.0, %v4129_v14  ;;  %v4131_v50 = vpop.eup %4130  ;;  %v6964_v60 = vld [vmem:[#allocation36_spill] sm:$0xff] }
 0x7e0   :  { %4140 = vrcp.f32 %v2915_v21 }
 0x7e1   :  { %v4133_v34 = vpop.eup %4132 }
 0x7e2   :  { %v2815_v44 = vmul.f32 %v4133_v34, %v4131_v50  ;;  %v4135_v48 = vpop.eup %4134 }
 0x7e3   :  { %v4137_v63 = vpop.eup %4136 }
 0x7e4   :  { %v2931_v29 = vpack.c.bf16 %v2815_v44, %v2815_v44  ;;  %v2922_v47 = vadd.f32 1.0, %v4137_v63  ;;  %v6979_v44 = vld [vmem:[#allocation24_spill] sm:$0xff]  ;;  %v6982_v63 = vld [vmem:[#allocation25_spill] sm:$0xff] }
 0x7e6   :  { %2965 = vmatmul.mubr.bf16.vlgmr.msra.gmra.mxu0 %v2931_v29  ;;  %3006 = vmatmul.mubr.bf16.vlgmr.msra.gmra.mxu1 %v2931_v29  ;;  %4142 = vrcp.f32 %v2922_v47  ;;  %v6980_v29 = vld [vmem:[#allocation23_spill] sm:$0xff] }
 0x7e7   :  { %3015 = vmatpush1.bf16.msra.mxu0 %v5885_v58  ;;  %3056 = vmatpush1.bf16.msra.mxu1 %v5888_v20  ;;  %v6986_v47 = vld [vmem:[#allocation39_spill] sm:$0xff] }
 0x7e8   :  { %3016 = vmatprep.subr.bf16.mxu0 %v5891_v6  ;;  %3057 = vmatprep.subr.bf16.mxu1 %v5894_v59 }
 0x7e9   :  { %3046 = vmatprep.mubr.bf16.mxu0 %v6587_v33  ;;  %3087 = vmatprep.mubr.bf16.mxu1 %v6587_v33 }
 0x7eb   :  { %v4139_v49 = vpop.eup %4138  ;;  %3017 = vmatpush1.bf16.msra.mxu0 %v5899_v24  ;;  %3058 = vmatpush1.bf16.msra.mxu1 %v5902_v45 }
 0x7ec   :  { %v2926_v4 = vmul.f32 %v4139_v49, %v4135_v48  ;;  %3018 = vmatprep.subr.bf16.mxu0 %v5905_v26  ;;  %3059 = vmatprep.subr.bf16.mxu1 %v5908_v2  ;;  %v6981_v48 = vld [vmem:[#allocation26_spill] sm:$0xff]  ;;  %v6983_v49 = vld [vmem:[#allocation35_spill] sm:$0xff] }
 0x7ed   :  { %v4141_v16 = vpop.eup %4140 }
 0x7ee   :  { %v2925_v56 = vmul.f32 %v4141_v16, %v5918_v3  ;;  %v6956_v3 = vld [vmem:[#allocation28_spill] sm:$0xff]  ;;  %v6985_v16 = vld [vmem:[#allocation38_spill] sm:$0xff] }
 0x7ef   :  { %3019 = vmatpush1.bf16.msra.mxu0 %v5912_v0  ;;  %3060 = vmatpush1.bf16.msra.mxu1 %v5915_v25 }
 0x7f0   :  { %v6144_v57 = vadd.f32 %v2926_v4, %v2925_v56  ;;  %3020 = vmatprep.subr.bf16.mxu0 %v5920_v53  ;;  %3061 = vmatprep.subr.bf16.mxu1 %v5923_v19  ;;  %v6984_v4 = vld [vmem:[#allocation37_spill] sm:$0xff]  ;;  %v6987_v56 = vld [vmem:[#allocation70_spill] sm:$0xff] }
 0x7f2   :  { %4144 = vtanh.f32 %v6144_v57 }
 0x7f3   :  { %3021 = vmatpush1.bf16.msra.mxu0 %v5927_v5  ;;  %3062 = vmatpush1.bf16.msra.mxu1 %v5930_v54  ;;  %v4143_v14 = vpop.eup %4142 }
 0x7f4   :  { %3022 = vmatprep.subr.bf16.mxu0 %v5933_v23  ;;  %3063 = vmatprep.subr.bf16.mxu1 %v6956_v3 }
 0x7f7   :  { %3023 = vmatpush1.bf16.msra.mxu0 %v6957_v15  ;;  %3064 = vmatpush1.bf16.msra.mxu1 %v6958_v51 }
 0x7f8   :  { %3024 = vmatprep.subr.bf16.mxu0 %v6959_v52  ;;  %3065 = vmatprep.subr.bf16.mxu1 %v6960_v55 }
 0x7fb   :  { %3025 = vmatpush1.bf16.msra.mxu0 %v6961_v62  ;;  %3066 = vmatpush1.bf16.msra.mxu1 %v6962_v10 }
 0x7fc   :  { %3026 = vmatprep.subr.bf16.mxu0 %v6963_v7  ;;  %3067 = vmatprep.subr.bf16.mxu1 %v6964_v60 }
 0x7ff   :  { %v4145_v21 = vpop.eup %4144  ;;  %3027 = vmatpush1.bf16.msra.mxu0 %v5963_v37  ;;  %3068 = vmatpush1.bf16.msra.mxu1 %v5966_v61 }
 0x800   :  { %3028 = vmatprep.subr.bf16.mxu0 %v5969_v9  ;;  %3069 = vmatprep.subr.bf16.mxu1 %v5972_v8  ;;  %v2929_v50 = vmul.f32 %v4145_v21, %v4143_v14  ;;  %v6988_v14 = vld [vmem:[#allocation75_spill] sm:$0xff]  ;;  %v6989_v21 = vld [vmem:[#allocation73_spill] sm:$0xff] }
 0x802   :  { %v2930_v34 = vpack.c.bf16 %v2929_v50, %v2929_v50  ;;  %v6990_v50 = vld [vmem:[#allocation71_spill] sm:$0xff] }
 0x803   :  { %3029 = vmatpush1.bf16.msra.mxu0 %v5975_v36  ;;  %3070 = vmatpush1.bf16.msra.mxu1 %v5978_v22 }
 0x804   :  { %3128 = vmatprep.subr.bf16.mxu0 %v5735_v27  ;;  %3169 = vmatprep.subr.bf16.mxu1 %v5738_v28  ;;  %v6965_v27 = vld [vmem:[#allocation78_spill] sm:$0xff]  ;;  %v6966_v28 = vld [vmem:[#allocation79_spill] sm:$0xff] }
 0x806   :  { %3047 = vmatmul.mubr.bf16.vlgmr.msra.gmra.mxu0 %v2930_v34  ;;  %3088 = vmatmul.mubr.bf16.vlgmr.msra.gmra.mxu1 %v2930_v34 }
 0x807   :  { %3129 = vmatpush1.bf16.msra.mxu0 %v5743_v30  ;;  %3170 = vmatpush1.bf16.msra.mxu1 %v5746_v31  ;;  %v6967_v30 = vld [vmem:[#allocation77_spill] sm:$0xff]  ;;  %v6968_v31 = vld [vmem:[#allocation80_spill] sm:$0xff] }
 0x808   :  { %3130 = vmatprep.subr.bf16.mxu0 %v5749_v13  ;;  %3171 = vmatprep.subr.bf16.mxu1 %v5752_v32  ;;  %v6969_v13 = vld [vmem:[#allocation82_spill] sm:$0xff]  ;;  %v6970_v32 = vld [vmem:[#allocation83_spill] sm:$0xff] }
 0x809   :  { %3160 = vmatprep.mubr.bf16.mxu0 %v6587_v33  ;;  %3201 = vmatprep.mubr.bf16.mxu1 %v6587_v33 }
 0x80b   :  { %3131 = vmatpush1.bf16.msra.mxu0 %v5757_v35  ;;  %3172 = vmatpush1.bf16.msra.mxu1 %v5760_v38  ;;  %v6971_v35 = vld [vmem:[#allocation81_spill] sm:$0xff]  ;;  %v6972_v38 = vld [vmem:[#allocation16_spill] sm:$0xff] }
 0x80c   :  { %3132 = vmatprep.subr.bf16.mxu0 %v5763_v39  ;;  %3173 = vmatprep.subr.bf16.mxu1 %v5766_v40  ;;  %v6973_v39 = vld [vmem:[#allocation18_spill] sm:$0xff]  ;;  %v6974_v40 = vld [vmem:[#allocation17_spill] sm:$0xff] }
 0x80f   :  { %3133 = vmatpush1.bf16.msra.mxu0 %v5769_v41  ;;  %3174 = vmatpush1.bf16.msra.mxu1 %v5772_v42  ;;  %v6975_v41 = vld [vmem:[#allocation20_spill] sm:$0xff]  ;;  %v6976_v42 = vld [vmem:[#allocation19_spill] sm:$0xff] }
 0x810   :  { %3134 = vmatprep.subr.bf16.mxu0 %v5775_v43  ;;  %3175 = vmatprep.subr.bf16.mxu1 %v5778_v46  ;;  %v6977_v43 = vld [vmem:[#allocation22_spill] sm:$0xff]  ;;  %v6978_v46 = vld [vmem:[#allocation21_spill] sm:$0xff] }
 0x813   :  { %3135 = vmatpush1.bf16.msra.mxu0 %v6965_v27  ;;  %3176 = vmatpush1.bf16.msra.mxu1 %v6966_v28  ;;  %v6991_v27 = vld [vmem:[#allocation74_spill] sm:$0xff]  ;;  %v6992_v28 = vld [vmem:[#allocation72_spill] sm:$0xff] }
 0x814   :  { %3136 = vmatprep.subr.bf16.mxu0 %v6967_v30  ;;  %3177 = vmatprep.subr.bf16.mxu1 %v6968_v31  ;;  %v6994_v30 = vld [vmem:[#allocation41_spill] sm:$0xff]  ;;  %v6995_v31 = vld [vmem:[#allocation84_spill] sm:$0xff] }
 0x817   :  { %3137 = vmatpush1.bf16.msra.mxu0 %v6969_v13  ;;  %3178 = vmatpush1.bf16.msra.mxu1 %v6970_v32  ;;  %v6996_v13 = vld [vmem:[#allocation86_spill] sm:$0xff]  ;;  %v6997_v32 = vld [vmem:[#allocation87_spill] sm:$0xff] }
 0x818   :  { %3138 = vmatprep.subr.bf16.mxu0 %v6971_v35  ;;  %3179 = vmatprep.subr.bf16.mxu1 %v6972_v38  ;;  %v6998_v35 = vld [vmem:[#allocation85_spill] sm:$0xff]  ;;  %v6999_v38 = vld [vmem:[#allocation42_spill] sm:$0xff] }
 0x81b   :  { %3139 = vmatpush1.bf16.msra.mxu0 %v6973_v39  ;;  %3180 = vmatpush1.bf16.msra.mxu1 %v6974_v40  ;;  %v7000_v39 = vld [vmem:[#allocation43_spill] sm:$0xff]  ;;  %v7001_v40 = vld [vmem:[#allocation44_spill] sm:$0xff] }
 0x81c   :  { %3140 = vmatprep.subr.bf16.mxu0 %v6975_v41  ;;  %3181 = vmatprep.subr.bf16.mxu1 %v6976_v42  ;;  %v7002_v41 = vld [vmem:[#allocation45_spill] sm:$0xff]  ;;  %v7003_v42 = vld [vmem:[#allocation46_spill] sm:$0xff] }
 0x81f   :  { %3141 = vmatpush1.bf16.msra.mxu0 %v6977_v43  ;;  %3182 = vmatpush1.bf16.msra.mxu1 %v6978_v46  ;;  %v7004_v43 = vld [vmem:[#allocation47_spill] sm:$0xff]  ;;  %v7005_v46 = vld [vmem:[#allocation48_spill] sm:$0xff] }
 0x820   :  { %3142 = vmatprep.subr.bf16.mxu0 %v6979_v44  ;;  %3183 = vmatprep.subr.bf16.mxu1 %v6980_v29  ;;  %v7006_v44 = vld [vmem:[#allocation49_spill] sm:$0xff]  ;;  %v7007_v29 = vld [vmem:[#allocation50_spill] sm:$0xff] }
 0x823   :  { %3143 = vmatpush1.bf16.msra.mxu0 %v6981_v48  ;;  %3184 = vmatpush1.bf16.msra.mxu1 %v6982_v63  ;;  %v7008_v48 = vld [vmem:[#allocation51_spill] sm:$0xff]  ;;  %v7009_v63 = vld [vmem:[#allocation52_spill] sm:$0xff] }
 0x824   :  { %3240 = vmatprep.subr.bf16.mxu0 %v6983_v49  ;;  %3281 = vmatprep.subr.bf16.mxu1 %v6984_v4  ;;  %v7010_v49 = vld [vmem:[#allocation53_spill] sm:$0xff]  ;;  %v7011_v4 = vld [vmem:[#allocation54_spill] sm:$0xff] }
 0x826   :  { %3161 = vmatmul.mubr.bf16.vlgmr.msra.gmra.mxu0 %v2930_v34  ;;  %3202 = vmatmul.mubr.bf16.vlgmr.msra.gmra.mxu1 %v2930_v34  ;;  %v6993_v34 = vld [vmem:[#allocation40_spill] sm:$0xff] }
 0x827   :  { %3241 = vmatpush1.bf16.msra.mxu0 %v6985_v16  ;;  %3282 = vmatpush1.bf16.msra.mxu1 %v6986_v47  ;;  %v7012_v16 = vld [vmem:[#allocation55_spill] sm:$0xff]  ;;  %v7013_v47 = vld [vmem:[#allocation56_spill] sm:$0xff] }
 0x828   :  { %3242 = vmatprep.subr.bf16.mxu0 %v6987_v56  ;;  %3283 = vmatprep.subr.bf16.mxu1 %v6988_v14  ;;  %v7014_v56 = vld [vmem:[#allocation57_spill] sm:$0xff]  ;;  %v7015_v14 = vld [vmem:[#allocation58_spill] sm:$0xff] }
 0x829   :  { %3272 = vmatprep.mubr.bf16.mxu0 %v6587_v33  ;;  %3313 = vmatprep.mubr.bf16.mxu1 %v6587_v33 }
 0x82b   :  { %3243 = vmatpush1.bf16.msra.mxu0 %v6989_v21  ;;  %3284 = vmatpush1.bf16.msra.mxu1 %v6990_v50  ;;  %v7016_v21 = vld [vmem:[#allocation59_spill] sm:$0xff] }
 0x82c   :  { %3244 = vmatprep.subr.bf16.mxu0 %v6991_v27  ;;  %3285 = vmatprep.subr.bf16.mxu1 %v6992_v28 }
 0x82f   :  { %3245 = vmatpush1.bf16.msra.mxu0 %v6993_v34  ;;  %3286 = vmatpush1.bf16.msra.mxu1 %v6994_v30 }
 0x830   :  { %3246 = vmatprep.subr.bf16.mxu0 %v6995_v31  ;;  %3287 = vmatprep.subr.bf16.mxu1 %v6996_v13 }
 0x833   :  { %3247 = vmatpush1.bf16.msra.mxu0 %v6997_v32  ;;  %3288 = vmatpush1.bf16.msra.mxu1 %v6998_v35 }
 0x834   :  { %3248 = vmatprep.subr.bf16.mxu0 %v6999_v38  ;;  %3289 = vmatprep.subr.bf16.mxu1 %v7000_v39 }
 0x837   :  { %3249 = vmatpush1.bf16.msra.mxu0 %v7001_v40  ;;  %3290 = vmatpush1.bf16.msra.mxu1 %v7002_v41 }
 0x838   :  { %3250 = vmatprep.subr.bf16.mxu0 %v7003_v42  ;;  %3291 = vmatprep.subr.bf16.mxu1 %v7004_v43 }
 0x83b   :  { %3251 = vmatpush1.bf16.msra.mxu0 %v7005_v46  ;;  %3292 = vmatpush1.bf16.msra.mxu1 %v7006_v44 }
 0x83c   :  { %3252 = vmatprep.subr.bf16.mxu0 %v7007_v29  ;;  %3293 = vmatprep.subr.bf16.mxu1 %v7008_v48 }
 0x83f   :  { %3253 = vmatpush1.bf16.msra.mxu0 %v7009_v63  ;;  %3294 = vmatpush1.bf16.msra.mxu1 %v7010_v49 }
 0x840   :  { %3254 = vmatprep.subr.bf16.mxu0 %v7011_v4  ;;  %3295 = vmatprep.subr.bf16.mxu1 %v7012_v16 }
 0x843   :  { %3255 = vmatpush1.bf16.msra.mxu0 %v7013_v47  ;;  %3296 = vmatpush1.bf16.msra.mxu1 %v7014_v56 }
 0x844   :  { %3322 = vmatprep.subr.bf16.mxu0 %v7015_v14  ;;  %3363 = vmatprep.subr.bf16.mxu1 %v7016_v21 }
 0x8a6   :  { %v2966_v50 = vpop.f32.mrf.mxu0  ;;  %v3007_v27 = vpop.f32.mrf.mxu1 }
 0x8a8   :  { %v2968_v28 = vpop.f32.mrf.mxu0  ;;  %v3009_v34 = vpop.f32.mrf.mxu1 }
 0x8aa   :  { %v2970_v30 = vpop.f32.mrf.mxu0  ;;  %v3011_v31 = vpop.f32.mrf.mxu1 }
 0x8ac   :  { %v2971_v13 = vpop.f32.mrf.mxu0  ;;  %v3012_v32 = vpop.f32.mrf.mxu1 }
 0x8c6   :  { %v3048_v35 = vpop.f32.mrf.mxu0  ;;  %v3089_v38 = vpop.f32.mrf.mxu1 }
 0x8c7   :  { %v3049_v39 = vadd.f32 %v3048_v35, %v2966_v50  ;;  %v3090_v56 = vadd.f32 %v3089_v38, %v3007_v27  ;;  %v7017_v35 = vld [vmem:[#allocation96_spill] sm:$0xff]  ;;  %v7018_v27 = vld [vmem:[#allocation98_spill] sm:$0xff] }
 0x8c8   :  { %v3050_v40 = vpop.f32.mrf.mxu0  ;;  %v3091_v41 = vpop.f32.mrf.mxu1 }
 0x8c9   :  { %v3096_v42 = vadd.f32 %v3049_v39, %v5119_v11  ;;  %v3051_v43 = vadd.f32 %v3050_v40, %v2968_v28  ;;  %v3092_v16 = vadd.f32 %v3091_v41, %v3009_v34  ;;  %v3098_v50 = vadd.f32 %v3090_v56, %v5134_v17 }
 0x8ca   :  { %v3052_v46 = vpop.f32.mrf.mxu0  ;;  %v3093_v44 = vpop.f32.mrf.mxu1 }
 0x8cb   :  { %v3715_v29 = vmul.f32 -1.442695, %v3096_v42  ;;  %v3097_v48 = vadd.f32 %v3051_v43, %v5123_v1  ;;  %v3099_v47 = vadd.f32 %v3092_v16, %v5129_v18 }
 0x8cc   :  { %v3053_v63 = vpop.f32.mrf.mxu0  ;;  %v3094_v49 = vpop.f32.mrf.mxu1 }
 0x8cd   :  { %4146 = vpow2.f32 %v3715_v29  ;;  %v3716_v4 = vmul.f32 -1.442695, %v3097_v48  ;;  %v3717_v14 = vmul.f32 -1.442695, %v3099_v47 }
 0x8cf   :  { %4148 = vpow2.f32 %v3716_v4 }
 0x8d0   :  { %4150 = vpow2.f32 %v3717_v14 }
 0x8da   :  { %v4147_v21 = vpop.eup %4146 }
 0x8db   :  { %v3103_v30 = vadd.f32 1.0, %v4147_v21  ;;  %v7019_v21 = vld [vmem:[#allocation99_spill] sm:$0xff] }
 0x8dc   :  { %v4149_v28 = vpop.eup %4148 }
 0x8dd   :  { %4152 = vrcp.f32 %v3103_v30  ;;  %v3109_v31 = vadd.f32 1.0, %v4149_v28  ;;  %v4151_v41 = vpop.eup %4150  ;;  %v7020_v30 = vld [vmem:[#allocation97_spill] sm:$0xff] }
 0x8de   :  { %4154 = vtanh.f32 %v3098_v50  ;;  %v3116_v49 = vadd.f32 1.0, %v4151_v41 }
 0x8df   :  { %4156 = vrcp.f32 %v3109_v31 }
 0x8e6   :  { %v3162_v13 = vpop.f32.mrf.mxu0  ;;  %v3203_v32 = vpop.f32.mrf.mxu1 }
 0x8e7   :  { %v3210_v39 = vadd.f32 %v3162_v13, %v7017_v35  ;;  %v3212_v28 = vadd.f32 %v3203_v32, %v7020_v30 }
 0x8e8   :  { %v3164_v40 = vpop.f32.mrf.mxu0  ;;  %v3205_v34 = vpop.f32.mrf.mxu1 }
 0x8e9   :  { %v3718_v42 = vmul.f32 -1.442695, %v3210_v39  ;;  %v3211_v38 = vadd.f32 %v3164_v40, %v7018_v27  ;;  %v3213_v50 = vadd.f32 %v3205_v34, %v7019_v21 }
 0x8ea   :  { %v4153_v43 = vpop.eup %4152  ;;  %v3166_v46 = vpop.f32.mrf.mxu0 }
 0x8eb   :  { %v3207_v44 = vpop.f32.mrf.mxu1  ;;  %v4155_v29 = vpop.eup %4154  ;;  %4158 = vpow2.f32 %v3718_v42  ;;  %v3719_v48 = vmul.f32 -1.442695, %v3211_v38  ;;  %v3720_v31 = vmul.f32 -1.442695, %v3213_v50 }
 0x8ec   :  { %v4157_v63 = vpop.eup %4156  ;;  %v3167_v4 = vpop.f32.mrf.mxu0  ;;  %v3120_v47 = vmul.f32 %v4155_v29, %v4153_v43 }
 0x8ed   :  { %v3208_v16 = vpop.f32.mrf.mxu1  ;;  %v3119_v56 = vmul.f32 %v4157_v63, %v6126_v12  ;;  %4160 = vpow2.f32 %v3719_v48 }
 0x8ee   :  { %4162 = vrcp.f32 %v3116_v49 }
 0x8ef   :  { %v6244_v14 = vadd.f32 %v3120_v47, %v3119_v56 }
 0x8f1   :  { %4164 = vtanh.f32 %v6244_v14 }
 0x8f2   :  { %4166 = vtanh.f32 %v3212_v28 }
 0x8f3   :  { %4168 = vpow2.f32 %v3720_v31 }
 0x8f8   :  { %v4159_v13 = vpop.eup %4158 }
 0x8f9   :  { %v3217_v35 = vadd.f32 1.0, %v4159_v13 }
 0x8fa   :  { %v4161_v39 = vpop.eup %4160 }
 0x8fb   :  { %4170 = vrcp.f32 %v3217_v35  ;;  %v3223_v40 = vadd.f32 1.0, %v4161_v39  ;;  %v4163_v41 = vpop.eup %4162 }
 0x8fd   :  { %4172 = vrcp.f32 %v3223_v40 }
 0x8fe   :  { %v4165_v12 = vpop.eup %4164 }
 0x8ff   :  { %v3123_v42 = vmul.f32 %v4165_v12, %v4163_v41  ;;  %v4167_v32 = vpop.eup %4166 }
 0x900   :  { %v4169_v34 = vpop.eup %4168 }
 0x901   :  { %v3239_v27 = vpack.c.bf16 %v3123_v42, %v3123_v42 }
 0x903   :  { %3273 = vmatmul.mubr.bf16.vlgmr.msra.gmra.mxu0 %v3239_v27  ;;  %3314 = vmatmul.mubr.bf16.vlgmr.msra.gmra.mxu1 %v3239_v27 }
 0x904   :  { %3323 = vmatpush1.bf16.msra.mxu0 %v5885_v58  ;;  %3364 = vmatpush1.bf16.msra.mxu1 %v5888_v20  ;;  %v3230_v20 = vadd.f32 1.0, %v4169_v34  ;;  %v3724_v34 = vld [vmem:[%s6301_s8] ss:$0 sm:$0xff] }
 0x905   :  { %3324 = vmatprep.subr.bf16.mxu0 %v5891_v6  ;;  %3365 = vmatprep.subr.bf16.mxu1 %v5894_v59 }
 0x906   :  { %3354 = vmatprep.mubr.bf16.mxu0 %v6587_v33  ;;  %3395 = vmatprep.mubr.bf16.mxu1 %v6587_v33  ;;  %4174 = vrcp.f32 %v3230_v20 }
 0x908   :  { %v4171_v38 = vpop.eup %4170  ;;  %3325 = vmatpush1.bf16.msra.mxu0 %v5899_v24  ;;  %3366 = vmatpush1.bf16.msra.mxu1 %v5902_v45 }
 0x909   :  { %v3234_v43 = vmul.f32 %v4171_v38, %v4167_v32  ;;  %3326 = vmatprep.subr.bf16.mxu0 %v5905_v26  ;;  %3367 = vmatprep.subr.bf16.mxu1 %v5908_v2  ;;  %v3930_v2 = vld [vmem:[#allocation9 + $0x38] sm:$0xff]  }
 0x90a   :  { %v4173_v58 = vpop.eup %4172 }
 0x90b   :  { %v3233_v6 = vmul.f32 %v4173_v58, %v6144_v57 }
 0x90c   :  { %3327 = vmatpush1.bf16.msra.mxu0 %v5912_v0  ;;  %3368 = vmatpush1.bf16.msra.mxu1 %v5915_v25  ;;  %v4503_v0 = vmov 0.0   ;;  %v3931_v25 = vld [vmem:[#allocation9 + $0x30] sm:$0xff]  }
 0x90d   :  { %v3235_v33 = vadd.f32 %v3234_v43, %v3233_v6  ;;  %3328 = vmatprep.subr.bf16.mxu0 %v5920_v53  ;;  %3369 = vmatprep.subr.bf16.mxu1 %v5923_v19  ;;  %v3932_v53 = vld [vmem:[#allocation9 + $0x28] sm:$0xff]   ;;  %v3933_v19 = vld [vmem:[#allocation9 + $0x20] sm:$0xff]  }
 0x90f   :  { %4176 = vtanh.f32 %v3235_v33 }
 0x910   :  { %3329 = vmatpush1.bf16.msra.mxu0 %v5927_v5  ;;  %3370 = vmatpush1.bf16.msra.mxu1 %v5930_v54  ;;  %v3934_v5 = vld [vmem:[#allocation9 + $0x18] sm:$0xff]   ;;  %v3935_v54 = vld [vmem:[#allocation9 + $0x10] sm:$0xff]  }
 0x911   :  { %3330 = vmatprep.subr.bf16.mxu0 %v5933_v23  ;;  %3371 = vmatprep.subr.bf16.mxu1 %v6956_v3  ;;  %v3936_v23 = vld [vmem:[#allocation9 + $0x8] sm:$0xff]  }
 0x913   :  { %v4175_v59 = vpop.eup %4174 }
 0x914   :  { %3331 = vmatpush1.bf16.msra.mxu0 %v6957_v15  ;;  %3372 = vmatpush1.bf16.msra.mxu1 %v6958_v51 }
 0x915   :  { %3332 = vmatprep.subr.bf16.mxu0 %v6959_v52  ;;  %3373 = vmatprep.subr.bf16.mxu1 %v6960_v55 }
 0x918   :  { %3333 = vmatpush1.bf16.msra.mxu0 %v6961_v62  ;;  %3374 = vmatpush1.bf16.msra.mxu1 %v6962_v10 }
 0x919   :  { %3334 = vmatprep.subr.bf16.mxu0 %v6963_v7  ;;  %3375 = vmatprep.subr.bf16.mxu1 %v6964_v60 }
 0x91c   :  { %v4177_v24 = vpop.eup %4176  ;;  %3335 = vmatpush1.bf16.msra.mxu0 %v5963_v37  ;;  %3376 = vmatpush1.bf16.msra.mxu1 %v5966_v61 }
 0x91d   :  { %3336 = vmatprep.subr.bf16.mxu0 %v5969_v9  ;;  %3377 = vmatprep.subr.bf16.mxu1 %v5972_v8  ;;  %v3237_v45 = vmul.f32 %v4177_v24, %v4175_v59 }
 0x91f   :  { %v3238_v26 = vpack.c.bf16 %v3237_v45, %v3237_v45 }
 0x920   :  { %3337 = vmatpush1.bf16.msra.mxu0 %v5975_v36  ;;  %3378 = vmatpush1.bf16.msra.mxu1 %v5978_v22  ;;  %v3937_v22 = vld [vmem:[#allocation9] sm:$0xff]  }
 0x921   :  { %3742 = vmatprep.subr.bf16.mxu0 %v4503_v0 }
 0x923   :  { %3355 = vmatmul.mubr.bf16.vlgmr.msra.gmra.mxu0 %v3238_v26  ;;  %3396 = vmatmul.mubr.bf16.vlgmr.msra.gmra.mxu1 %v3238_v26 }
 0x924   :  { %3743 = vmatpush3.bf16.msra.mxu0 %v3930_v2  ;;  %3758 = vmatprep.mubr.msk.bf16.mxu0 %vm4504_vm2, %v4503_v0 }
 0x925   :  { %3744 = vmatprep.subr.bf16.mxu0 %v4503_v0 }
 0x928   :  { %3745 = vmatpush3.bf16.msra.mxu0 %v3931_v25 }
 0x929   :  { %3746 = vmatprep.subr.bf16.mxu0 %v4503_v0 }
 0x92c   :  { %3747 = vmatpush3.bf16.msra.mxu0 %v3932_v53 }
 0x92d   :  { %3748 = vmatprep.subr.bf16.mxu0 %v4503_v0 }
 0x930   :  { %3749 = vmatpush3.bf16.msra.mxu0 %v3933_v19 }
 0x931   :  { %3750 = vmatprep.subr.bf16.mxu0 %v4503_v0 }
 0x934   :  { %3751 = vmatpush3.bf16.msra.mxu0 %v3934_v5 }
 0x935   :  { %3752 = vmatprep.subr.bf16.mxu0 %v4503_v0 }
 0x938   :  { %3753 = vmatpush3.bf16.msra.mxu0 %v3935_v54 }
 0x939   :  { %3754 = vmatprep.subr.bf16.mxu0 %v4503_v0 }
 0x93c   :  { %3755 = vmatpush3.bf16.msra.mxu0 %v3936_v23 }
 0x93d   :  { %3756 = vmatprep.subr.bf16.mxu0 %v4503_v0 }
 0x940   :  { %3757 = vmatpush3.bf16.msra.mxu0 %v3937_v22 }
 0x9c3   :  { %v3274_v36 = vpop.f32.mrf.mxu0  ;;  %v3315_v37 = vpop.f32.mrf.mxu1 }
 0x9c5   :  { %v3276_v61 = vpop.f32.mrf.mxu0  ;;  %v3317_v9 = vpop.f32.mrf.mxu1 }
 0x9c7   :  { %v3278_v8 = vpop.f32.mrf.mxu0  ;;  %v3319_v57 = vpop.f32.mrf.mxu1 }
 0x9c9   :  { %v3279_v3 = vpop.f32.mrf.mxu0  ;;  %v3320_v15 = vpop.f32.mrf.mxu1 }
 0x9e3   :  { %v3356_v51 = vpop.f32.mrf.mxu0  ;;  %v3397_v52 = vpop.f32.mrf.mxu1 }
 0x9e4   :  { %v3357_v55 = vadd.f32 %v3356_v51, %v3274_v36  ;;  %v3398_v56 = vadd.f32 %v3397_v52, %v3315_v37 }
 0x9e5   :  { %v3358_v62 = vpop.f32.mrf.mxu0  ;;  %v3399_v10 = vpop.f32.mrf.mxu1 }
 0x9e6   :  { %v3404_v7 = vadd.f32 %v3357_v55, %v5119_v11  ;;  %v3359_v60 = vadd.f32 %v3358_v62, %v3276_v61  ;;  %v3400_v16 = vadd.f32 %v3399_v10, %v3317_v9  ;;  %v3406_v30 = vadd.f32 %v3398_v56, %v5134_v17 }
 0x9e7   :  { %v3360_v46 = vpop.f32.mrf.mxu0  ;;  %v3401_v44 = vpop.f32.mrf.mxu1 }
 0x9e8   :  { %v3721_v29 = vmul.f32 -1.442695, %v3404_v7  ;;  %v3405_v48 = vadd.f32 %v3359_v60, %v5123_v1  ;;  %v3407_v47 = vadd.f32 %v3400_v16, %v5129_v18 }
 0x9e9   :  { %v3361_v63 = vpop.f32.mrf.mxu0  ;;  %v3402_v49 = vpop.f32.mrf.mxu1 }
 0x9ea   :  { %4178 = vpow2.f32 %v3721_v29  ;;  %v3722_v4 = vmul.f32 -1.442695, %v3405_v48  ;;  %v3723_v21 = vmul.f32 -1.442695, %v3407_v47 }
 0x9ec   :  { %4180 = vpow2.f32 %v3722_v4 }
 0x9ed   :  { %4182 = vpow2.f32 %v3723_v21 }
 0x9f7   :  { %v4179_v50 = vpop.eup %4178 }
 0x9f8   :  { %v3411_v11 = vadd.f32 1.0, %v4179_v50 }
 0x9f9   :  { %v4181_v28 = vpop.eup %4180 }
 0x9fa   :  { %4184 = vrcp.f32 %v3411_v11  ;;  %v3417_v31 = vadd.f32 1.0, %v4181_v28  ;;  %v4183_v1 = vpop.eup %4182 }
 0x9fb   :  { %4186 = vtanh.f32 %v3406_v30  ;;  %v3424_v40 = vadd.f32 1.0, %v4183_v1 }
 0x9fc   :  { %4188 = vrcp.f32 %v3417_v31 }
 0x9fd   :  { %4190 = vrcp.f32 %v3424_v40 }
 0xa07   :  { %v4185_v13 = vpop.eup %4184 }
 0xa08   :  { %v4187_v35 = vpop.eup %4186 }
 0xa09   :  { %v4189_v39 = vpop.eup %4188  ;;  %v3428_v41 = vmul.f32 %v4187_v35, %v4185_v13 }
 0xa0a   :  { %v3427_v18 = vmul.f32 %v4189_v39, %v6244_v14  ;;  %v4191_v42 = vpop.eup %4190 }
 0xa0c   :  { %v3429_v12 = vadd.f32 %v3428_v41, %v3427_v18 }
 0xa0e   :  { %4192 = vtanh.f32 %v3429_v12 }
 0xa1b   :  { %v4193_v17 = vpop.eup %4192 }
 0xa1c   :  { %v3431_v27 = vmul.f32 %v4193_v17, %v4191_v42 }
 0xa1e   :  { %v3432_v32 = vpack.c.bf16 %v3431_v27, %v3431_v27 }
 0xa20   :  { %3759 = vmatmul.mubr.bf16.vlgmr.msra.gmra.mxu0 %v3432_v32 }
 0xae0   :  { %v3538_v38 = vpop.f32.mrf.mxu0 }
 0xae1   :  { %v3539_v43 = vadd.f32 %v3724_v34, %v3538_v38 }
 0xae2   :  { %v3760_v58 = vpop.f32.mrf.mxu0 }
 0xae3   :  { %3544 = vst [vmem:[#allocation11] sm:$0xff] %v3539_v43 }
 0xae4   :  { %v3541_v14 = vpop.f32.mrf.mxu0 }
 0xae5   :  { %4477 = shalt.err (!%p4474_p10)
}
 0xae6   :  { %3554 = dma.vmem_to_hbm [thread:$0]  %s3552_s18, 128, %s6302_s9, [#allocation5]   ;;  %v3761_v20 = vpop.f32.mrf.mxu0 }
 0xae7   :  { %4492 = dma.done.wait [#allocation5], 128  }
 0xae8   :  { %4493 = vsyncadd [#allocation5], 4294967168 }
 0xae9   :  { %3558 = vsyncpa [#allocation4], 1 }
 0xaea   :  { %3559 = vsyncpa [#allocation7], 1 }
 0xaeb   :  { %3560 = vsyncpa [#allocation10], 1 }
 0xaec   :  { %3561 = vsyncpa [#allocation5], 1 }

</bundles_post_ra>
